<compile_context>
chip_gen: v6e
topology: v6e:2x2x1
jax: 0.10.0
libtpu: 0.0.40
codegen_flags: <defaults>
</compile_context>

<pallas_src>
import functools

import jax
import jax.numpy as jnp
from jax.experimental import pallas as pl
from jax.experimental.pallas import tpu as pltpu

_EPS = 1e-5
_VMEM_LIMIT = 48 * 1024 * 1024   # fits every generation (v7x physical = 64 MiB)

# Matmul tile preferences (multiples of 256 for the 2x256x256 MXU on v6e/v7x,
# small enough to double-buffer comfortably inside v7x's 64 MiB VMEM).
_TM_MM = 512
_TN_MM = 256
_TK_MM = 512

_TM_EW = 512                     # row tile for the HBM-bound elementwise kernels


# ----------------------------------------------------------------------------
# Pallas kernels
# ----------------------------------------------------------------------------
def _mm_stats_kernel(a_ref, b_ref, o_ref, sum_ref, ssq_ref, acc_ref,
                     *, m_total, tm, tn, ragged_m):
    """C = A @ B (bf16 operands, f32 accumulation) + per-tile BN statistics."""
    # All grid-position primitives are bound here (kernel top level); only the
    # resulting *values* are closed over by the pl.when bodies below.
    k = pl.program_id(2)
    last_k = pl.num_programs(2) - 1
    row0 = pl.program_id(0) * tm

    @pl.when(k == 0)
    def _():
        acc_ref[...] = jnp.zeros_like(acc_ref)

    acc_ref[...] += jnp.dot(a_ref[...], b_ref[...],
                            preferred_element_type=jnp.float32)

    @pl.when(k == last_k)
    def _():
        acc = acc_ref[...]
        o_ref[...] = acc.astype(o_ref.dtype)
        if ragged_m:
            # Mask rows beyond the real M extent (ragged last M tile) so they
            # do not pollute the BatchNorm statistics.
            row = row0 + jax.lax.broadcasted_iota(jnp.int32, (tm, 1), 0)
            acc = jnp.where(row < m_total, acc, 0.0)
        s = jnp.sum(acc, axis=0).reshape(1, 1, tn)
        q = jnp.sum(acc * acc, axis=0).reshape(1, 1, tn)
        sum_ref[...] = jnp.broadcast_to(s, (1, 8, tn))
        ssq_ref[...] = jnp.broadcast_to(q, (1, 8, tn))


def _scale_shift_relu_kernel(x_ref, s_ref, b_ref, o_ref):
    y = x_ref[...].astype(jnp.float32) * s_ref[...] + b_ref[...]
    o_ref[...] = jnp.maximum(y, 0.0).astype(o_ref.dtype)


def _residual_kernel(y_ref, sy_ref, by_ref, r_ref, sr_ref, br_ref, o_ref):
    # relu( relu(bn3(conv3)) + bn_proj(proj-or-identity) )
    y = jnp.maximum(
        y_ref[...].astype(jnp.float32) * sy_ref[...] + by_ref[...], 0.0)
    r = r_ref[...].astype(jnp.float32) * sr_ref[...] + br_ref[...]
    o_ref[...] = jnp.maximum(y + r, 0.0).astype(o_ref.dtype)


# ----------------------------------------------------------------------------
# Tile pickers / small helpers
# ----------------------------------------------------------------------------
def _pick_tk(k, pref=_TK_MM):
    if k <= pref:
        return k
    for cand in (pref, 384, 256, 128):      # all multiples of 128
        if k % cand == 0:
            return cand
    return k       # untiled K still fits VMEM for any realistic conv shape


def _pick_tn(n, pref=_TN_MM):
    if n <= pref:
        return n
    for cand in (pref, 128):
        if n % cand == 0:
            return cand
    return n


def _lane_group(m, c):
    """Group rows so the elementwise lane dim is >= 128 (unmasked stores)."""
    g = 1
    while c * g < 128 and m % (g * 2) == 0:
        g *= 2
    return g


# ----------------------------------------------------------------------------
# Pallas wrappers
# ----------------------------------------------------------------------------
def pallas_matmul_stats(a, b, out_dtype=jnp.float32):
    """(M, K) @ (K, N) on the MXU in bf16 with an f32 VMEM accumulator.

    Returns (out, psum, pssq), where psum/pssq hold per-M-tile partial
    channel sums / sums-of-squares (pad rows excluded) for BatchNorm.
    """
    m, k = a.shape
    _, n = b.shape
    a = a.astype(jnp.bfloat16)
    b = b.astype(jnp.bfloat16)

    tm = m if m <= _TM_MM else _TM_MM
    tn = _pick_tn(n)
    tk = _pick_tk(k)
    nm, nn, nk = pl.cdiv(m, tm), pl.cdiv(n, tn), pl.cdiv(k, tk)

    kernel = functools.partial(_mm_stats_kernel, m_total=m, tm=tm, tn=tn,
                               ragged_m=(m % tm != 0))
    out, psum, pssq = pl.pallas_call(
        kernel,
        out_shape=(jax.ShapeDtypeStruct((m, n), out_dtype),
                   jax.ShapeDtypeStruct((nm, 8, n), jnp.float32),
                   jax.ShapeDtypeStruct((nm, 8, n), jnp.float32)),
        grid=(nm, nn, nk),
        in_specs=[pl.BlockSpec((tm, tk), lambda i, j, kk: (i, kk)),
                  pl.BlockSpec((tk, tn), lambda i, j, kk: (kk, j))],
        out_specs=(pl.BlockSpec((tm, tn), lambda i, j, kk: (i, j)),
                   pl.BlockSpec((1, 8, tn), lambda i, j, kk: (i, 0, j)),
                   pl.BlockSpec((1, 8, tn), lambda i, j, kk: (i, 0, j))),
        scratch_shapes=[pltpu.VMEM((tm, tn), jnp.float32)],
        compiler_params=pltpu.CompilerParams(
            dimension_semantics=("parallel", "parallel", "arbitrary"),
            vmem_limit_bytes=_VMEM_LIMIT),
    )(a, b)
    return out, psum, pssq


def _bn_scale_shift(psum, pssq, count, gamma, beta):
    """Fold batch statistics into per-channel scale/shift (training-mode BN)."""
    s = jnp.sum(psum[:, 0, :], axis=0)
    q = jnp.sum(pssq[:, 0, :], axis=0)
    mean = s / count
    var = jnp.maximum(q / count - mean * mean, 0.0)      # biased, like PyTorch
    scale = gamma.astype(jnp.float32) * jax.lax.rsqrt(var + _EPS)
    shift = beta.astype(jnp.float32) - mean * scale
    return scale, shift


def pallas_bn_relu(x, scale, shift, out_dtype=jnp.bfloat16):
    """y = relu(x * scale + shift), lane-dense row-tiled."""
    m, c = x.shape
    g = _lane_group(m, c)
    mg, cg = m // g, g * c
    xg = x.reshape(mg, cg)
    sg = jnp.tile(scale.astype(jnp.float32), g).reshape(1, cg)
    bg = jnp.tile(shift.astype(jnp.float32), g).reshape(1, cg)
    tm = mg if mg <= _TM_EW else _TM_EW
    out = pl.pallas_call(
        _scale_shift_relu_kernel,
        out_shape=jax.ShapeDtypeStruct((mg, cg), out_dtype),
        grid=(pl.cdiv(mg, tm),),
        in_specs=[pl.BlockSpec((tm, cg), lambda i: (i, 0)),
                  pl.BlockSpec((1, cg), lambda i: (0, 0)),
                  pl.BlockSpec((1, cg), lambda i: (0, 0))],
        out_specs=pl.BlockSpec((tm, cg), lambda i: (i, 0)),
        compiler_params=pltpu.CompilerParams(
            dimension_semantics=("parallel",),
            vmem_limit_bytes=_VMEM_LIMIT),
    )(xg, sg, bg)
    return out.reshape(m, c)


def pallas_residual(y, sy, by, r, sr, br):
    """relu( relu(y*sy+by) + (r*sr+br) ): fused BN3+ReLU+residual+BNproj+ReLU."""
    m, c = y.shape
    g = _lane_group(m, c)
    mg, cg = m // g, g * c
    yg = y.reshape(mg, cg)
    rg = r.reshape(mg, cg)
    tile = lambda v: jnp.tile(v.astype(jnp.float32), g).reshape(1, cg)
    tm = mg if mg <= _TM_EW else _TM_EW
    out = pl.pallas_call(
        _residual_kernel,
        out_shape=jax.ShapeDtypeStruct((mg, cg), jnp.float32),
        grid=(pl.cdiv(mg, tm),),
        in_specs=[pl.BlockSpec((tm, cg), lambda i: (i, 0)),
                  pl.BlockSpec((1, cg), lambda i: (0, 0)),
                  pl.BlockSpec((1, cg), lambda i: (0, 0)),
                  pl.BlockSpec((tm, cg), lambda i: (i, 0)),
                  pl.BlockSpec((1, cg), lambda i: (0, 0)),
                  pl.BlockSpec((1, cg), lambda i: (0, 0))],
        out_specs=pl.BlockSpec((tm, cg), lambda i: (i, 0)),
        compiler_params=pltpu.CompilerParams(
            dimension_semantics=("parallel",),
            vmem_limit_bytes=_VMEM_LIMIT),
    )(yg, tile(sy), tile(by), rg, tile(sr), tile(br))
    return out.reshape(m, c)


# ----------------------------------------------------------------------------
# im2col glue (plain JAX, bf16)
# ----------------------------------------------------------------------------
def _im2col_temporal(x, kt):
    # (N, D, H, W, C) -> (N, Do, H, W, kt*C); temporal padding kt//2.
    pad = kt // 2
    n, d, h, w, c = x.shape
    xp = jnp.pad(x, ((0, 0), (pad, pad), (0, 0), (0, 0), (0, 0)))
    do = d + 2 * pad - kt + 1
    cols = [xp[:, t:t + do] for t in range(kt)]
    return jnp.concatenate(cols, axis=-1), do


# TODO(synk): conv2 still materializes bf16 im2col patches (9x activation
# traffic); a tap-wise direct conv over strided NDHWC slices needs
# Element / manual-DMA BlockSpecs and is left for a follow-up.
def _im2col_3x3(x, stride):
    # (N, D, H, W, C) -> (N, D, Ho, Wo, 9*C); spatial padding 1, stride s.
    n, d, h, w, c = x.shape
    xp = jnp.pad(x, ((0, 0), (0, 0), (1, 1), (1, 1), (0, 0)))
    ho = (h + 2 - 3) // stride + 1
    wo = (w + 2 - 3) // stride + 1
    cols = []
    for kh in range(3):
        for kw in range(3):
            cols.append(xp[:, :,
                           kh:kh + (ho - 1) * stride + 1:stride,
                           kw:kw + (wo - 1) * stride + 1:stride, :])
    return jnp.concatenate(cols, axis=-1), ho, wo


# ----------------------------------------------------------------------------
# Full residual block forward (matches PyTorch module semantics)
# ----------------------------------------------------------------------------
def resnet_block_forward(x_ncdhw, params, temp_kernel_size, stride):
    n, cin, d, h, w = x_ncdhw.shape
    kt = temp_kernel_size
    # Channels-last bf16 activations feed the MXU directly.
    x = jnp.transpose(x_ncdhw, (0, 2, 3, 4, 1)).astype(jnp.bfloat16)   # NDHWC

    # conv1: (kt,1,1), pad (kt//2,0,0) -> BN -> ReLU
    w1 = params["w1"]                                    # (cmid, cin, kt, 1, 1)
    cmid = w1.shape[0]
    patches, do = _im2col_temporal(x, kt)
    a1 = patches.reshape(-1, kt * cin)
    b1 = jnp.transpose(w1[:, :, :, 0, 0], (2, 1, 0)).reshape(kt * cin, cmid)
    y1, s1, q1 = pallas_matmul_stats(a1, b1, out_dtype=jnp.bfloat16)
    sc1, sh1 = _bn_scale_shift(s1, q1, a1.shape[0], params["g1"], params["b1"])
    y1 = pallas_bn_relu(y1, sc1, sh1).reshape(n, do, h, w, cmid)

    # conv2: (1,3,3), stride (1,s,s), pad (0,1,1) -> BN -> ReLU
    w2 = params["w2"]                                    # (cmid, cmid, 1, 3, 3)
    patches, ho, wo = _im2col_3x3(y1, stride)
    a2 = patches.reshape(-1, 9 * cmid)
    b2 = jnp.transpose(w2[:, :, 0, :, :], (2, 3, 1, 0)).reshape(9 * cmid, cmid)
    y2, s2, q2 = pallas_matmul_stats(a2, b2, out_dtype=jnp.bfloat16)
    sc2, sh2 = _bn_scale_shift(s2, q2, a2.shape[0], params["g2"], params["b2"])
    y2 = pallas_bn_relu(y2, sc2, sh2)                    # (M, cmid) bf16

    # conv3: (1,1,1) -> BN   (its ReLU is fused into the residual epilogue)
    w3 = params["w3"]                                    # (cout, cmid, 1, 1, 1)
    cout = w3.shape[0]
    b3 = jnp.transpose(w3[:, :, 0, 0, 0], (1, 0))
    y3, s3, q3 = pallas_matmul_stats(y2, b3)             # f32 out (epilogue)
    sc3, sh3 = _bn_scale_shift(s3, q3, y2.shape[0], params["g3"], params["b3"])

    # projection branch (1x1x1, stride (1,s,s)) -> BN, or raw identity
    if "wp" in params:
        idn = x[:, :, ::stride, ::stride, :].reshape(-1, cin)
        bp = jnp.transpose(params["wp"][:, :, 0, 0, 0], (1, 0))
        r, sp, qp = pallas_matmul_stats(idn, bp)         # f32 out (epilogue)
        scp, shp = _bn_scale_shift(sp, qp, idn.shape[0],
                                   params["gp"], params["bp"])
    else:
        r = x.reshape(-1, cin)                           # cin == cout here
        scp = jnp.ones((cout,), jnp.float32)
        shp = jnp.zeros((cout,), jnp.float32)

    # Fused: relu( relu(bn3(conv3)) + bn_proj(proj-or-identity) )
    out = pallas_residual(y3, sc3, sh3, r, scp, shp)
    out = out.reshape(n, do, ho, wo, cout)
    return jnp.transpose(out, (0, 4, 1, 2, 3))           # back to NCDHW


# ----------------------------------------------------------------------------
# Pure-JAX reference (mirrors the PyTorch forward) for verification
# ----------------------------------------------------------------------------
def _ref_forward(x, params, kt, stride):
    def conv(xx, ww, strides, padding):
        return jax.lax.conv_general_dilated(
            xx, ww, window_strides=strides,
            padding=[(p, p) for p in padding],
            dimension_numbers=("NCDHW", "OIDHW", "NCDHW"),
            precision=jax.lax.Precision.HIGHEST)

    def bn(xx, g, b):
        mean = jnp.mean(xx, axis=(0, 2, 3, 4), keepdims=True)
        var = jnp.mean((xx - mean) ** 2, axis=(0, 2, 3, 4), keepdims=True)
        xn = (xx - mean) / jnp.sqrt(var + _EPS)
        return xn * g.reshape(1, -1, 1, 1, 1) + b.reshape(1, -1, 1, 1, 1)

    y = conv(x, params["w1"], (1, 1, 1), (kt // 2, 0, 0))
    y = jax.nn.relu(bn(y, params["g1"], params["b1"]))
    y = conv(y, params["w2"], (1, stride, stride), (0, 1, 1))
    y = jax.nn.relu(bn(y, params["g2"], params["b2"]))
    y = conv(y, params["w3"], (1, 1, 1), (0, 0, 0))
    y = jax.nn.relu(bn(y, params["g3"], params["b3"]))
    if "wp" in params:
        idn = conv(x, params["wp"], (1, stride, stride), (0, 0, 0))
        idn = bn(idn, params["gp"], params["bp"])
    else:
        idn = x
    return jax.nn.relu(y + idn)


# ----------------------------------------------------------------------------
if __name__ == "__main__":
    key = jax.random.PRNGKey(0)
    ks = jax.random.split(key, 10)

    def make_params(cin, cmid, cout, kt, with_proj, keys):
        p = {
            "w1": 0.1 * jax.random.normal(keys[0], (cmid, cin, kt, 1, 1),
                                          jnp.float32),
            "g1": jnp.ones((cmid,), jnp.float32),
            "b1": jnp.zeros((cmid,), jnp.float32),
            "w2": 0.1 * jax.random.normal(keys[1], (cmid, cmid, 1, 3, 3),
                                          jnp.float32),
            "g2": jnp.ones((cmid,), jnp.float32),
            "b2": jnp.zeros((cmid,), jnp.float32),
            "w3": 0.1 * jax.random.normal(keys[2], (cout, cmid, 1, 1, 1),
                                          jnp.float32),
            "g3": jnp.ones((cout,), jnp.float32),
            "b3": jnp.zeros((cout,), jnp.float32),
        }
        if with_proj:
            p["wp"] = 0.1 * jax.random.normal(keys[3], (cout, cin, 1, 1, 1),
                                              jnp.float32)
            p["gp"] = jnp.ones((cout,), jnp.float32)
            p["bp"] = jnp.zeros((cout,), jnp.float32)
        return p

    def check(x, params, kt, stride):
        fwd = jax.jit(functools.partial(resnet_block_forward,
                                        temp_kernel_size=kt, stride=stride))
        out = jax.block_until_ready(fwd(x, params))
        ref = jax.block_until_ready(_ref_forward(x, params, kt, stride))
        assert out.shape == ref.shape, (out.shape, ref.shape)
        err = float(jnp.max(jnp.abs(out - ref)))
        # bf16 MXU operands vs f32 reference -> loose-but-bug-catching tolerance
        assert jnp.allclose(out, ref, atol=5e-2, rtol=5e-2), err

    # Case 1: projection branch (Cin != Cout, stride 2).
    N, Cin, Cmid, Cout, D, H, W = 2, 4, 4, 8, 4, 8, 8
    kt, stride = 3, 2
    params = make_params(Cin, Cmid, Cout, kt, True, ks[0:4])
    x = jax.random.normal(ks[4], (N, Cin, D, H, W), jnp.float32)
    check(x, params, kt, stride)

    # Case 2: plain identity shortcut (Cin == Cout, stride 1).
    Cin2, Cmid2, Cout2 = 8, 4, 8
    params2 = make_params(Cin2, Cmid2, Cout2, kt, False, ks[5:9])
    x2 = jax.random.normal(ks[9], (N, Cin2, D, H, W), jnp.float32)
    check(x2, params2, kt, 1)

    print("KERNEL_OK")
</pallas_src>

<mosaic_0001>
module attributes {stable_mosaic.version = 11 : i64} {
  func.func @_mm_stats_kernel(%arg0: i32, %arg1: i32, %arg2: i32, %arg3: memref<128x4xbf16, #tpu.memory_space<vmem>>, %arg4: memref<4x8xbf16, #tpu.memory_space<vmem>>, %arg5: memref<128x8xf32, #tpu.memory_space<vmem>>, %arg6: memref<1x8x8xf32, #tpu.memory_space<vmem>>, %arg7: memref<1x8x8xf32, #tpu.memory_space<vmem>>, %arg8: memref<128x8xf32, #tpu.memory_space<vmem>>) attributes {dimension_semantics = [#tpu.dimension_semantics<parallel>, #tpu.dimension_semantics<parallel>, #tpu.dimension_semantics<arbitrary>], iteration_bounds = array<i64: 1, 1, 1>, scalar_prefetch = 0 : i64, scratch_operands = 1 : i64, tpu.core_type = #tpu.core_type<tc>, window_params = [{transform_indices = @transform_0, window_bounds = array<i64: 128, 4>}, {transform_indices = @transform_1, window_bounds = array<i64: 4, 8>}, {transform_indices = @transform_2, window_bounds = array<i64: 128, 8>}, {transform_indices = @transform_3, window_bounds = array<i64: 1, 8, 8>}, {transform_indices = @transform_4, window_bounds = array<i64: 1, 8, 8>}]} {
    %c0_i32 = arith.constant 0 : i32
    %0 = arith.cmpi eq, %arg2, %c0_i32 : i32
    %1 = arith.extui %0 : i1 to i32
    %c0_i32_0 = arith.constant 0 : i32
    %2 = arith.cmpi ne, %1, %c0_i32_0 : i32
    scf.if %2 {
      %cst_10 = arith.constant 0.000000e+00 : f32
      %12 = vector.broadcast %cst_10 : f32 to vector<128x8xf32>
      %c0_11 = arith.constant 0 : index
      %c0_12 = arith.constant 0 : index
      %13 = vector.load %arg8[%c0_11, %c0_12] : memref<128x8xf32, #tpu.memory_space<vmem>>, vector<128x8xf32>
      tpu.vector_store %arg8[%c0_11, %c0_12], %12 {strides = array<i32>} : memref<128x8xf32, #tpu.memory_space<vmem>>, vector<128x8xf32>,
    } else {
    }
    %c0 = arith.constant 0 : index
    %c0_1 = arith.constant 0 : index
    %3 = vector.load %arg8[%c0, %c0_1] : memref<128x8xf32, #tpu.memory_space<vmem>>, vector<128x8xf32>
    %c0_2 = arith.constant 0 : index
    %c0_3 = arith.constant 0 : index
    %4 = vector.load %arg3[%c0_2, %c0_3] : memref<128x4xbf16, #tpu.memory_space<vmem>>, vector<128x4xbf16>
    %c0_4 = arith.constant 0 : index
    %c0_5 = arith.constant 0 : index
    %5 = vector.load %arg4[%c0_4, %c0_5] : memref<4x8xbf16, #tpu.memory_space<vmem>>, vector<4x8xbf16>
    %cst = arith.constant dense<0.000000e+00> : vector<128x8xf32>
    %6 = tpu.matmul %4, %5, %cst {dimension_numbers = #tpu.dot_dimension_numbers<[1], [0], [0], [1], [0, 0, 1, 1], [], []>} : vector<128x4xbf16>, vector<4x8xbf16>, vector<128x8xf32> -> vector<128x8xf32>
    %7 = arith.addf %3, %6 : vector<128x8xf32>
    %c0_6 = arith.constant 0 : index
    %c0_7 = arith.constant 0 : index
    %8 = vector.load %arg8[%c0_6, %c0_7] : memref<128x8xf32, #tpu.memory_space<vmem>>, vector<128x8xf32>
    tpu.vector_store %arg8[%c0_6, %c0_7], %7 {strides = array<i32>} : memref<128x8xf32, #tpu.memory_space<vmem>>, vector<128x8xf32>,
    %c0_i32_8 = arith.constant 0 : i32
    %9 = arith.cmpi eq, %arg2, %c0_i32_8 : i32
    %10 = arith.extui %9 : i1 to i32
    %c0_i32_9 = arith.constant 0 : i32
    %11 = arith.cmpi ne, %10, %c0_i32_9 : i32
    scf.if %11 {
      %c0_10 = arith.constant 0 : index
      %c0_11 = arith.constant 0 : index
      %12 = vector.load %arg8[%c0_10, %c0_11] : memref<128x8xf32, #tpu.memory_space<vmem>>, vector<128x8xf32>
      %c0_12 = arith.constant 0 : index
      %c0_13 = arith.constant 0 : index
      %13 = vector.load %arg5[%c0_12, %c0_13] : memref<128x8xf32, #tpu.memory_space<vmem>>, vector<128x8xf32>
      tpu.vector_store %arg5[%c0_12, %c0_13], %12 {strides = array<i32>} : memref<128x8xf32, #tpu.memory_space<vmem>>, vector<128x8xf32>,
      %cst_14 = arith.constant dense<0.000000e+00> : vector<8xf32>
      %14 = vector.multi_reduction <add>, %12, %cst_14 [0] : vector<128x8xf32> to vector<8xf32>
      %15 = vector.shape_cast %14 : vector<8xf32> to vector<1x1x8xf32>
      %16 = arith.mulf %12, %12 : vector<128x8xf32>
      %cst_15 = arith.constant dense<0.000000e+00> : vector<8xf32>
      %17 = vector.multi_reduction <add>, %16, %cst_15 [0] : vector<128x8xf32> to vector<8xf32>
      %18 = vector.shape_cast %17 : vector<8xf32> to vector<1x1x8xf32>
      %19 = vector.shape_cast %15 : vector<1x1x8xf32> to vector<1x1x8xf32>
      %20 = vector.broadcast %19 : vector<1x1x8xf32> to vector<1x8x8xf32>
      %c0_16 = arith.constant 0 : index
      %c0_17 = arith.constant 0 : index
      %c0_18 = arith.constant 0 : index
      %21 = vector.load %arg6[%c0_16, %c0_17, %c0_18] : memref<1x8x8xf32, #tpu.memory_space<vmem>>, vector<1x8x8xf32>
      tpu.vector_store %arg6[%c0_16, %c0_17, %c0_18], %20 {strides = array<i32>} : memref<1x8x8xf32, #tpu.memory_space<vmem>>, vector<1x8x8xf32>,
      %22 = vector.shape_cast %18 : vector<1x1x8xf32> to vector<1x1x8xf32>
      %23 = vector.broadcast %22 : vector<1x1x8xf32> to vector<1x8x8xf32>
      %c0_19 = arith.constant 0 : index
      %c0_20 = arith.constant 0 : index
      %c0_21 = arith.constant 0 : index
      %24 = vector.load %arg7[%c0_19, %c0_20, %c0_21] : memref<1x8x8xf32, #tpu.memory_space<vmem>>, vector<1x8x8xf32>
      tpu.vector_store %arg7[%c0_19, %c0_20, %c0_21], %23 {strides = array<i32>} : memref<1x8x8xf32, #tpu.memory_space<vmem>>, vector<1x8x8xf32>,
    } else {
    }
    return
  }
  func.func @transform_0(%arg0: i32, %arg1: i32, %arg2: i32) -> (i32, i32) {
    %c0_i32 = arith.constant 0 : i32
    return %arg0, %arg2 : i32, i32
  }
  func.func @transform_1(%arg0: i32, %arg1: i32, %arg2: i32) -> (i32, i32) {
    %c0_i32 = arith.constant 0 : i32
    return %arg2, %arg1 : i32, i32
  }
  func.func @transform_2(%arg0: i32, %arg1: i32, %arg2: i32) -> (i32, i32) {
    %c0_i32 = arith.constant 0 : i32
    return %arg0, %arg1 : i32, i32
  }
  func.func @transform_3(%arg0: i32, %arg1: i32, %arg2: i32) -> (i32, i32, i32) {
    %c0_i32 = arith.constant 0 : i32
    %c0_i32_0 = arith.constant 0 : i32
    return %arg0, %c0_i32, %arg1 : i32, i32, i32
  }
  func.func @transform_4(%arg0: i32, %arg1: i32, %arg2: i32) -> (i32, i32, i32) {
    %c0_i32 = arith.constant 0 : i32
    %c0_i32_0 = arith.constant 0 : i32
    return %arg0, %c0_i32, %arg1 : i32, i32, i32
  }
}

module attributes {stable_mosaic.version = 11 : i64} {
  func.func @_mm_stats_kernel(%arg0: i32, %arg1: i32, %arg2: i32, %arg3: memref<512x12xbf16, #tpu.memory_space<vmem>>, %arg4: memref<12x4xbf16, #tpu.memory_space<vmem>>, %arg5: memref<512x4xbf16, #tpu.memory_space<vmem>>, %arg6: memref<1x8x4xf32, #tpu.memory_space<vmem>>, %arg7: memref<1x8x4xf32, #tpu.memory_space<vmem>>, %arg8: memref<512x4xf32, #tpu.memory_space<vmem>>) attributes {dimension_semantics = [#tpu.dimension_semantics<parallel>, #tpu.dimension_semantics<parallel>, #tpu.dimension_semantics<arbitrary>], iteration_bounds = array<i64: 1, 1, 1>, scalar_prefetch = 0 : i64, scratch_operands = 1 : i64, tpu.core_type = #tpu.core_type<tc>, window_params = [{transform_indices = @transform_0, window_bounds = array<i64: 512, 12>}, {transform_indices = @transform_1, window_bounds = array<i64: 12, 4>}, {transform_indices = @transform_2, window_bounds = array<i64: 512, 4>}, {transform_indices = @transform_3, window_bounds = array<i64: 1, 8, 4>}, {transform_indices = @transform_4, window_bounds = array<i64: 1, 8, 4>}]} {
    %c0_i32 = arith.constant 0 : i32
    %0 = arith.cmpi eq, %arg2, %c0_i32 : i32
    %1 = arith.extui %0 : i1 to i32
    %c0_i32_0 = arith.constant 0 : i32
    %2 = arith.cmpi ne, %1, %c0_i32_0 : i32
    scf.if %2 {
      %cst_10 = arith.constant 0.000000e+00 : f32
      %12 = vector.broadcast %cst_10 : f32 to vector<512x4xf32>
      %c0_11 = arith.constant 0 : index
      %c0_12 = arith.constant 0 : index
      %13 = vector.load %arg8[%c0_11, %c0_12] : memref<512x4xf32, #tpu.memory_space<vmem>>, vector<512x4xf32>
      tpu.vector_store %arg8[%c0_11, %c0_12], %12 {strides = array<i32>} : memref<512x4xf32, #tpu.memory_space<vmem>>, vector<512x4xf32>,
    } else {
    }
    %c0 = arith.constant 0 : index
    %c0_1 = arith.constant 0 : index
    %3 = vector.load %arg8[%c0, %c0_1] : memref<512x4xf32, #tpu.memory_space<vmem>>, vector<512x4xf32>
    %c0_2 = arith.constant 0 : index
    %c0_3 = arith.constant 0 : index
    %4 = vector.load %arg3[%c0_2, %c0_3] : memref<512x12xbf16, #tpu.memory_space<vmem>>, vector<512x12xbf16>
    %c0_4 = arith.constant 0 : index
    %c0_5 = arith.constant 0 : index
    %5 = vector.load %arg4[%c0_4, %c0_5] : memref<12x4xbf16, #tpu.memory_space<vmem>>, vector<12x4xbf16>
    %cst = arith.constant dense<0.000000e+00> : vector<512x4xf32>
    %6 = tpu.matmul %4, %5, %cst {dimension_numbers = #tpu.dot_dimension_numbers<[1], [0], [0], [1], [0, 0, 1, 1], [], []>} : vector<512x12xbf16>, vector<12x4xbf16>, vector<512x4xf32> -> vector<512x4xf32>
    %7 = arith.addf %3, %6 : vector<512x4xf32>
    %c0_6 = arith.constant 0 : index
    %c0_7 = arith.constant 0 : index
    %8 = vector.load %arg8[%c0_6, %c0_7] : memref<512x4xf32, #tpu.memory_space<vmem>>, vector<512x4xf32>
    tpu.vector_store %arg8[%c0_6, %c0_7], %7 {strides = array<i32>} : memref<512x4xf32, #tpu.memory_space<vmem>>, vector<512x4xf32>,
    %c0_i32_8 = arith.constant 0 : i32
    %9 = arith.cmpi eq, %arg2, %c0_i32_8 : i32
    %10 = arith.extui %9 : i1 to i32
    %c0_i32_9 = arith.constant 0 : i32
    %11 = arith.cmpi ne, %10, %c0_i32_9 : i32
    scf.if %11 {
      %c0_10 = arith.constant 0 : index
      %c0_11 = arith.constant 0 : index
      %12 = vector.load %arg8[%c0_10, %c0_11] : memref<512x4xf32, #tpu.memory_space<vmem>>, vector<512x4xf32>
      %13 = arith.truncf %12 : vector<512x4xf32> to vector<512x4xbf16>
      %c0_12 = arith.constant 0 : index
      %c0_13 = arith.constant 0 : index
      %14 = vector.load %arg5[%c0_12, %c0_13] : memref<512x4xbf16, #tpu.memory_space<vmem>>, vector<512x4xbf16>
      tpu.vector_store %arg5[%c0_12, %c0_13], %13 {strides = array<i32>} : memref<512x4xbf16, #tpu.memory_space<vmem>>, vector<512x4xbf16>,
      %cst_14 = arith.constant dense<0.000000e+00> : vector<4xf32>
      %15 = vector.multi_reduction <add>, %12, %cst_14 [0] : vector<512x4xf32> to vector<4xf32>
      %16 = vector.shape_cast %15 : vector<4xf32> to vector<1x1x4xf32>
      %17 = arith.mulf %12, %12 : vector<512x4xf32>
      %cst_15 = arith.constant dense<0.000000e+00> : vector<4xf32>
      %18 = vector.multi_reduction <add>, %17, %cst_15 [0] : vector<512x4xf32> to vector<4xf32>
      %19 = vector.shape_cast %18 : vector<4xf32> to vector<1x1x4xf32>
      %20 = vector.shape_cast %16 : vector<1x1x4xf32> to vector<1x1x4xf32>
      %21 = vector.broadcast %20 : vector<1x1x4xf32> to vector<1x8x4xf32>
      %c0_16 = arith.constant 0 : index
      %c0_17 = arith.constant 0 : index
      %c0_18 = arith.constant 0 : index
      %22 = vector.load %arg6[%c0_16, %c0_17, %c0_18] : memref<1x8x4xf32, #tpu.memory_space<vmem>>, vector<1x8x4xf32>
      tpu.vector_store %arg6[%c0_16, %c0_17, %c0_18], %21 {strides = array<i32>} : memref<1x8x4xf32, #tpu.memory_space<vmem>>, vector<1x8x4xf32>,
      %23 = vector.shape_cast %19 : vector<1x1x4xf32> to vector<1x1x4xf32>
      %24 = vector.broadcast %23 : vector<1x1x4xf32> to vector<1x8x4xf32>
      %c0_19 = arith.constant 0 : index
      %c0_20 = arith.constant 0 : index
      %c0_21 = arith.constant 0 : index
      %25 = vector.load %arg7[%c0_19, %c0_20, %c0_21] : memref<1x8x4xf32, #tpu.memory_space<vmem>>, vector<1x8x4xf32>
      tpu.vector_store %arg7[%c0_19, %c0_20, %c0_21], %24 {strides = array<i32>} : memref<1x8x4xf32, #tpu.memory_space<vmem>>, vector<1x8x4xf32>,
    } else {
    }
    return
  }
  func.func @transform_0(%arg0: i32, %arg1: i32, %arg2: i32) -> (i32, i32) {
    %c0_i32 = arith.constant 0 : i32
    return %arg0, %arg2 : i32, i32
  }
  func.func @transform_1(%arg0: i32, %arg1: i32, %arg2: i32) -> (i32, i32) {
    %c0_i32 = arith.constant 0 : i32
    return %arg2, %arg1 : i32, i32
  }
  func.func @transform_2(%arg0: i32, %arg1: i32, %arg2: i32) -> (i32, i32) {
    %c0_i32 = arith.constant 0 : i32
    return %arg0, %arg1 : i32, i32
  }
  func.func @transform_3(%arg0: i32, %arg1: i32, %arg2: i32) -> (i32, i32, i32) {
    %c0_i32 = arith.constant 0 : i32
    %c0_i32_0 = arith.constant 0 : i32
    return %arg0, %c0_i32, %arg1 : i32, i32, i32
  }
  func.func @transform_4(%arg0: i32, %arg1: i32, %arg2: i32) -> (i32, i32, i32) {
    %c0_i32 = arith.constant 0 : i32
    %c0_i32_0 = arith.constant 0 : i32
    return %arg0, %c0_i32, %arg1 : i32, i32, i32
  }
}

module attributes {stable_mosaic.version = 11 : i64} {
  func.func @_scale_shift_relu_kernel(%arg0: i32, %arg1: memref<16x128xbf16, #tpu.memory_space<vmem>>, %arg2: memref<1x128xf32, #tpu.memory_space<vmem>>, %arg3: memref<1x128xf32, #tpu.memory_space<vmem>>, %arg4: memref<16x128xbf16, #tpu.memory_space<vmem>>) attributes {dimension_semantics = [#tpu.dimension_semantics<parallel>], iteration_bounds = array<i64: 1>, scalar_prefetch = 0 : i64, scratch_operands = 0 : i64, tpu.core_type = #tpu.core_type<tc>, window_params = [{transform_indices = @transform_0, window_bounds = array<i64: 16, 128>}, {pipeline_mode = #tpu.pipeline_mode<synchronous>, transform_indices = @transform_1, window_bounds = array<i64: 1, 128>}, {pipeline_mode = #tpu.pipeline_mode<synchronous>, transform_indices = @transform_2, window_bounds = array<i64: 1, 128>}, {transform_indices = @transform_3, window_bounds = array<i64: 16, 128>}]} {
    %c0 = arith.constant 0 : index
    %c0_0 = arith.constant 0 : index
    %0 = vector.load %arg1[%c0, %c0_0] : memref<16x128xbf16, #tpu.memory_space<vmem>>, vector<16x128xbf16>
    %1 = arith.extf %0 : vector<16x128xbf16> to vector<16x128xf32>
    %c0_1 = arith.constant 0 : index
    %c0_2 = arith.constant 0 : index
    %2 = vector.load %arg2[%c0_1, %c0_2] : memref<1x128xf32, #tpu.memory_space<vmem>>, vector<1x128xf32>
    %3 = vector.broadcast %2 : vector<1x128xf32> to vector<16x128xf32>
    %4 = arith.mulf %1, %3 : vector<16x128xf32>
    %c0_3 = arith.constant 0 : index
    %c0_4 = arith.constant 0 : index
    %5 = vector.load %arg3[%c0_3, %c0_4] : memref<1x128xf32, #tpu.memory_space<vmem>>, vector<1x128xf32>
    %6 = vector.broadcast %5 : vector<1x128xf32> to vector<16x128xf32>
    %7 = arith.addf %4, %6 : vector<16x128xf32>
    %cst = arith.constant 0.000000e+00 : f32
    %8 = vector.broadcast %cst : f32 to vector<16x128xf32>
    %9 = arith.maximumf %7, %8 : vector<16x128xf32>
    %10 = arith.truncf %9 : vector<16x128xf32> to vector<16x128xbf16>
    %c0_5 = arith.constant 0 : index
    %c0_6 = arith.constant 0 : index
    %11 = vector.load %arg4[%c0_5, %c0_6] : memref<16x128xbf16, #tpu.memory_space<vmem>>, vector<16x128xbf16>
    tpu.vector_store %arg4[%c0_5, %c0_6], %10 {strides = array<i32>} : memref<16x128xbf16, #tpu.memory_space<vmem>>, vector<16x128xbf16>,
    return
  }
  func.func @transform_0(%arg0: i32) -> (i32, i32) {
    %c0_i32 = arith.constant 0 : i32
    %c0_i32_0 = arith.constant 0 : i32
    return %arg0, %c0_i32 : i32, i32
  }
  func.func @transform_1(%arg0: i32) -> (i32, i32) {
    %c0_i32 = arith.constant 0 : i32
    %c0_i32_0 = arith.constant 0 : i32
    %c0_i32_1 = arith.constant 0 : i32
    return %c0_i32, %c0_i32_0 : i32, i32
  }
  func.func @transform_2(%arg0: i32) -> (i32, i32) {
    %c0_i32 = arith.constant 0 : i32
    %c0_i32_0 = arith.constant 0 : i32
    %c0_i32_1 = arith.constant 0 : i32
    return %c0_i32, %c0_i32_0 : i32, i32
  }
  func.func @transform_3(%arg0: i32) -> (i32, i32) {
    %c0_i32 = arith.constant 0 : i32
    %c0_i32_0 = arith.constant 0 : i32
    return %arg0, %c0_i32 : i32, i32
  }
}

module attributes {stable_mosaic.version = 11 : i64} {
  func.func @_mm_stats_kernel(%arg0: i32, %arg1: i32, %arg2: i32, %arg3: memref<128x36xbf16, #tpu.memory_space<vmem>>, %arg4: memref<36x4xbf16, #tpu.memory_space<vmem>>, %arg5: memref<128x4xbf16, #tpu.memory_space<vmem>>, %arg6: memref<1x8x4xf32, #tpu.memory_space<vmem>>, %arg7: memref<1x8x4xf32, #tpu.memory_space<vmem>>, %arg8: memref<128x4xf32, #tpu.memory_space<vmem>>) attributes {dimension_semantics = [#tpu.dimension_semantics<parallel>, #tpu.dimension_semantics<parallel>, #tpu.dimension_semantics<arbitrary>], iteration_bounds = array<i64: 1, 1, 1>, scalar_prefetch = 0 : i64, scratch_operands = 1 : i64, tpu.core_type = #tpu.core_type<tc>, window_params = [{transform_indices = @transform_0, window_bounds = array<i64: 128, 36>}, {transform_indices = @transform_1, window_bounds = array<i64: 36, 4>}, {transform_indices = @transform_2, window_bounds = array<i64: 128, 4>}, {transform_indices = @transform_3, window_bounds = array<i64: 1, 8, 4>}, {transform_indices = @transform_4, window_bounds = array<i64: 1, 8, 4>}]} {
    %c0_i32 = arith.constant 0 : i32
    %0 = arith.cmpi eq, %arg2, %c0_i32 : i32
    %1 = arith.extui %0 : i1 to i32
    %c0_i32_0 = arith.constant 0 : i32
    %2 = arith.cmpi ne, %1, %c0_i32_0 : i32
    scf.if %2 {
      %cst_10 = arith.constant 0.000000e+00 : f32
      %12 = vector.broadcast %cst_10 : f32 to vector<128x4xf32>
      %c0_11 = arith.constant 0 : index
      %c0_12 = arith.constant 0 : index
      %13 = vector.load %arg8[%c0_11, %c0_12] : memref<128x4xf32, #tpu.memory_space<vmem>>, vector<128x4xf32>
      tpu.vector_store %arg8[%c0_11, %c0_12], %12 {strides = array<i32>} : memref<128x4xf32, #tpu.memory_space<vmem>>, vector<128x4xf32>,
    } else {
    }
    %c0 = arith.constant 0 : index
    %c0_1 = arith.constant 0 : index
    %3 = vector.load %arg8[%c0, %c0_1] : memref<128x4xf32, #tpu.memory_space<vmem>>, vector<128x4xf32>
    %c0_2 = arith.constant 0 : index
    %c0_3 = arith.constant 0 : index
    %4 = vector.load %arg3[%c0_2, %c0_3] : memref<128x36xbf16, #tpu.memory_space<vmem>>, vector<128x36xbf16>
    %c0_4 = arith.constant 0 : index
    %c0_5 = arith.constant 0 : index
    %5 = vector.load %arg4[%c0_4, %c0_5] : memref<36x4xbf16, #tpu.memory_space<vmem>>, vector<36x4xbf16>
    %cst = arith.constant dense<0.000000e+00> : vector<128x4xf32>
    %6 = tpu.matmul %4, %5, %cst {dimension_numbers = #tpu.dot_dimension_numbers<[1], [0], [0], [1], [0, 0, 1, 1], [], []>} : vector<128x36xbf16>, vector<36x4xbf16>, vector<128x4xf32> -> vector<128x4xf32>
    %7 = arith.addf %3, %6 : vector<128x4xf32>
    %c0_6 = arith.constant 0 : index
    %c0_7 = arith.constant 0 : index
    %8 = vector.load %arg8[%c0_6, %c0_7] : memref<128x4xf32, #tpu.memory_space<vmem>>, vector<128x4xf32>
    tpu.vector_store %arg8[%c0_6, %c0_7], %7 {strides = array<i32>} : memref<128x4xf32, #tpu.memory_space<vmem>>, vector<128x4xf32>,
    %c0_i32_8 = arith.constant 0 : i32
    %9 = arith.cmpi eq, %arg2, %c0_i32_8 : i32
    %10 = arith.extui %9 : i1 to i32
    %c0_i32_9 = arith.constant 0 : i32
    %11 = arith.cmpi ne, %10, %c0_i32_9 : i32
    scf.if %11 {
      %c0_10 = arith.constant 0 : index
      %c0_11 = arith.constant 0 : index
      %12 = vector.load %arg8[%c0_10, %c0_11] : memref<128x4xf32, #tpu.memory_space<vmem>>, vector<128x4xf32>
      %13 = arith.truncf %12 : vector<128x4xf32> to vector<128x4xbf16>
      %c0_12 = arith.constant 0 : index
      %c0_13 = arith.constant 0 : index
      %14 = vector.load %arg5[%c0_12, %c0_13] : memref<128x4xbf16, #tpu.memory_space<vmem>>, vector<128x4xbf16>
      tpu.vector_store %arg5[%c0_12, %c0_13], %13 {strides = array<i32>} : memref<128x4xbf16, #tpu.memory_space<vmem>>, vector<128x4xbf16>,
      %cst_14 = arith.constant dense<0.000000e+00> : vector<4xf32>
      %15 = vector.multi_reduction <add>, %12, %cst_14 [0] : vector<128x4xf32> to vector<4xf32>
      %16 = vector.shape_cast %15 : vector<4xf32> to vector<1x1x4xf32>
      %17 = arith.mulf %12, %12 : vector<128x4xf32>
      %cst_15 = arith.constant dense<0.000000e+00> : vector<4xf32>
      %18 = vector.multi_reduction <add>, %17, %cst_15 [0] : vector<128x4xf32> to vector<4xf32>
      %19 = vector.shape_cast %18 : vector<4xf32> to vector<1x1x4xf32>
      %20 = vector.shape_cast %16 : vector<1x1x4xf32> to vector<1x1x4xf32>
      %21 = vector.broadcast %20 : vector<1x1x4xf32> to vector<1x8x4xf32>
      %c0_16 = arith.constant 0 : index
      %c0_17 = arith.constant 0 : index
      %c0_18 = arith.constant 0 : index
      %22 = vector.load %arg6[%c0_16, %c0_17, %c0_18] : memref<1x8x4xf32, #tpu.memory_space<vmem>>, vector<1x8x4xf32>
      tpu.vector_store %arg6[%c0_16, %c0_17, %c0_18], %21 {strides = array<i32>} : memref<1x8x4xf32, #tpu.memory_space<vmem>>, vector<1x8x4xf32>,
      %23 = vector.shape_cast %19 : vector<1x1x4xf32> to vector<1x1x4xf32>
      %24 = vector.broadcast %23 : vector<1x1x4xf32> to vector<1x8x4xf32>
      %c0_19 = arith.constant 0 : index
      %c0_20 = arith.constant 0 : index
      %c0_21 = arith.constant 0 : index
      %25 = vector.load %arg7[%c0_19, %c0_20, %c0_21] : memref<1x8x4xf32, #tpu.memory_space<vmem>>, vector<1x8x4xf32>
      tpu.vector_store %arg7[%c0_19, %c0_20, %c0_21], %24 {strides = array<i32>} : memref<1x8x4xf32, #tpu.memory_space<vmem>>, vector<1x8x4xf32>,
    } else {
    }
    return
  }
  func.func @transform_0(%arg0: i32, %arg1: i32, %arg2: i32) -> (i32, i32) {
    %c0_i32 = arith.constant 0 : i32
    return %arg0, %arg2 : i32, i32
  }
  func.func @transform_1(%arg0: i32, %arg1: i32, %arg2: i32) -> (i32, i32) {
    %c0_i32 = arith.constant 0 : i32
    return %arg2, %arg1 : i32, i32
  }
  func.func @transform_2(%arg0: i32, %arg1: i32, %arg2: i32) -> (i32, i32) {
    %c0_i32 = arith.constant 0 : i32
    return %arg0, %arg1 : i32, i32
  }
  func.func @transform_3(%arg0: i32, %arg1: i32, %arg2: i32) -> (i32, i32, i32) {
    %c0_i32 = arith.constant 0 : i32
    %c0_i32_0 = arith.constant 0 : i32
    return %arg0, %c0_i32, %arg1 : i32, i32, i32
  }
  func.func @transform_4(%arg0: i32, %arg1: i32, %arg2: i32) -> (i32, i32, i32) {
    %c0_i32 = arith.constant 0 : i32
    %c0_i32_0 = arith.constant 0 : i32
    return %arg0, %c0_i32, %arg1 : i32, i32, i32
  }
}

module attributes {stable_mosaic.version = 11 : i64} {
  func.func @_scale_shift_relu_kernel(%arg0: i32, %arg1: memref<4x128xbf16, #tpu.memory_space<vmem>>, %arg2: memref<1x128xf32, #tpu.memory_space<vmem>>, %arg3: memref<1x128xf32, #tpu.memory_space<vmem>>, %arg4: memref<4x128xbf16, #tpu.memory_space<vmem>>) attributes {dimension_semantics = [#tpu.dimension_semantics<parallel>], iteration_bounds = array<i64: 1>, scalar_prefetch = 0 : i64, scratch_operands = 0 : i64, tpu.core_type = #tpu.core_type<tc>, window_params = [{transform_indices = @transform_0, window_bounds = array<i64: 4, 128>}, {pipeline_mode = #tpu.pipeline_mode<synchronous>, transform_indices = @transform_1, window_bounds = array<i64: 1, 128>}, {pipeline_mode = #tpu.pipeline_mode<synchronous>, transform_indices = @transform_2, window_bounds = array<i64: 1, 128>}, {transform_indices = @transform_3, window_bounds = array<i64: 4, 128>}]} {
    %c0 = arith.constant 0 : index
    %c0_0 = arith.constant 0 : index
    %0 = vector.load %arg1[%c0, %c0_0] : memref<4x128xbf16, #tpu.memory_space<vmem>>, vector<4x128xbf16>
    %1 = arith.extf %0 : vector<4x128xbf16> to vector<4x128xf32>
    %c0_1 = arith.constant 0 : index
    %c0_2 = arith.constant 0 : index
    %2 = vector.load %arg2[%c0_1, %c0_2] : memref<1x128xf32, #tpu.memory_space<vmem>>, vector<1x128xf32>
    %3 = vector.broadcast %2 : vector<1x128xf32> to vector<4x128xf32>
    %4 = arith.mulf %1, %3 : vector<4x128xf32>
    %c0_3 = arith.constant 0 : index
    %c0_4 = arith.constant 0 : index
    %5 = vector.load %arg3[%c0_3, %c0_4] : memref<1x128xf32, #tpu.memory_space<vmem>>, vector<1x128xf32>
    %6 = vector.broadcast %5 : vector<1x128xf32> to vector<4x128xf32>
    %7 = arith.addf %4, %6 : vector<4x128xf32>
    %cst = arith.constant 0.000000e+00 : f32
    %8 = vector.broadcast %cst : f32 to vector<4x128xf32>
    %9 = arith.maximumf %7, %8 : vector<4x128xf32>
    %10 = arith.truncf %9 : vector<4x128xf32> to vector<4x128xbf16>
    %c0_5 = arith.constant 0 : index
    %c0_6 = arith.constant 0 : index
    %11 = vector.load %arg4[%c0_5, %c0_6] : memref<4x128xbf16, #tpu.memory_space<vmem>>, vector<4x128xbf16>
    tpu.vector_store %arg4[%c0_5, %c0_6], %10 {strides = array<i32>} : memref<4x128xbf16, #tpu.memory_space<vmem>>, vector<4x128xbf16>,
    return
  }
  func.func @transform_0(%arg0: i32) -> (i32, i32) {
    %c0_i32 = arith.constant 0 : i32
    %c0_i32_0 = arith.constant 0 : i32
    return %arg0, %c0_i32 : i32, i32
  }
  func.func @transform_1(%arg0: i32) -> (i32, i32) {
    %c0_i32 = arith.constant 0 : i32
    %c0_i32_0 = arith.constant 0 : i32
    %c0_i32_1 = arith.constant 0 : i32
    return %c0_i32, %c0_i32_0 : i32, i32
  }
  func.func @transform_2(%arg0: i32) -> (i32, i32) {
    %c0_i32 = arith.constant 0 : i32
    %c0_i32_0 = arith.constant 0 : i32
    %c0_i32_1 = arith.constant 0 : i32
    return %c0_i32, %c0_i32_0 : i32, i32
  }
  func.func @transform_3(%arg0: i32) -> (i32, i32) {
    %c0_i32 = arith.constant 0 : i32
    %c0_i32_0 = arith.constant 0 : i32
    return %arg0, %c0_i32 : i32, i32
  }
}

module attributes {stable_mosaic.version = 11 : i64} {
  func.func @_residual_kernel(%arg0: i32, %arg1: memref<8x128xf32, #tpu.memory_space<vmem>>, %arg2: memref<1x128xf32, #tpu.memory_space<vmem>>, %arg3: memref<1x128xf32, #tpu.memory_space<vmem>>, %arg4: memref<8x128xf32, #tpu.memory_space<vmem>>, %arg5: memref<1x128xf32, #tpu.memory_space<vmem>>, %arg6: memref<1x128xf32, #tpu.memory_space<vmem>>, %arg7: memref<8x128xf32, #tpu.memory_space<vmem>>) attributes {dimension_semantics = [#tpu.dimension_semantics<parallel>], iteration_bounds = array<i64: 1>, scalar_prefetch = 0 : i64, scratch_operands = 0 : i64, tpu.core_type = #tpu.core_type<tc>, window_params = [{transform_indices = @transform_0, window_bounds = array<i64: 8, 128>}, {pipeline_mode = #tpu.pipeline_mode<synchronous>, transform_indices = @transform_1, window_bounds = array<i64: 1, 128>}, {pipeline_mode = #tpu.pipeline_mode<synchronous>, transform_indices = @transform_2, window_bounds = array<i64: 1, 128>}, {transform_indices = @transform_3, window_bounds = array<i64: 8, 128>}, {pipeline_mode = #tpu.pipeline_mode<synchronous>, transform_indices = @transform_4, window_bounds = array<i64: 1, 128>}, {pipeline_mode = #tpu.pipeline_mode<synchronous>, transform_indices = @transform_5, window_bounds = array<i64: 1, 128>}, {transform_indices = @transform_6, window_bounds = array<i64: 8, 128>}]} {
    %c0 = arith.constant 0 : index
    %c0_0 = arith.constant 0 : index
    %0 = vector.load %arg1[%c0, %c0_0] : memref<8x128xf32, #tpu.memory_space<vmem>>, vector<8x128xf32>
    %c0_1 = arith.constant 0 : index
    %c0_2 = arith.constant 0 : index
    %1 = vector.load %arg2[%c0_1, %c0_2] : memref<1x128xf32, #tpu.memory_space<vmem>>, vector<1x128xf32>
    %2 = vector.broadcast %1 : vector<1x128xf32> to vector<8x128xf32>
    %3 = arith.mulf %0, %2 : vector<8x128xf32>
    %c0_3 = arith.constant 0 : index
    %c0_4 = arith.constant 0 : index
    %4 = vector.load %arg3[%c0_3, %c0_4] : memref<1x128xf32, #tpu.memory_space<vmem>>, vector<1x128xf32>
    %5 = vector.broadcast %4 : vector<1x128xf32> to vector<8x128xf32>
    %6 = arith.addf %3, %5 : vector<8x128xf32>
    %cst = arith.constant 0.000000e+00 : f32
    %7 = vector.broadcast %cst : f32 to vector<8x128xf32>
    %8 = arith.maximumf %6, %7 : vector<8x128xf32>
    %c0_5 = arith.constant 0 : index
    %c0_6 = arith.constant 0 : index
    %9 = vector.load %arg4[%c0_5, %c0_6] : memref<8x128xf32, #tpu.memory_space<vmem>>, vector<8x128xf32>
    %c0_7 = arith.constant 0 : index
    %c0_8 = arith.constant 0 : index
    %10 = vector.load %arg5[%c0_7, %c0_8] : memref<1x128xf32, #tpu.memory_space<vmem>>, vector<1x128xf32>
    %11 = vector.broadcast %10 : vector<1x128xf32> to vector<8x128xf32>
    %12 = arith.mulf %9, %11 : vector<8x128xf32>
    %c0_9 = arith.constant 0 : index
    %c0_10 = arith.constant 0 : index
    %13 = vector.load %arg6[%c0_9, %c0_10] : memref<1x128xf32, #tpu.memory_space<vmem>>, vector<1x128xf32>
    %14 = vector.broadcast %13 : vector<1x128xf32> to vector<8x128xf32>
    %15 = arith.addf %12, %14 : vector<8x128xf32>
    %16 = arith.addf %8, %15 : vector<8x128xf32>
    %cst_11 = arith.constant 0.000000e+00 : f32
    %17 = vector.broadcast %cst_11 : f32 to vector<8x128xf32>
    %18 = arith.maximumf %16, %17 : vector<8x128xf32>
    %c0_12 = arith.constant 0 : index
    %c0_13 = arith.constant 0 : index
    %19 = vector.load %arg7[%c0_12, %c0_13] : memref<8x128xf32, #tpu.memory_space<vmem>>, vector<8x128xf32>
    tpu.vector_store %arg7[%c0_12, %c0_13], %18 {strides = array<i32>} : memref<8x128xf32, #tpu.memory_space<vmem>>, vector<8x128xf32>,
    return
  }
  func.func @transform_0(%arg0: i32) -> (i32, i32) {
    %c0_i32 = arith.constant 0 : i32
    %c0_i32_0 = arith.constant 0 : i32
    return %arg0, %c0_i32 : i32, i32
  }
  func.func @transform_1(%arg0: i32) -> (i32, i32) {
    %c0_i32 = arith.constant 0 : i32
    %c0_i32_0 = arith.constant 0 : i32
    %c0_i32_1 = arith.constant 0 : i32
    return %c0_i32, %c0_i32_0 : i32, i32
  }
  func.func @transform_2(%arg0: i32) -> (i32, i32) {
    %c0_i32 = arith.constant 0 : i32
    %c0_i32_0 = arith.constant 0 : i32
    %c0_i32_1 = arith.constant 0 : i32
    return %c0_i32, %c0_i32_0 : i32, i32
  }
  func.func @transform_3(%arg0: i32) -> (i32, i32) {
    %c0_i32 = arith.constant 0 : i32
    %c0_i32_0 = arith.constant 0 : i32
    return %arg0, %c0_i32 : i32, i32
  }
  func.func @transform_4(%arg0: i32) -> (i32, i32) {
    %c0_i32 = arith.constant 0 : i32
    %c0_i32_0 = arith.constant 0 : i32
    %c0_i32_1 = arith.constant 0 : i32
    return %c0_i32, %c0_i32_0 : i32, i32
  }
  func.func @transform_5(%arg0: i32) -> (i32, i32) {
    %c0_i32 = arith.constant 0 : i32
    %c0_i32_0 = arith.constant 0 : i32
    %c0_i32_1 = arith.constant 0 : i32
    return %c0_i32, %c0_i32_0 : i32, i32
  }
  func.func @transform_6(%arg0: i32) -> (i32, i32) {
    %c0_i32 = arith.constant 0 : i32
    %c0_i32_0 = arith.constant 0 : i32
    return %arg0, %c0_i32 : i32, i32
  }
}

</mosaic_0001>

<bundles_post_ra>
// kernel: tile.78
= control target key start
LH: loop header
LB: loop body
LE: loop exit
PB: predicated region body
PF: predicated region fallthrough
CT: control target
= control target key end

     0   :  { %s28_s0 = inlined_call_operand.vmem [shape: f32[8], index: 0, kind: input, shape index: {}]   ;;  %s29_s1 = inlined_call_operand.vmem [shape: f32[16,8], index: 1, kind: output, shape index: {}]  }
   0x1   :  { %v4_v0 = vld [vmem:[%s28_s0] ss:$0 sm:$0xff] }
   0x2   :  { %5 = vst [vmem:[%s29_s1] sm:$0xff] %v4_v0  ;;  %8 = vst [vmem:[%s29_s1 + $0x8] sm:$0xff] %v4_v0 }

// kernel: tile.79
= control target key start
LH: loop header
LB: loop body
LE: loop exit
PB: predicated region body
PF: predicated region fallthrough
CT: control target
= control target key end

     0   :  { %s133_s10 = smov 120   ;;  %s134_s11 = smov 104   ;;  %vm3_vm0 = vcmask 64512   ;;  %vm9_vm1 = vcmask 1048512   ;;  %vm15_vm2 = vcmask 982912   ;;  %vm21_vm3 = vcmask 917312   ;;  %s209_s0 = inlined_call_operand.vmem [shape: f32[16,8], index: 0, kind: input, shape index: {}]   ;;  %s210_s1 = inlined_call_operand.vmem [shape: f32[1,128], index: 1, kind: output, shape index: {}]  }
   0x1   :  { %v103_v0 = vld [vmem:[%s209_s0 + $0xf] sm:$0x1]   ;;  %v105_v1 = vld [vmem:[%s209_s0 + $0xd] sm:$0x1]   ;;  %v104_v2 = vld [vmem:[%s209_s0 + $0xe] sm:$0x1]  }
   0x2   :  { %7 = vrot.lane.b32.xlu0 %v103_v0, %s133_s10  ;;  %19 = vrot.lane.b32.xlu1 %v105_v1, %s134_s11  ;;  %v106_v3 = vld [vmem:[%s209_s0 + $0xc] sm:$0x1]   ;;  %s135_s16 = smov 112   ;;  %s136_s17 = smov 96   ;;  %v107_v4 = vld [vmem:[%s209_s0 + $0xb] sm:$0x1]  }
   0x3   :  { %v108_v5 = vld [vmem:[%s209_s0 + $0xa] sm:$0x1]   ;;  %v2_v6 = vld [vmem:[%s209_s0] sm:$0x1]   ;;  %s137_s24 = smov 88   ;;  %s138_s25 = smov 80  }
   0x4   :  { %4 = vst.msk [vmem:[#allocation0] sm:$0x1] %vm3_vm0, %v2_v6   ;;  %v109_v7 = vld [vmem:[%s209_s0 + $0x9] sm:$0x1]   ;;  %v110_v8 = vld [vmem:[%s209_s0 + $0x8] sm:$0x1]  }
   0x5   :  { %s139_s30 = smov 72   ;;  %s140_s2 = smov 64   ;;  %v111_v9 = vld [vmem:[%s209_s0 + $0x7] sm:$0x1]   ;;  %v112_v10 = vld [vmem:[%s209_s0 + $0x6] sm:$0x1]  }
   0x6   :  { %13 = vrot.lane.b32.xlu0 %v104_v2, %s135_s16  ;;  %25 = vrot.lane.b32.xlu1 %v106_v3, %s136_s17  ;;  %s141_s7 = smov 56   ;;  %s142_s8 = smov 48   ;;  %v113_v11 = vld [vmem:[%s209_s0 + $0x5] sm:$0x1]   ;;  %v114_v12 = vld [vmem:[%s209_s0 + $0x4] sm:$0x1]  }
   0x7   :  { %s143_s13 = smov 40   ;;  %s144_s14 = smov 32   ;;  %v115_v13 = vld [vmem:[%s209_s0 + $0x3] sm:$0x1]   ;;  %v116_v14 = vld [vmem:[%s209_s0 + $0x2] sm:$0x1]  }
   0x8   :  { %s145_s19 = smov 24   ;;  %s146_s20 = smov 16   ;;  %v117_v15 = vld [vmem:[%s209_s0 + $0x1] sm:$0x1]   ;;  %vm27_vm4 = vcmask 851712   ;;  %vm33_vm5 = vcmask 786112  }
   0x9   :  { %s147_s0 = smov 8   ;;  %vm39_vm6 = vcmask 720512   ;;  %vm45_vm7 = vcmask 654912   ;;  %vm51_vm8 = vcmask 589312   ;;  %vm57_vm9 = vcmask 523712  }
   0xa   :  { %31 = vrot.lane.b32.xlu0 %v107_v4, %s137_s24  ;;  %37 = vrot.lane.b32.xlu1 %v108_v5, %s138_s25  ;;  %vm63_vm10 = vcmask 458112   ;;  %vm69_vm11 = vcmask 392512   ;;  %vm75_vm12 = vcmask 326912   ;;  %vm81_vm13 = vcmask 261312  }
   0xb   :  { %vm87_vm14 = vcmask 195712   ;;  %vm93_vm15 = vcmask 130112  }
   0xe   :  { %43 = vrot.lane.b32.xlu0 %v109_v7, %s139_s30  ;;  %49 = vrot.lane.b32.xlu1 %v110_v8, %s140_s2 }
  0x12   :  { %55 = vrot.lane.b32.xlu0 %v111_v9, %s141_s7  ;;  %61 = vrot.lane.b32.xlu1 %v112_v10, %s142_s8 }
  0x16   :  { %67 = vrot.lane.b32.xlu0 %v113_v11, %s143_s13  ;;  %73 = vrot.lane.b32.xlu1 %v114_v12, %s144_s14 }
  0x1a   :  { %79 = vrot.lane.b32.xlu0 %v115_v13, %s145_s19  ;;  %85 = vrot.lane.b32.xlu1 %v116_v14, %s146_s20 }
  0x1e   :  { %91 = vrot.lane.b32.xlu0 %v117_v15, %s147_s0 }
  0x74   :  { %v8_v16 = vpop.permute.xlu0 %7   ;;  %v20_v17 = vpop.permute.xlu1 %19  }
  0x75   :  { %10 = vst.msk [vmem:[#allocation0] sm:$0x1] %vm9_vm1, %v8_v16  }
  0x78   :  { %v14_v18 = vpop.permute.xlu0 %13   ;;  %v26_v19 = vpop.permute.xlu1 %25  }
  0x79   :  { %16 = vst.msk [vmem:[#allocation0] sm:$0x1] %vm15_vm2, %v14_v18  }
  0x7a   :  { %22 = vst.msk [vmem:[#allocation0] sm:$0x1] %vm21_vm3, %v20_v17  }
  0x7b   :  { %28 = vst.msk [vmem:[#allocation0] sm:$0x1] %vm27_vm4, %v26_v19  }
  0x7c   :  { %v32_v20 = vpop.permute.xlu0 %31   ;;  %v38_v21 = vpop.permute.xlu1 %37  }
  0x7d   :  { %34 = vst.msk [vmem:[#allocation0] sm:$0x1] %vm33_vm5, %v32_v20  }
  0x7e   :  { %40 = vst.msk [vmem:[#allocation0] sm:$0x1] %vm39_vm6, %v38_v21  }
  0x80   :  { %v44_v22 = vpop.permute.xlu0 %43   ;;  %v50_v23 = vpop.permute.xlu1 %49  }
  0x81   :  { %46 = vst.msk [vmem:[#allocation0] sm:$0x1] %vm45_vm7, %v44_v22  }
  0x82   :  { %52 = vst.msk [vmem:[#allocation0] sm:$0x1] %vm51_vm8, %v50_v23  }
  0x84   :  { %v56_v24 = vpop.permute.xlu0 %55   ;;  %v62_v25 = vpop.permute.xlu1 %61  }
  0x85   :  { %58 = vst.msk [vmem:[#allocation0] sm:$0x1] %vm57_vm9, %v56_v24  }
  0x86   :  { %64 = vst.msk [vmem:[#allocation0] sm:$0x1] %vm63_vm10, %v62_v25  }
  0x88   :  { %v68_v26 = vpop.permute.xlu0 %67   ;;  %v74_v27 = vpop.permute.xlu1 %73  }
  0x89   :  { %70 = vst.msk [vmem:[#allocation0] sm:$0x1] %vm69_vm11, %v68_v26  }
  0x8a   :  { %76 = vst.msk [vmem:[#allocation0] sm:$0x1] %vm75_vm12, %v74_v27  }
  0x8c   :  { %v80_v28 = vpop.permute.xlu0 %79   ;;  %v86_v29 = vpop.permute.xlu1 %85  }
  0x8d   :  { %82 = vst.msk [vmem:[#allocation0] sm:$0x1] %vm81_vm13, %v80_v28  }
  0x8e   :  { %88 = vst.msk [vmem:[#allocation0] sm:$0x1] %vm87_vm14, %v86_v29  }
  0x90   :  { %v92_v30 = vpop.permute.xlu0 %91  }
  0x91   :  { %94 = vst.msk [vmem:[#allocation0] sm:$0x1] %vm93_vm15, %v92_v30  }
  0x98   :  { %v99_v31 = vld [vmem:[#allocation0] sm:$0x1] }
  0x99   :  { %102 = vst [vmem:[%s210_s1] sm:$0x1] %v99_v31 }

// kernel: resnet_block_forward.12
= control target key start
LH: loop header
LB: loop body
LE: loop exit
PB: predicated region body
PF: predicated region fallthrough
CT: control target
= control target key end

     0   :  { %vm134_vm0 = vcmask 1041408   ;;  %vm109_vm1 = vcmask 31744   ;;  %vm19_vm2 = vcmask 64512   ;;  %v463_v1 = vmov 0.0   ;;  %s687_s1 = inlined_call_operand.vmem [shape: bf16[4,8], index: 1, kind: input, shape index: {}]   ;;  %s688_s0 = inlined_call_operand.vmem [shape: bf16[128,4], index: 0, kind: input, shape index: {}]   ;;  %s689_s2 = inlined_call_operand.vmem [shape: f32[128,8], index: 2, kind: output, shape index: {0}]   ;;  %s690_s3 = inlined_call_operand.vmem [shape: f32[1,8,8], index: 3, kind: output, shape index: {1}]   ;;  %s691_s4 = inlined_call_operand.vmem [shape: f32[1,8,8], index: 4, kind: output, shape index: {2}]  }
   0x1   :  { %v68_v0 = vld [vmem:[%s687_s1] sm:$0x3]  ;;  %22 = vst.msk [vmem:[#allocation2 + $0x10] sm:$0xff] %vm19_vm2, %v463_v1  ;;  %20 = vst.msk [vmem:[#allocation2] sm:$0xff] %vm19_vm2, %v463_v1  ;;  %v456_v4 = vld [vmem:[%s688_s0 + $0x8] sm:$0xff]  }
   0x2   :  { %21 = vst.msk [vmem:[#allocation2 + $0x8] sm:$0xff] %vm19_vm2, %v463_v1  ;;  %23 = vst.msk [vmem:[#allocation2 + $0x18] sm:$0xff] %vm19_vm2, %v463_v1  ;;  %452 = vmatprep.subr.msk.bf16.mxu0 %vm134_vm0, %v68_v0  ;;  %v136_v2 = vsel %vm134_vm0, %v68_v0, 0  ;;  %v455_v3 = vld [vmem:[%s688_s0] sm:$0xff]   ;;  %453 = vmatprep.subr.msk.bf16.mxu1 %vm134_vm0, %v68_v0  ;;  %v457_v5 = vld [vmem:[%s688_s0 + $0x10] sm:$0xff]  }
   0x3   :  { %24 = vst.msk [vmem:[#allocation2 + $0x20] sm:$0xff] %vm19_vm2, %v463_v1  ;;  %25 = vst.msk [vmem:[#allocation2 + $0x28] sm:$0xff] %vm19_vm2, %v463_v1  ;;  %433 = vmatpush3.bf16.msra.mxu0 %v136_v2  ;;  %451 = vmatpush3.bf16.msra.mxu1 %v136_v2  ;;  %v459_v6 = vld [vmem:[%s688_s0 + $0x20] sm:$0xff]   ;;  %v460_v7 = vld [vmem:[%s688_s0 + $0x28] sm:$0xff]  }
   0x4   :  { %26 = vst.msk [vmem:[#allocation2 + $0x30] sm:$0xff] %vm19_vm2, %v463_v1  ;;  %27 = vst.msk [vmem:[#allocation2 + $0x38] sm:$0xff] %vm19_vm2, %v463_v1  ;;  %434 = vmatprep.mubr.msk.bf16.mxu0 %vm109_vm1, %v455_v3  ;;  %442 = vmatprep.mubr.msk.bf16.mxu1 %vm109_vm1, %v459_v6  ;;  %v461_v8 = vld [vmem:[%s688_s0 + $0x30] sm:$0xff]   ;;  %v458_v9 = vld [vmem:[%s688_s0 + $0x18] sm:$0xff]  }
   0x5   :  { %28 = vst.msk [vmem:[#allocation2 + $0x40] sm:$0xff] %vm19_vm2, %v463_v1  ;;  %29 = vst.msk [vmem:[#allocation2 + $0x48] sm:$0xff] %vm19_vm2, %v463_v1  ;;  %v462_v10 = vld [vmem:[%s688_s0 + $0x38] sm:$0xff]  }
   0x6   :  { %30 = vst.msk [vmem:[#allocation2 + $0x50] sm:$0xff] %vm19_vm2, %v463_v1  ;;  %31 = vst.msk [vmem:[#allocation2 + $0x58] sm:$0xff] %vm19_vm2, %v463_v1  ;;  %435 = vmatmul.mubr.msk.bf16.vlgmr.msra.gmra.mxu0 %vm109_vm1, %v456_v4  ;;  %443 = vmatmul.mubr.msk.bf16.vlgmr.msra.gmra.mxu1 %vm109_vm1, %v460_v7 }
   0x7   :  { %32 = vst.msk [vmem:[#allocation2 + $0x60] sm:$0xff] %vm19_vm2, %v463_v1  ;;  %33 = vst.msk [vmem:[#allocation2 + $0x68] sm:$0xff] %vm19_vm2, %v463_v1  ;;  %438 = vmatprep.mubr.msk.bf16.mxu0 %vm109_vm1, %v457_v5  ;;  %446 = vmatprep.mubr.msk.bf16.mxu1 %vm109_vm1, %v461_v8 }
   0x8   :  { %34 = vst.msk [vmem:[#allocation2 + $0x70] sm:$0xff] %vm19_vm2, %v463_v1  ;;  %35 = vst.msk [vmem:[#allocation2 + $0x78] sm:$0xff] %vm19_vm2, %v463_v1  ;;  %v38_v11 = vld [vmem:[#allocation2 + $0x10] sm:$0xff]  ;;  %v36_v13 = vld [vmem:[#allocation2] sm:$0xff] }
   0x9   :  { %v39_v17 = vld [vmem:[#allocation2 + $0x18] sm:$0xff]  ;;  %v37_v22 = vld [vmem:[#allocation2 + $0x8] sm:$0xff] }
   0xa   :  { %v40_v34 = vld [vmem:[#allocation2 + $0x20] sm:$0xff]  ;;  %v41_v48 = vld [vmem:[#allocation2 + $0x28] sm:$0xff] }
   0xb   :  { %v42_v28 = vld [vmem:[#allocation2 + $0x30] sm:$0xff]  ;;  %v43_v41 = vld [vmem:[#allocation2 + $0x38] sm:$0xff] }
   0xc   :  { %v44_v20 = vld [vmem:[#allocation2 + $0x40] sm:$0xff]  ;;  %v45_v32 = vld [vmem:[#allocation2 + $0x48] sm:$0xff] }
   0xd   :  { %v46_v15 = vld [vmem:[#allocation2 + $0x50] sm:$0xff]  ;;  %v47_v26 = vld [vmem:[#allocation2 + $0x58] sm:$0xff] }
   0xe   :  { %439 = vmatmul.mubr.msk.bf16.gmra.mxu0 %vm109_vm1, %v458_v9  ;;  %447 = vmatmul.mubr.msk.bf16.gmra.mxu1 %vm109_vm1, %v462_v10  ;;  %v48_v45 = vld [vmem:[#allocation2 + $0x60] sm:$0xff]  ;;  %v49_v63 = vld [vmem:[#allocation2 + $0x68] sm:$0xff] }
   0xf   :  { %v50_v38 = vld [vmem:[#allocation2 + $0x70] sm:$0xff]  ;;  %v51_v53 = vld [vmem:[#allocation2 + $0x78] sm:$0xff] }
  0xc6   :  { %v436_v12 = vpop.f32.mrf.mxu0  ;;  %v444_v19 = vpop.f32.mrf.mxu1 }
  0xc7   :  { %v237_v14 = vadd.f32 %v436_v12, %v38_v11  ;;  %v245_v23 = vadd.f32 %v444_v19, %v46_v15 }
  0xc8   :  { %v172_v16 = vpop.f32.mrf.mxu0  ;;  %v204_v25 = vpop.f32.mrf.mxu1 }
  0xc9   :  { %254 = vst.msk [vmem:[#allocation2 + $0x10] sm:$0xff] %vm19_vm2, %v237_v14  ;;  %v235_v18 = vadd.f32 %v172_v16, %v36_v13  ;;  %262 = vst.msk [vmem:[#allocation2 + $0x50] sm:$0xff] %vm19_vm2, %v245_v23  ;;  %v243_v29 = vadd.f32 %v204_v25, %v44_v20 }
  0xca   :  { %v437_v21 = vpop.f32.mrf.mxu0  ;;  %v445_v31 = vpop.f32.mrf.mxu1 }
  0xcb   :  { %252 = vst.msk [vmem:[#allocation2] sm:$0xff] %vm19_vm2, %v235_v18  ;;  %v238_v24 = vadd.f32 %v437_v21, %v39_v17  ;;  %260 = vst.msk [vmem:[#allocation2 + $0x40] sm:$0xff] %vm19_vm2, %v243_v29  ;;  %v246_v35 = vadd.f32 %v445_v31, %v47_v26 }
  0xcc   :  { %v175_v27 = vpop.f32.mrf.mxu0  ;;  %v207_v37 = vpop.f32.mrf.mxu1 }
  0xcd   :  { %255 = vst.msk [vmem:[#allocation2 + $0x18] sm:$0xff] %vm19_vm2, %v238_v24  ;;  %v236_v30 = vadd.f32 %v175_v27, %v37_v22  ;;  %263 = vst.msk [vmem:[#allocation2 + $0x58] sm:$0xff] %vm19_vm2, %v246_v35  ;;  %v244_v42 = vadd.f32 %v207_v37, %v45_v32 }
  0xce   :  { %v440_v33 = vpop.f32.mrf.mxu0  ;;  %v448_v44 = vpop.f32.mrf.mxu1 }
  0xcf   :  { %253 = vst.msk [vmem:[#allocation2 + $0x8] sm:$0xff] %vm19_vm2, %v236_v30  ;;  %v241_v36 = vadd.f32 %v440_v33, %v42_v28  ;;  %261 = vst.msk [vmem:[#allocation2 + $0x48] sm:$0xff] %vm19_vm2, %v244_v42  ;;  %v249_v49 = vadd.f32 %v448_v44, %v50_v38 }
  0xd0   :  { %v273_v39 = vld [vmem:[#allocation2 + $0x10] sm:$0xff]  ;;  %v188_v40 = vpop.f32.mrf.mxu0  ;;  %v220_v52 = vpop.f32.mrf.mxu1 }
  0xd1   :  { %289 = vst.msk [vmem:[%s689_s2 + $0x10] sm:$0xff] %vm19_vm2, %v273_v39  ;;  %258 = vst.msk [vmem:[#allocation2 + $0x30] sm:$0xff] %vm19_vm2, %v241_v36  ;;  %v239_v43 = vadd.f32 %v188_v40, %v40_v34  ;;  %v561_v50 = vld [vmem:[#allocation2 + $0x50] sm:$0xff]  ;;  %v247_v56 = vadd.f32 %v220_v52, %v48_v45  ;;  %v342_v0 = vmul.f32 %v273_v39, %v273_v39  ;;  %v306_v6 = vsel %vm19_vm2, %v273_v39, 0.0 }
  0xd2   :  { %v271_v46 = vld [vmem:[#allocation2] sm:$0xff]  ;;  %v441_v47 = vpop.f32.mrf.mxu0  ;;  %297 = vst.msk [vmem:[%s689_s2 + $0x50] sm:$0xff] %vm19_vm2, %v561_v50  ;;  %266 = vst.msk [vmem:[#allocation2 + $0x70] sm:$0xff] %vm19_vm2, %v249_v49  ;;  %v449_v60 = vpop.f32.mrf.mxu1 }
  0xd3   :  { %287 = vst.msk [vmem:[%s689_s2] sm:$0xff] %vm19_vm2, %v271_v46  ;;  %256 = vst.msk [vmem:[#allocation2 + $0x20] sm:$0xff] %vm19_vm2, %v239_v43  ;;  %v242_v51 = vadd.f32 %v441_v47, %v43_v41  ;;  %v340_v57 = vmul.f32 %v271_v46, %v271_v46  ;;  %v574_v58 = vld [vmem:[#allocation2 + $0x40] sm:$0xff]  ;;  %v250_v62 = vadd.f32 %v449_v60, %v51_v53  ;;  %v303_v1 = vsel %vm19_vm2, %v271_v46, 0.0 }
  0xd4   :  { %v274_v54 = vld [vmem:[#allocation2 + $0x18] sm:$0xff]  ;;  %v191_v55 = vpop.f32.mrf.mxu0  ;;  %295 = vst.msk [vmem:[%s689_s2 + $0x40] sm:$0xff] %vm19_vm2, %v574_v58  ;;  %264 = vst.msk [vmem:[#allocation2 + $0x60] sm:$0xff] %vm19_vm2, %v247_v56  ;;  %v223_v5 = vpop.f32.mrf.mxu1  ;;  %v359_v17 = vsel %vm19_vm2, %v342_v0, 0.0  ;;  %v348_v45 = vmul.f32 %v574_v58, %v574_v58  ;;  %v318_v49 = vsel %vm19_vm2, %v574_v58, 0.0  ;;  %v322_v60 = vsel %vm19_vm2, %v561_v50, 0.0 }
  0xd5   :  { %290 = vst.msk [vmem:[%s689_s2 + $0x18] sm:$0xff] %vm19_vm2, %v274_v54  ;;  %259 = vst.msk [vmem:[#allocation2 + $0x38] sm:$0xff] %vm19_vm2, %v242_v51  ;;  %v240_v59 = vadd.f32 %v191_v55, %v41_v48  ;;  %v589_v4 = vld [vmem:[#allocation2 + $0x58] sm:$0xff]  ;;  %v356_v9 = vsel %vm19_vm2, %v340_v57, 0.0  ;;  %v343_v10 = vmul.f32 %v274_v54, %v274_v54  ;;  %v248_v13 = vadd.f32 %v223_v5, %v49_v63 }
  0xd6   :  { %v272_v61 = vld [vmem:[#allocation2 + $0x8] sm:$0xff]  ;;  %298 = vst.msk [vmem:[%s689_s2 + $0x58] sm:$0xff] %vm19_vm2, %v589_v4  ;;  %267 = vst.msk [vmem:[#allocation2 + $0x78] sm:$0xff] %vm19_vm2, %v250_v62  ;;  %v308_v18 = vsel %vm19_vm2, %v274_v54, 0.0  ;;  %v350_v54 = vmul.f32 %v561_v50, %v561_v50  ;;  %v371_v55 = vsel %vm19_vm2, %v348_v45, 0.0 }
  0xd7   :  { %288 = vst.msk [vmem:[%s689_s2 + $0x8] sm:$0xff] %vm19_vm2, %v272_v61  ;;  %v304_v2 = vsel %vm19_vm2, %v272_v61, 0.0  ;;  %v341_v3 = vmul.f32 %v272_v61, %v272_v61  ;;  %257 = vst.msk [vmem:[#allocation2 + $0x28] sm:$0xff] %vm19_vm2, %v240_v59  ;;  %v280_v12 = vld [vmem:[#allocation2 + $0x48] sm:$0xff]  ;;  %v361_v24 = vsel %vm19_vm2, %v343_v10, 0.0  ;;  %v351_v61 = vmul.f32 %v589_v4, %v589_v4 }
  0xd8   :  { %v305_v7 = vadd.f32 %v304_v2, %v303_v1  ;;  %v277_v8 = vld [vmem:[#allocation2 + $0x30] sm:$0xff]  ;;  %296 = vst.msk [vmem:[%s689_s2 + $0x48] sm:$0xff] %vm19_vm2, %v280_v12  ;;  %265 = vst.msk [vmem:[#allocation2 + $0x68] sm:$0xff] %vm19_vm2, %v248_v13  ;;  %v349_v51 = vmul.f32 %v280_v12, %v280_v12  ;;  %v320_v56 = vsel %vm19_vm2, %v280_v12, 0.0  ;;  %v375_v0 = vsel %vm19_vm2, %v350_v54, 0.0 }
  0xd9   :  { %v357_v11 = vsel %vm19_vm2, %v341_v3, 0.0  ;;  %293 = vst.msk [vmem:[%s689_s2 + $0x30] sm:$0xff] %vm19_vm2, %v277_v8  ;;  %v614_v20 = vld [vmem:[#allocation2 + $0x70] sm:$0xff]  ;;  %v346_v30 = vmul.f32 %v277_v8, %v277_v8  ;;  %v314_v37 = vsel %vm19_vm2, %v277_v8, 0.0  ;;  %v324_v1 = vsel %vm19_vm2, %v589_v4, 0.0 }
  0xda   :  { %v307_v14 = vadd.f32 %v306_v6, %v305_v7  ;;  %v358_v15 = vadd.f32 %v357_v11, %v356_v9  ;;  %v275_v16 = vld [vmem:[#allocation2 + $0x20] sm:$0xff]  ;;  %301 = vst.msk [vmem:[%s689_s2 + $0x70] sm:$0xff] %vm19_vm2, %v614_v20  ;;  %v373_v58 = vsel %vm19_vm2, %v349_v51, 0.0  ;;  %v377_v6 = vsel %vm19_vm2, %v351_v61, 0.0 }
  0xdb   :  { %291 = vst.msk [vmem:[%s689_s2 + $0x20] sm:$0xff] %vm19_vm2, %v275_v16  ;;  %v344_v19 = vmul.f32 %v275_v16, %v275_v16  ;;  %v310_v25 = vsel %vm19_vm2, %v275_v16, 0.0  ;;  %v283_v26 = vld [vmem:[#allocation2 + $0x60] sm:$0xff]  ;;  %v367_v43 = vsel %vm19_vm2, %v346_v30, 0.0  ;;  %v354_v10 = vmul.f32 %v614_v20, %v614_v20 }
  0xdc   :  { %v360_v21 = vadd.f32 %v359_v17, %v358_v15  ;;  %v309_v22 = vadd.f32 %v308_v18, %v307_v14  ;;  %v278_v23 = vld [vmem:[#allocation2 + $0x38] sm:$0xff]  ;;  %299 = vst.msk [vmem:[%s689_s2 + $0x60] sm:$0xff] %vm19_vm2, %v283_v26  ;;  %v352_v2 = vmul.f32 %v283_v26, %v283_v26  ;;  %v326_v7 = vsel %vm19_vm2, %v283_v26, 0.0 }
  0xdd   :  { %294 = vst.msk [vmem:[%s689_s2 + $0x38] sm:$0xff] %vm19_vm2, %v278_v23  ;;  %v363_v31 = vsel %vm19_vm2, %v344_v19, 0.0  ;;  %v286_v34 = vld [vmem:[#allocation2 + $0x78] sm:$0xff]  ;;  %v347_v38 = vmul.f32 %v278_v23, %v278_v23  ;;  %v316_v44 = vsel %vm19_vm2, %v278_v23, 0.0  ;;  %v330_v4 = vsel %vm19_vm2, %v614_v20, 0.0 }
  0xde   :  { %v311_v27 = vadd.f32 %v310_v25, %v309_v22  ;;  %v362_v28 = vadd.f32 %v361_v24, %v360_v21  ;;  %v276_v29 = vld [vmem:[#allocation2 + $0x28] sm:$0xff]  ;;  %302 = vst.msk [vmem:[%s689_s2 + $0x78] sm:$0xff] %vm19_vm2, %v286_v34  ;;  %v379_v11 = vsel %vm19_vm2, %v352_v2, 0.0  ;;  %v355_v15 = vmul.f32 %v286_v34, %v286_v34 }
  0xdf   :  { %292 = vst.msk [vmem:[%s689_s2 + $0x28] sm:$0xff] %vm19_vm2, %v276_v29  ;;  %v312_v32 = vsel %vm19_vm2, %v276_v29, 0.0  ;;  %v345_v33 = vmul.f32 %v276_v29, %v276_v29  ;;  %v284_v42 = vld [vmem:[#allocation2 + $0x68] sm:$0xff]  ;;  %v369_v48 = vsel %vm19_vm2, %v347_v38, 0.0  ;;  %v383_v19 = vsel %vm19_vm2, %v354_v10, 0.0 }
  0xe0   :  { %v364_v35 = vadd.f32 %v363_v31, %v362_v28  ;;  %v313_v36 = vadd.f32 %v312_v32, %v311_v27  ;;  %300 = vst.msk [vmem:[%s689_s2 + $0x68] sm:$0xff] %vm19_vm2, %v284_v42  ;;  %v353_v50 = vmul.f32 %v284_v42, %v284_v42  ;;  %v328_v12 = vsel %vm19_vm2, %v284_v42, 0.0 }
  0xe1   :  { %v365_v39 = vsel %vm19_vm2, %v345_v33, 0.0  ;;  %v332_v21 = vsel %vm19_vm2, %v286_v34, 0.0  ;;  %v385_v24 = vsel %vm19_vm2, %v355_v15, 0.0 }
  0xe2   :  { %v315_v40 = vadd.f32 %v314_v37, %v313_v36  ;;  %v366_v41 = vadd.f32 %v365_v39, %v364_v35  ;;  %v381_v16 = vsel %vm19_vm2, %v353_v50, 0.0 }
  0xe4   :  { %v368_v46 = vadd.f32 %v367_v43, %v366_v41  ;;  %v317_v47 = vadd.f32 %v316_v44, %v315_v40 }
  0xe6   :  { %v319_v52 = vadd.f32 %v318_v49, %v317_v47  ;;  %v370_v53 = vadd.f32 %v369_v48, %v368_v46 }
  0xe8   :  { %v321_v57 = vadd.f32 %v320_v56, %v319_v52  ;;  %v372_v59 = vadd.f32 %v371_v55, %v370_v53 }
  0xea   :  { %v323_v62 = vadd.f32 %v322_v60, %v321_v57  ;;  %v374_v63 = vadd.f32 %v373_v58, %v372_v59 }
  0xec   :  { %v376_v3 = vadd.f32 %v375_v0, %v374_v63  ;;  %v325_v5 = vadd.f32 %v324_v1, %v323_v62 }
  0xee   :  { %v327_v8 = vadd.f32 %v326_v7, %v325_v5  ;;  %v378_v9 = vadd.f32 %v377_v6, %v376_v3 }
  0xf0   :  { %v380_v13 = vadd.f32 %v379_v11, %v378_v9  ;;  %v329_v14 = vadd.f32 %v328_v12, %v327_v8 }
  0xf2   :  { %v331_v17 = vadd.f32 %v330_v4, %v329_v14  ;;  %v382_v18 = vadd.f32 %v381_v16, %v380_v13 }
  0xf4   :  { %v333_v22 = vadd.f32 %v332_v21, %v331_v17  ;;  %v384_v23 = vadd.f32 %v383_v19, %v382_v18 }
  0xf6   :  { %v334_v25 = vrot.slane %v333_v22, 4  ;;  %v386_v26 = vadd.f32 %v385_v24, %v384_v23 }
  0xf8   :  { %v335_v27 = vadd.f32 %v334_v25, %v333_v22  ;;  %v387_v28 = vrot.slane %v386_v26, 4 }
  0xfa   :  { %v336_v29 = vrot.slane %v335_v27, 2  ;;  %v388_v30 = vadd.f32 %v387_v28, %v386_v26 }
  0xfc   :  { %v337_v20 = vadd.f32 %v336_v29, %v335_v27  ;;  %v389_v31 = vrot.slane %v388_v30, 2 }
  0xfe   :  { %v338_v32 = vrot.slane %v337_v20, 1  ;;  %v390_v33 = vadd.f32 %v389_v31, %v388_v30 }
 0x100   :  { %v339_v35 = vadd.f32 %v338_v32, %v337_v20  ;;  %v391_v36 = vrot.slane %v390_v33, 1 }
 0x102   :  { %v392_v37 = vadd.f32 %v391_v36, %v390_v33  ;;  %393 = vst.msk [vmem:[%s690_s3] sm:$0xff] %vm19_vm2, %v339_v35 }
 0x104   :  { %394 = vst.msk [vmem:[%s691_s4] sm:$0xff] %vm19_vm2, %v392_v37 }

// kernel: tile.48
= control target key start
LH: loop header
LB: loop body
LE: loop exit
PB: predicated region body
PF: predicated region fallthrough
CT: control target
= control target key end

     0   :  { %s40_s0 = inlined_call_operand.vmem [shape: f32[4], index: 0, kind: input, shape index: {}]   ;;  %s41_s1 = inlined_call_operand.vmem [shape: f32[32,4], index: 1, kind: output, shape index: {}]  }
   0x1   :  { %v4_v0 = vld [vmem:[%s40_s0] ss:$0 sm:$0xff] }
   0x2   :  { %5 = vst [vmem:[%s41_s1] sm:$0xff] %v4_v0  ;;  %12 = vst [vmem:[%s41_s1 + $0x8] sm:$0xff] %v4_v0 }
   0x3   :  { %13 = vst [vmem:[%s41_s1 + $0x10] sm:$0xff] %v4_v0  ;;  %14 = vst [vmem:[%s41_s1 + $0x18] sm:$0xff] %v4_v0 }

// kernel: tile.49
= control target key start
LH: loop header
LB: loop body
LE: loop exit
PB: predicated region body
PF: predicated region fallthrough
CT: control target
= control target key end

     0   :  { %s261_s10 = smov 124   ;;  %s262_s11 = smov 116   ;;  %vm3_vm0 = vcmask 31744   ;;  %vm9_vm1 = vcmask 1048544   ;;  %vm15_vm2 = vcmask 1015744   ;;  %vm21_vm3 = vcmask 982944   ;;  %s401_s0 = inlined_call_operand.vmem [shape: f32[32,4], index: 0, kind: input, shape index: {}]   ;;  %s402_s1 = inlined_call_operand.vmem [shape: f32[1,128], index: 1, kind: output, shape index: {}]  }
   0x1   :  { %v199_v0 = vld [vmem:[%s401_s0 + $0x1f] sm:$0x1]   ;;  %v201_v1 = vld [vmem:[%s401_s0 + $0x1d] sm:$0x1]   ;;  %v200_v2 = vld [vmem:[%s401_s0 + $0x1e] sm:$0x1]  }
   0x2   :  { %7 = vrot.lane.b32.xlu0 %v199_v0, %s261_s10  ;;  %19 = vrot.lane.b32.xlu1 %v201_v1, %s262_s11  ;;  %v202_v3 = vld [vmem:[%s401_s0 + $0x1c] sm:$0x1]   ;;  %s263_s16 = smov 120   ;;  %s264_s17 = smov 112   ;;  %v203_v4 = vld [vmem:[%s401_s0 + $0x1b] sm:$0x1]  }
   0x3   :  { %v204_v5 = vld [vmem:[%s401_s0 + $0x1a] sm:$0x1]   ;;  %s265_s22 = smov 108   ;;  %s266_s23 = smov 104   ;;  %v205_v6 = vld [vmem:[%s401_s0 + $0x19] sm:$0x1]  }
   0x4   :  { %v206_v7 = vld [vmem:[%s401_s0 + $0x18] sm:$0x1]   ;;  %s267_s28 = smov 100   ;;  %s268_s29 = smov 96   ;;  %v207_v8 = vld [vmem:[%s401_s0 + $0x17] sm:$0x1]  }
   0x5   :  { %v208_v9 = vld [vmem:[%s401_s0 + $0x16] sm:$0x1]   ;;  %v2_v10 = vld [vmem:[%s401_s0] sm:$0x1]   ;;  %s269_s7 = smov 92   ;;  %s270_s8 = smov 88  }
   0x6   :  { %13 = vrot.lane.b32.xlu0 %v200_v2, %s263_s16  ;;  %25 = vrot.lane.b32.xlu1 %v202_v3, %s264_s17  ;;  %4 = vst.msk [vmem:[#allocation0] sm:$0x1] %vm3_vm0, %v2_v10   ;;  %v209_v11 = vld [vmem:[%s401_s0 + $0x15] sm:$0x1]   ;;  %v210_v12 = vld [vmem:[%s401_s0 + $0x14] sm:$0x1]  }
   0x7   :  { %s271_s13 = smov 84   ;;  %s272_s14 = smov 80   ;;  %v211_v13 = vld [vmem:[%s401_s0 + $0x13] sm:$0x1]   ;;  %v212_v14 = vld [vmem:[%s401_s0 + $0x12] sm:$0x1]  }
   0x8   :  { %s273_s19 = smov 76   ;;  %s274_s20 = smov 72   ;;  %v213_v15 = vld [vmem:[%s401_s0 + $0x11] sm:$0x1]   ;;  %v214_v16 = vld [vmem:[%s401_s0 + $0x10] sm:$0x1]  }
   0x9   :  { %s275_s25 = smov 68   ;;  %s276_s26 = smov 64   ;;  %v215_v17 = vld [vmem:[%s401_s0 + $0xf] sm:$0x1]   ;;  %v216_v18 = vld [vmem:[%s401_s0 + $0xe] sm:$0x1]  }
   0xa   :  { %31 = vrot.lane.b32.xlu0 %v203_v4, %s265_s22  ;;  %37 = vrot.lane.b32.xlu1 %v204_v5, %s266_s23  ;;  %s277_s2 = smov 60   ;;  %s278_s3 = smov 56   ;;  %v217_v19 = vld [vmem:[%s401_s0 + $0xd] sm:$0x1]   ;;  %v218_v20 = vld [vmem:[%s401_s0 + $0xc] sm:$0x1]  }
   0xb   :  { %s280_s9 = smov 48   ;;  %v219_v21 = vld [vmem:[%s401_s0 + $0xb] sm:$0x1]   ;;  %v220_v22 = vld [vmem:[%s401_s0 + $0xa] sm:$0x1]   ;;  %s282_s15 = smov 40  }
   0xc   :  { %v221_v23 = vld [vmem:[%s401_s0 + $0x9] sm:$0x1]   ;;  %v222_v24 = vld [vmem:[%s401_s0 + $0x8] sm:$0x1]   ;;  %s284_s21 = smov 32   ;;  %s286_s27 = smov 24  }
   0xd   :  { %v223_v25 = vld [vmem:[%s401_s0 + $0x7] sm:$0x1]   ;;  %v224_v26 = vld [vmem:[%s401_s0 + $0x6] sm:$0x1]   ;;  %v225_v27 = vld [vmem:[%s401_s0 + $0x5] sm:$0x1]  }
   0xe   :  { %43 = vrot.lane.b32.xlu0 %v205_v6, %s267_s28  ;;  %49 = vrot.lane.b32.xlu1 %v206_v7, %s268_s29  ;;  %v226_v28 = vld [vmem:[%s401_s0 + $0x4] sm:$0x1]   ;;  %s288_s4 = smov 16   ;;  %v227_v29 = vld [vmem:[%s401_s0 + $0x3] sm:$0x1]   ;;  %s290_s10 = smov 8  }
   0xf   :  { %v228_v30 = vld [vmem:[%s401_s0 + $0x2] sm:$0x1]   ;;  %v229_v31 = vld [vmem:[%s401_s0 + $0x1] sm:$0x1]   ;;  %s291_s0 = smov 4   ;;  %vm27_vm4 = vcmask 950144  }
  0x10   :  { %vm33_vm5 = vcmask 917344   ;;  %vm39_vm6 = vcmask 884544   ;;  %vm45_vm7 = vcmask 851744   ;;  %vm51_vm8 = vcmask 818944  }
  0x11   :  { %vm57_vm9 = vcmask 786144   ;;  %vm63_vm10 = vcmask 753344   ;;  %vm69_vm11 = vcmask 720544   ;;  %vm75_vm12 = vcmask 687744  }
  0x12   :  { %55 = vrot.lane.b32.xlu0 %v207_v8, %s269_s7  ;;  %61 = vrot.lane.b32.xlu1 %v208_v9, %s270_s8  ;;  %s279_s8 = smov 52   ;;  %vm81_vm13 = vcmask 654944   ;;  %vm87_vm14 = vcmask 622144   ;;  %vm93_vm15 = vcmask 589344   ;;  %vm99_vm0 = vcmask 556544  }
  0x16   :  { %67 = vrot.lane.b32.xlu0 %v209_v11, %s271_s13  ;;  %73 = vrot.lane.b32.xlu1 %v210_v12, %s272_s14  ;;  %s281_s14 = smov 44  }
  0x1a   :  { %79 = vrot.lane.b32.xlu0 %v211_v13, %s273_s19  ;;  %85 = vrot.lane.b32.xlu1 %v212_v14, %s274_s20  ;;  %s283_s20 = smov 36  }
  0x1e   :  { %91 = vrot.lane.b32.xlu0 %v213_v15, %s275_s25  ;;  %97 = vrot.lane.b32.xlu1 %v214_v16, %s276_s26  ;;  %s285_s26 = smov 28  }
  0x22   :  { %103 = vrot.lane.b32.xlu0 %v215_v17, %s277_s2  ;;  %109 = vrot.lane.b32.xlu1 %v216_v18, %s278_s3  ;;  %s287_s3 = smov 20  }
  0x26   :  { %115 = vrot.lane.b32.xlu0 %v217_v19, %s279_s8  ;;  %121 = vrot.lane.b32.xlu1 %v218_v20, %s280_s9  ;;  %s289_s9 = smov 12  }
  0x2a   :  { %127 = vrot.lane.b32.xlu0 %v219_v21, %s281_s14  ;;  %133 = vrot.lane.b32.xlu1 %v220_v22, %s282_s15 }
  0x2e   :  { %139 = vrot.lane.b32.xlu0 %v221_v23, %s283_s20  ;;  %145 = vrot.lane.b32.xlu1 %v222_v24, %s284_s21 }
  0x32   :  { %151 = vrot.lane.b32.xlu0 %v223_v25, %s285_s26  ;;  %157 = vrot.lane.b32.xlu1 %v224_v26, %s286_s27 }
  0x36   :  { %163 = vrot.lane.b32.xlu0 %v225_v27, %s287_s3  ;;  %169 = vrot.lane.b32.xlu1 %v226_v28, %s288_s4 }
  0x3a   :  { %175 = vrot.lane.b32.xlu0 %v227_v29, %s289_s9  ;;  %181 = vrot.lane.b32.xlu1 %v228_v30, %s290_s10 }
  0x3e   :  { %187 = vrot.lane.b32.xlu0 %v229_v31, %s291_s0 }
  0x74   :  { %v8_v32 = vpop.permute.xlu0 %7   ;;  %v20_v33 = vpop.permute.xlu1 %19  }
  0x75   :  { %10 = vst.msk [vmem:[#allocation0] sm:$0x1] %vm9_vm1, %v8_v32   ;;  %vm105_vm1 = vcmask 523744  }
  0x78   :  { %v14_v34 = vpop.permute.xlu0 %13   ;;  %v26_v35 = vpop.permute.xlu1 %25  }
  0x79   :  { %16 = vst.msk [vmem:[#allocation0] sm:$0x1] %vm15_vm2, %v14_v34   ;;  %vm111_vm2 = vcmask 490944  }
  0x7a   :  { %22 = vst.msk [vmem:[#allocation0] sm:$0x1] %vm21_vm3, %v20_v33   ;;  %vm117_vm3 = vcmask 458144  }
  0x7b   :  { %28 = vst.msk [vmem:[#allocation0] sm:$0x1] %vm27_vm4, %v26_v35   ;;  %vm123_vm4 = vcmask 425344  }
  0x7c   :  { %v32_v36 = vpop.permute.xlu0 %31   ;;  %v38_v37 = vpop.permute.xlu1 %37  }
  0x7d   :  { %34 = vst.msk [vmem:[#allocation0] sm:$0x1] %vm33_vm5, %v32_v36   ;;  %vm129_vm5 = vcmask 392544  }
  0x7e   :  { %40 = vst.msk [vmem:[#allocation0] sm:$0x1] %vm39_vm6, %v38_v37   ;;  %vm135_vm6 = vcmask 359744  }
  0x80   :  { %v44_v38 = vpop.permute.xlu0 %43   ;;  %v50_v39 = vpop.permute.xlu1 %49  }
  0x81   :  { %46 = vst.msk [vmem:[#allocation0] sm:$0x1] %vm45_vm7, %v44_v38   ;;  %vm141_vm7 = vcmask 326944  }
  0x82   :  { %52 = vst.msk [vmem:[#allocation0] sm:$0x1] %vm51_vm8, %v50_v39   ;;  %vm147_vm8 = vcmask 294144  }
  0x84   :  { %v56_v40 = vpop.permute.xlu0 %55   ;;  %v62_v41 = vpop.permute.xlu1 %61  }
  0x85   :  { %58 = vst.msk [vmem:[#allocation0] sm:$0x1] %vm57_vm9, %v56_v40   ;;  %vm153_vm9 = vcmask 261344  }
  0x86   :  { %64 = vst.msk [vmem:[#allocation0] sm:$0x1] %vm63_vm10, %v62_v41   ;;  %vm159_vm10 = vcmask 228544  }
  0x88   :  { %v68_v42 = vpop.permute.xlu0 %67   ;;  %v74_v43 = vpop.permute.xlu1 %73  }
  0x89   :  { %70 = vst.msk [vmem:[#allocation0] sm:$0x1] %vm69_vm11, %v68_v42   ;;  %vm165_vm11 = vcmask 195744  }
  0x8a   :  { %76 = vst.msk [vmem:[#allocation0] sm:$0x1] %vm75_vm12, %v74_v43   ;;  %vm171_vm12 = vcmask 162944  }
  0x8c   :  { %v80_v44 = vpop.permute.xlu0 %79   ;;  %v86_v45 = vpop.permute.xlu1 %85  }
  0x8d   :  { %82 = vst.msk [vmem:[#allocation0] sm:$0x1] %vm81_vm13, %v80_v44   ;;  %vm177_vm13 = vcmask 130144  }
  0x8e   :  { %88 = vst.msk [vmem:[#allocation0] sm:$0x1] %vm87_vm14, %v86_v45   ;;  %vm183_vm14 = vcmask 97344  }
  0x90   :  { %v92_v46 = vpop.permute.xlu0 %91   ;;  %v98_v47 = vpop.permute.xlu1 %97  }
  0x91   :  { %94 = vst.msk [vmem:[#allocation0] sm:$0x1] %vm93_vm15, %v92_v46   ;;  %vm189_vm15 = vcmask 64544  }
  0x92   :  { %100 = vst.msk [vmem:[#allocation0] sm:$0x1] %vm99_vm0, %v98_v47  }
  0x94   :  { %v104_v48 = vpop.permute.xlu0 %103   ;;  %v110_v49 = vpop.permute.xlu1 %109  }
  0x95   :  { %106 = vst.msk [vmem:[#allocation0] sm:$0x1] %vm105_vm1, %v104_v48  }
  0x96   :  { %112 = vst.msk [vmem:[#allocation0] sm:$0x1] %vm111_vm2, %v110_v49  }
  0x98   :  { %v116_v50 = vpop.permute.xlu0 %115   ;;  %v122_v51 = vpop.permute.xlu1 %121  }
  0x99   :  { %118 = vst.msk [vmem:[#allocation0] sm:$0x1] %vm117_vm3, %v116_v50  }
  0x9a   :  { %124 = vst.msk [vmem:[#allocation0] sm:$0x1] %vm123_vm4, %v122_v51  }
  0x9c   :  { %v128_v52 = vpop.permute.xlu0 %127   ;;  %v134_v53 = vpop.permute.xlu1 %133  }
  0x9d   :  { %130 = vst.msk [vmem:[#allocation0] sm:$0x1] %vm129_vm5, %v128_v52  }
  0x9e   :  { %136 = vst.msk [vmem:[#allocation0] sm:$0x1] %vm135_vm6, %v134_v53  }
  0xa0   :  { %v140_v54 = vpop.permute.xlu0 %139   ;;  %v146_v55 = vpop.permute.xlu1 %145  }
  0xa1   :  { %142 = vst.msk [vmem:[#allocation0] sm:$0x1] %vm141_vm7, %v140_v54  }
  0xa2   :  { %148 = vst.msk [vmem:[#allocation0] sm:$0x1] %vm147_vm8, %v146_v55  }
  0xa4   :  { %v152_v56 = vpop.permute.xlu0 %151   ;;  %v158_v57 = vpop.permute.xlu1 %157  }
  0xa5   :  { %154 = vst.msk [vmem:[#allocation0] sm:$0x1] %vm153_vm9, %v152_v56  }
  0xa6   :  { %160 = vst.msk [vmem:[#allocation0] sm:$0x1] %vm159_vm10, %v158_v57  }
  0xa8   :  { %v164_v58 = vpop.permute.xlu0 %163   ;;  %v170_v59 = vpop.permute.xlu1 %169  }
  0xa9   :  { %166 = vst.msk [vmem:[#allocation0] sm:$0x1] %vm165_vm11, %v164_v58  }
  0xaa   :  { %172 = vst.msk [vmem:[#allocation0] sm:$0x1] %vm171_vm12, %v170_v59  }
  0xac   :  { %v176_v60 = vpop.permute.xlu0 %175   ;;  %v182_v61 = vpop.permute.xlu1 %181  }
  0xad   :  { %178 = vst.msk [vmem:[#allocation0] sm:$0x1] %vm177_vm13, %v176_v60  }
  0xae   :  { %184 = vst.msk [vmem:[#allocation0] sm:$0x1] %vm183_vm14, %v182_v61  }
  0xb0   :  { %v188_v62 = vpop.permute.xlu0 %187  }
  0xb1   :  { %190 = vst.msk [vmem:[#allocation0] sm:$0x1] %vm189_vm15, %v188_v62  }
  0xb8   :  { %v195_v63 = vld [vmem:[#allocation0] sm:$0x1] }
  0xb9   :  { %198 = vst [vmem:[%s402_s1] sm:$0x1] %v195_v63 }

// kernel: resnet_block_forward.7
= control target key start
LH: loop header
LB: loop body
LE: loop exit
PB: predicated region body
PF: predicated region fallthrough
CT: control target
= control target key end

     0   :  { %vm476_vm0 = vcmask 1045504   ;;  %vm379_vm1 = vcmask 97280   ;;  %vm19_vm2 = vcmask 31744   ;;  %v1960_v1 = vmov 0.0   ;;  %s2988_s1 = inlined_call_operand.vmem [shape: bf16[12,4], index: 1, kind: input, shape index: {}]   ;;  %s2989_s0 = inlined_call_operand.vmem [shape: bf16[512,12], index: 0, kind: input, shape index: {}]   ;;  %s2990_s2 = inlined_call_operand.vmem [shape: bf16[512,4], index: 2, kind: output, shape index: {0}]   ;;  %s2991_s3 = inlined_call_operand.vmem [shape: f32[1,8,4], index: 3, kind: output, shape index: {1}]   ;;  %s2992_s4 = inlined_call_operand.vmem [shape: f32[1,8,4], index: 4, kind: output, shape index: {2}]  }
   0x1   :  { %v1989_v0 = vld [vmem:[%s2988_s1] sm:$0x3f]   ;;  %22 = vst.msk [vmem:[#allocation2 + $0x10] sm:$0xff] %vm19_vm2, %v1960_v1  ;;  %20 = vst.msk [vmem:[#allocation2] sm:$0xff] %vm19_vm2, %v1960_v1  ;;  %v1929_v4 = vld [vmem:[%s2989_s0 + $0x8] sm:$0xff]   ;;  %vm1221_vm3 = vcmask 27648  }
   0x2   :  { %21 = vst.msk [vmem:[#allocation2 + $0x8] sm:$0xff] %vm19_vm2, %v1960_v1  ;;  %23 = vst.msk [vmem:[#allocation2 + $0x18] sm:$0xff] %vm19_vm2, %v1960_v1  ;;  %v1928_v2 = vld [vmem:[%s2989_s0] sm:$0xff]   ;;  %1924 = vmatprep.subr.msk.bf16.mxu0 %vm476_vm0, %v1989_v0  ;;  %v478_v3 = vsel %vm476_vm0, %v1989_v0, 0  ;;  %1925 = vmatprep.subr.msk.bf16.mxu1 %vm476_vm0, %v1989_v0  ;;  %v1930_v5 = vld [vmem:[%s2989_s0 + $0x10] sm:$0xff]  }
   0x3   :  { %24 = vst.msk [vmem:[#allocation2 + $0x20] sm:$0xff] %vm19_vm2, %v1960_v1  ;;  %25 = vst.msk [vmem:[#allocation2 + $0x28] sm:$0xff] %vm19_vm2, %v1960_v1  ;;  %1857 = vmatpush3.bf16.msra.mxu0 %v478_v3  ;;  %1858 = vmatprep.mubr.msk.bf16.mxu0 %vm379_vm1, %v1928_v2  ;;  %v1931_v6 = vld [vmem:[%s2989_s0 + $0x18] sm:$0xff]   ;;  %v1932_v7 = vld [vmem:[%s2989_s0 + $0x20] sm:$0xff]  }
   0x4   :  { %26 = vst.msk [vmem:[#allocation2 + $0x30] sm:$0xff] %vm19_vm2, %v1960_v1  ;;  %27 = vst.msk [vmem:[#allocation2 + $0x38] sm:$0xff] %vm19_vm2, %v1960_v1  ;;  %1923 = vmatpush3.bf16.msra.mxu1 %v478_v3  ;;  %v1933_v8 = vld [vmem:[%s2989_s0 + $0x28] sm:$0xff]   ;;  %v1934_v9 = vld [vmem:[%s2989_s0 + $0x30] sm:$0xff]  }
   0x5   :  { %28 = vst.msk [vmem:[#allocation2 + $0x40] sm:$0xff] %vm19_vm2, %v1960_v1  ;;  %29 = vst.msk [vmem:[#allocation2 + $0x48] sm:$0xff] %vm19_vm2, %v1960_v1  ;;  %v1944_v10 = vld [vmem:[%s2989_s0 + $0x80] sm:$0xff]   ;;  %v1945_v11 = vld [vmem:[%s2989_s0 + $0x88] sm:$0xff]  }
   0x6   :  { %30 = vst.msk [vmem:[#allocation2 + $0x50] sm:$0xff] %vm19_vm2, %v1960_v1  ;;  %31 = vst.msk [vmem:[#allocation2 + $0x58] sm:$0xff] %vm19_vm2, %v1960_v1  ;;  %1859 = vmatmul.mubr.msk.bf16.vlgmr.msra.gmra.mxu0 %vm379_vm1, %v1929_v4  ;;  %1890 = vmatprep.mubr.msk.bf16.mxu1 %vm379_vm1, %v1944_v10  ;;  %v1946_v12 = vld [vmem:[%s2989_s0 + $0x90] sm:$0xff]   ;;  %v1947_v13 = vld [vmem:[%s2989_s0 + $0x98] sm:$0xff]  }
   0x7   :  { %32 = vst.msk [vmem:[#allocation2 + $0x60] sm:$0xff] %vm19_vm2, %v1960_v1  ;;  %33 = vst.msk [vmem:[#allocation2 + $0x68] sm:$0xff] %vm19_vm2, %v1960_v1  ;;  %1862 = vmatprep.mubr.msk.bf16.mxu0 %vm379_vm1, %v1930_v5  ;;  %1891 = vmatmul.mubr.msk.bf16.vlgmr.msra.gmra.mxu1 %vm379_vm1, %v1945_v11  ;;  %v1948_v14 = vld [vmem:[%s2989_s0 + $0xa0] sm:$0xff]   ;;  %v1935_v15 = vld [vmem:[%s2989_s0 + $0x38] sm:$0xff]  }
   0x8   :  { %34 = vst.msk [vmem:[#allocation2 + $0x70] sm:$0xff] %vm19_vm2, %v1960_v1  ;;  %35 = vst.msk [vmem:[#allocation2 + $0x78] sm:$0xff] %vm19_vm2, %v1960_v1  ;;  %1894 = vmatprep.mubr.msk.bf16.mxu1 %vm379_vm1, %v1946_v12  ;;  %v1936_v16 = vld [vmem:[%s2989_s0 + $0x40] sm:$0xff]   ;;  %v1949_v17 = vld [vmem:[%s2989_s0 + $0xa8] sm:$0xff]  }
   0x9   :  { %36 = vst.msk [vmem:[#allocation2 + $0x80] sm:$0xff] %vm19_vm2, %v1960_v1  ;;  %37 = vst.msk [vmem:[#allocation2 + $0x88] sm:$0xff] %vm19_vm2, %v1960_v1  ;;  %v1950_v18 = vld [vmem:[%s2989_s0 + $0xb0] sm:$0xff]   ;;  %v1937_v19 = vld [vmem:[%s2989_s0 + $0x48] sm:$0xff]  }
   0xa   :  { %38 = vst.msk [vmem:[#allocation2 + $0x90] sm:$0xff] %vm19_vm2, %v1960_v1  ;;  %39 = vst.msk [vmem:[#allocation2 + $0x98] sm:$0xff] %vm19_vm2, %v1960_v1  ;;  %v1938_v20 = vld [vmem:[%s2989_s0 + $0x50] sm:$0xff]   ;;  %v1951_v21 = vld [vmem:[%s2989_s0 + $0xb8] sm:$0xff]  }
   0xb   :  { %40 = vst.msk [vmem:[#allocation2 + $0xa0] sm:$0xff] %vm19_vm2, %v1960_v1  ;;  %41 = vst.msk [vmem:[#allocation2 + $0xa8] sm:$0xff] %vm19_vm2, %v1960_v1  ;;  %v1952_v22 = vld [vmem:[%s2989_s0 + $0xc0] sm:$0xff]   ;;  %v1939_v23 = vld [vmem:[%s2989_s0 + $0x58] sm:$0xff]  }
   0xc   :  { %42 = vst.msk [vmem:[#allocation2 + $0xb0] sm:$0xff] %vm19_vm2, %v1960_v1  ;;  %43 = vst.msk [vmem:[#allocation2 + $0xb8] sm:$0xff] %vm19_vm2, %v1960_v1  ;;  %v1940_v24 = vld [vmem:[%s2989_s0 + $0x60] sm:$0xff]   ;;  %v1953_v25 = vld [vmem:[%s2989_s0 + $0xc8] sm:$0xff]  }
   0xd   :  { %44 = vst.msk [vmem:[#allocation2 + $0xc0] sm:$0xff] %vm19_vm2, %v1960_v1  ;;  %45 = vst.msk [vmem:[#allocation2 + $0xc8] sm:$0xff] %vm19_vm2, %v1960_v1  ;;  %v1954_v26 = vld [vmem:[%s2989_s0 + $0xd0] sm:$0xff]   ;;  %v1941_v27 = vld [vmem:[%s2989_s0 + $0x68] sm:$0xff]  }
   0xe   :  { %46 = vst.msk [vmem:[#allocation2 + $0xd0] sm:$0xff] %vm19_vm2, %v1960_v1  ;;  %47 = vst.msk [vmem:[#allocation2 + $0xd8] sm:$0xff] %vm19_vm2, %v1960_v1  ;;  %1863 = vmatmul.mubr.msk.bf16.gmra.mxu0 %vm379_vm1, %v1931_v6  ;;  %v1942_v28 = vld [vmem:[%s2989_s0 + $0x70] sm:$0xff]   ;;  %v1955_v29 = vld [vmem:[%s2989_s0 + $0xd8] sm:$0xff]  }
   0xf   :  { %48 = vst.msk [vmem:[#allocation2 + $0xe0] sm:$0xff] %vm19_vm2, %v1960_v1  ;;  %49 = vst.msk [vmem:[#allocation2 + $0xe8] sm:$0xff] %vm19_vm2, %v1960_v1  ;;  %1866 = vmatprep.mubr.msk.bf16.mxu0 %vm379_vm1, %v1932_v7  ;;  %1895 = vmatmul.mubr.msk.bf16.gmra.mxu1 %vm379_vm1, %v1947_v13  ;;  %v1956_v30 = vld [vmem:[%s2989_s0 + $0xe0] sm:$0xff]   ;;  %v1943_v31 = vld [vmem:[%s2989_s0 + $0x78] sm:$0xff]  }
  0x10   :  { %50 = vst.msk [vmem:[#allocation2 + $0xf0] sm:$0xff] %vm19_vm2, %v1960_v1  ;;  %51 = vst.msk [vmem:[#allocation2 + $0xf8] sm:$0xff] %vm19_vm2, %v1960_v1  ;;  %1898 = vmatprep.mubr.msk.bf16.mxu1 %vm379_vm1, %v1948_v14  ;;  %v1957_v32 = vld [vmem:[%s2989_s0 + $0xe8] sm:$0xff]   ;;  %v1958_v33 = vld [vmem:[%s2989_s0 + $0xf0] sm:$0xff]  }
  0x11   :  { %52 = vst.msk [vmem:[#allocation2 + $0x100] sm:$0xff] %vm19_vm2, %v1960_v1  ;;  %53 = vst.msk [vmem:[#allocation2 + $0x108] sm:$0xff] %vm19_vm2, %v1960_v1  ;;  %v1959_v34 = vld [vmem:[%s2989_s0 + $0xf8] sm:$0xff]   ;;  %v86_v35 = vld [vmem:[#allocation2 + $0x10] sm:$0xff] }
  0x12   :  { %54 = vst.msk [vmem:[#allocation2 + $0x110] sm:$0xff] %vm19_vm2, %v1960_v1  ;;  %55 = vst.msk [vmem:[#allocation2 + $0x118] sm:$0xff] %vm19_vm2, %v1960_v1  ;;  %v84_v37 = vld [vmem:[#allocation2] sm:$0xff]  ;;  %v87_v40 = vld [vmem:[#allocation2 + $0x18] sm:$0xff] }
  0x13   :  { %56 = vst.msk [vmem:[#allocation2 + $0x120] sm:$0xff] %vm19_vm2, %v1960_v1  ;;  %57 = vst.msk [vmem:[#allocation2 + $0x128] sm:$0xff] %vm19_vm2, %v1960_v1  ;;  %v85_v43 = vld [vmem:[#allocation2 + $0x8] sm:$0xff]  ;;  %v90_v46 = vld [vmem:[#allocation2 + $0x30] sm:$0xff] }
  0x14   :  { %58 = vst.msk [vmem:[#allocation2 + $0x130] sm:$0xff] %vm19_vm2, %v1960_v1  ;;  %59 = vst.msk [vmem:[#allocation2 + $0x138] sm:$0xff] %vm19_vm2, %v1960_v1  ;;  %v88_v49 = vld [vmem:[#allocation2 + $0x20] sm:$0xff]  ;;  %v91_v55 = vld [vmem:[#allocation2 + $0x38] sm:$0xff] }
  0x15   :  { %60 = vst.msk [vmem:[#allocation2 + $0x140] sm:$0xff] %vm19_vm2, %v1960_v1  ;;  %61 = vst.msk [vmem:[#allocation2 + $0x148] sm:$0xff] %vm19_vm2, %v1960_v1  ;;  %v89_v59 = vld [vmem:[#allocation2 + $0x28] sm:$0xff]  ;;  %v94_v3 = vld [vmem:[#allocation2 + $0x50] sm:$0xff] }
  0x16   :  { %62 = vst.msk [vmem:[#allocation2 + $0x150] sm:$0xff] %vm19_vm2, %v1960_v1  ;;  %63 = vst.msk [vmem:[#allocation2 + $0x158] sm:$0xff] %vm19_vm2, %v1960_v1  ;;  %1867 = vmatmul.mubr.msk.bf16.gmra.mxu0 %vm379_vm1, %v1933_v8 }
  0x17   :  { %64 = vst.msk [vmem:[#allocation2 + $0x160] sm:$0xff] %vm19_vm2, %v1960_v1  ;;  %65 = vst.msk [vmem:[#allocation2 + $0x168] sm:$0xff] %vm19_vm2, %v1960_v1  ;;  %1870 = vmatprep.mubr.msk.bf16.mxu0 %vm379_vm1, %v1934_v9  ;;  %1899 = vmatmul.mubr.msk.bf16.gmra.mxu1 %vm379_vm1, %v1949_v17 }
  0x18   :  { %66 = vst.msk [vmem:[#allocation2 + $0x170] sm:$0xff] %vm19_vm2, %v1960_v1  ;;  %67 = vst.msk [vmem:[#allocation2 + $0x178] sm:$0xff] %vm19_vm2, %v1960_v1  ;;  %1902 = vmatprep.mubr.msk.bf16.mxu1 %vm379_vm1, %v1950_v18  ;;  %v116_v4 = vld [vmem:[#allocation2 + $0x100] sm:$0xff] }
  0x19   :  { %68 = vst.msk [vmem:[#allocation2 + $0x180] sm:$0xff] %vm19_vm2, %v1960_v1  ;;  %69 = vst.msk [vmem:[#allocation2 + $0x188] sm:$0xff] %vm19_vm2, %v1960_v1  ;;  %v118_v60 = vld [vmem:[#allocation2 + $0x110] sm:$0xff] }
  0x1a   :  { %70 = vst.msk [vmem:[#allocation2 + $0x190] sm:$0xff] %vm19_vm2, %v1960_v1  ;;  %71 = vst.msk [vmem:[#allocation2 + $0x198] sm:$0xff] %vm19_vm2, %v1960_v1 }
  0x1b   :  { %72 = vst.msk [vmem:[#allocation2 + $0x1a0] sm:$0xff] %vm19_vm2, %v1960_v1  ;;  %73 = vst.msk [vmem:[#allocation2 + $0x1a8] sm:$0xff] %vm19_vm2, %v1960_v1 }
  0x1c   :  { %74 = vst.msk [vmem:[#allocation2 + $0x1b0] sm:$0xff] %vm19_vm2, %v1960_v1  ;;  %75 = vst.msk [vmem:[#allocation2 + $0x1b8] sm:$0xff] %vm19_vm2, %v1960_v1 }
  0x1d   :  { %76 = vst.msk [vmem:[#allocation2 + $0x1c0] sm:$0xff] %vm19_vm2, %v1960_v1  ;;  %77 = vst.msk [vmem:[#allocation2 + $0x1c8] sm:$0xff] %vm19_vm2, %v1960_v1 }
  0x1e   :  { %78 = vst.msk [vmem:[#allocation2 + $0x1d0] sm:$0xff] %vm19_vm2, %v1960_v1  ;;  %79 = vst.msk [vmem:[#allocation2 + $0x1d8] sm:$0xff] %vm19_vm2, %v1960_v1  ;;  %1871 = vmatmul.mubr.msk.bf16.gmra.mxu0 %vm379_vm1, %v1935_v15  ;;  %v92_v15 = vld [vmem:[#allocation2 + $0x40] sm:$0xff] }
  0x1f   :  { %80 = vst.msk [vmem:[#allocation2 + $0x1e0] sm:$0xff] %vm19_vm2, %v1960_v1  ;;  %81 = vst.msk [vmem:[#allocation2 + $0x1e8] sm:$0xff] %vm19_vm2, %v1960_v1  ;;  %1874 = vmatprep.mubr.msk.bf16.mxu0 %vm379_vm1, %v1936_v16  ;;  %1903 = vmatmul.mubr.msk.bf16.gmra.mxu1 %vm379_vm1, %v1951_v21  ;;  %v119_v16 = vld [vmem:[#allocation2 + $0x118] sm:$0xff] }
  0x20   :  { %82 = vst.msk [vmem:[#allocation2 + $0x1f0] sm:$0xff] %vm19_vm2, %v1960_v1  ;;  %83 = vst.msk [vmem:[#allocation2 + $0x1f8] sm:$0xff] %vm19_vm2, %v1960_v1  ;;  %1906 = vmatprep.mubr.msk.bf16.mxu1 %vm379_vm1, %v1952_v22 }
  0x26   :  { %1875 = vmatmul.mubr.msk.bf16.gmra.mxu0 %vm379_vm1, %v1937_v19 }
  0x27   :  { %1878 = vmatprep.mubr.msk.bf16.mxu0 %vm379_vm1, %v1938_v20  ;;  %1907 = vmatmul.mubr.msk.bf16.gmra.mxu1 %vm379_vm1, %v1953_v25 }
  0x28   :  { %1910 = vmatprep.mubr.msk.bf16.mxu1 %vm379_vm1, %v1954_v26 }
  0x2e   :  { %1879 = vmatmul.mubr.msk.bf16.gmra.mxu0 %vm379_vm1, %v1939_v23 }
  0x2f   :  { %1882 = vmatprep.mubr.msk.bf16.mxu0 %vm379_vm1, %v1940_v24  ;;  %1911 = vmatmul.mubr.msk.bf16.gmra.mxu1 %vm379_vm1, %v1955_v29  ;;  %v117_v29 = vld [vmem:[#allocation2 + $0x108] sm:$0xff] }
  0x30   :  { %1914 = vmatprep.mubr.msk.bf16.mxu1 %vm379_vm1, %v1956_v30 }
  0x36   :  { %1883 = vmatmul.mubr.msk.bf16.gmra.mxu0 %vm379_vm1, %v1941_v27 }
  0x37   :  { %1886 = vmatprep.mubr.msk.bf16.mxu0 %vm379_vm1, %v1942_v28  ;;  %1915 = vmatmul.mubr.msk.bf16.gmra.mxu1 %vm379_vm1, %v1957_v32  ;;  %v95_v28 = vld [vmem:[#allocation2 + $0x58] sm:$0xff] }
  0x38   :  { %1918 = vmatprep.mubr.msk.bf16.mxu1 %vm379_vm1, %v1958_v33 }
  0x3e   :  { %1887 = vmatmul.mubr.msk.bf16.gmra.mxu0 %vm379_vm1, %v1943_v31 }
  0x3f   :  { %1919 = vmatmul.mubr.msk.bf16.gmra.mxu1 %vm379_vm1, %v1959_v34 }
  0xc6   :  { %v1860_v36 = vpop.f32.mrf.mxu0 }
  0xc7   :  { %v771_v38 = vadd.f32 %v1860_v36, %v86_v35  ;;  %v1892_v0 = vpop.f32.mrf.mxu1  ;;  %v93_v35 = vld [vmem:[#allocation2 + $0x48] sm:$0xff] }
  0xc8   :  { %v514_v39 = vpop.f32.mrf.mxu0  ;;  %v803_v9 = vadd.f32 %v1892_v0, %v118_v60  ;;  %v96_v60 = vld [vmem:[#allocation2 + $0x60] sm:$0xff] }
  0xc9   :  { %836 = vst.msk [vmem:[#allocation2 + $0x10] sm:$0xff] %vm19_vm2, %v771_v38  ;;  %v769_v41 = vadd.f32 %v514_v39, %v84_v37  ;;  %v642_v10 = vpop.f32.mrf.mxu1  ;;  %v122_v38 = vld [vmem:[#allocation2 + $0x130] sm:$0xff] }
  0xca   :  { %v1861_v42 = vpop.f32.mrf.mxu0  ;;  %868 = vst.msk [vmem:[#allocation2 + $0x110] sm:$0xff] %vm19_vm2, %v803_v9  ;;  %v801_v22 = vadd.f32 %v642_v10, %v116_v4  ;;  %v99_v9 = vld [vmem:[#allocation2 + $0x78] sm:$0xff] }
  0xcb   :  { %834 = vst.msk [vmem:[#allocation2] sm:$0xff] %vm19_vm2, %v769_v41  ;;  %v772_v44 = vadd.f32 %v1861_v42, %v87_v40  ;;  %v1893_v23 = vpop.f32.mrf.mxu1 }
  0xcc   :  { %v517_v45 = vpop.f32.mrf.mxu0  ;;  %866 = vst.msk [vmem:[#allocation2 + $0x100] sm:$0xff] %vm19_vm2, %v801_v22  ;;  %v804_v36 = vadd.f32 %v1893_v23, %v119_v16 }
  0xcd   :  { %837 = vst.msk [vmem:[#allocation2 + $0x18] sm:$0xff] %vm19_vm2, %v772_v44  ;;  %v770_v47 = vadd.f32 %v517_v45, %v85_v43  ;;  %v645_v37 = vpop.f32.mrf.mxu1 }
  0xce   :  { %v1864_v48 = vpop.f32.mrf.mxu0  ;;  %869 = vst.msk [vmem:[#allocation2 + $0x118] sm:$0xff] %vm19_vm2, %v804_v36  ;;  %v102_v36 = vld [vmem:[#allocation2 + $0x90] sm:$0xff] }
  0xcf   :  { %835 = vst.msk [vmem:[#allocation2 + $0x8] sm:$0xff] %vm19_vm2, %v770_v47  ;;  %v775_v50 = vadd.f32 %v1864_v48, %v90_v46  ;;  %v98_v47 = vld [vmem:[#allocation2 + $0x70] sm:$0xff]  ;;  %v802_v48 = vadd.f32 %v645_v37, %v117_v29 }
  0xd0   :  { %v903_v51 = vld [vmem:[#allocation2 + $0x10] sm:$0xff]  ;;  %v530_v52 = vpop.f32.mrf.mxu0 }
  0xd1   :  { %v1761_v53 = vpack.c.bf16 %v903_v51, %v903_v51  ;;  %840 = vst.msk [vmem:[#allocation2 + $0x30] sm:$0xff] %vm19_vm2, %v775_v50  ;;  %v773_v54 = vadd.f32 %v530_v52, %v88_v49  ;;  %v1421_v5 = vmul.f32 %v903_v51, %v903_v51  ;;  %v1289_v17 = vsel %vm19_vm2, %v903_v51, 0.0  ;;  %v1896_v49 = vpop.f32.mrf.mxu1  ;;  %v120_v50 = vld [vmem:[#allocation2 + $0x120] sm:$0xff]  ;;  %867 = vst.msk [vmem:[#allocation2 + $0x108] sm:$0xff] %vm19_vm2, %v802_v48 }
  0xd2   :  { %v901_v56 = vld [vmem:[#allocation2] sm:$0xff]  ;;  %v1865_v57 = vpop.f32.mrf.mxu0 }
  0xd3   :  { %1224 = vst.msk [vmem:[%s2990_s2 + $0x8] sm:$0xf] %vm1221_vm3, %v1761_v53  ;;  %v1759_v58 = vpack.c.bf16 %v901_v56, %v901_v56  ;;  %v776_v62 = vadd.f32 %v1865_v57, %v91_v55  ;;  %v1419_v1 = vmul.f32 %v901_v56, %v901_v56  ;;  %v1286_v11 = vsel %vm19_vm2, %v901_v56, 0.0  ;;  %v2356_v48 = vld [vmem:[#allocation2 + $0x100] sm:$0xff] }
  0xd4   :  { %838 = vst.msk [vmem:[#allocation2 + $0x20] sm:$0xff] %vm19_vm2, %v773_v54  ;;  %v904_v61 = vld [vmem:[#allocation2 + $0x18] sm:$0xff]  ;;  %v533_v63 = vpop.f32.mrf.mxu0  ;;  %v1486_v39 = vsel %vm19_vm2, %v1421_v5, 0.0  ;;  %v807_v55 = vadd.f32 %v1896_v49, %v122_v38 }
  0xd5   :  { %1222 = vst.msk [vmem:[%s2990_s2] sm:$0xf] %vm1221_vm3, %v1759_v58  ;;  %v1762_v2 = vpack.c.bf16 %v904_v61, %v904_v61  ;;  %v774_v7 = vadd.f32 %v533_v63, %v89_v59  ;;  %v1483_v24 = vsel %vm19_vm2, %v1419_v1, 0.0  ;;  %v1422_v25 = vmul.f32 %v904_v61, %v904_v61 }
  0xd6   :  { %v902_v6 = vld [vmem:[#allocation2 + $0x8] sm:$0xff]  ;;  %841 = vst.msk [vmem:[#allocation2 + $0x38] sm:$0xff] %vm19_vm2, %v776_v62  ;;  %v1868_v8 = vpop.f32.mrf.mxu0  ;;  %v1291_v40 = vsel %vm19_vm2, %v904_v61, 0.0  ;;  %v658_v61 = vpop.f32.mrf.mxu1  ;;  %872 = vst.msk [vmem:[#allocation2 + $0x130] sm:$0xff] %vm19_vm2, %v807_v55 }
  0xd7   :  { %1225 = vst.msk [vmem:[%s2990_s2 + $0xc] sm:$0xf] %vm1221_vm3, %v1762_v2  ;;  %v1760_v12 = vpack.c.bf16 %v902_v6, %v902_v6  ;;  %v1287_v13 = vsel %vm19_vm2, %v902_v6, 0.0  ;;  %v1420_v14 = vmul.f32 %v902_v6, %v902_v6  ;;  %v779_v20 = vadd.f32 %v1868_v8, %v94_v3  ;;  %v2309_v2 = vld [vmem:[#allocation2 + $0x110] sm:$0xff] }
  0xd8   :  { %v1288_v18 = vadd.f32 %v1287_v13, %v1286_v11  ;;  %v2275_v19 = vld [vmem:[#allocation2 + $0x30] sm:$0xff]  ;;  %839 = vst.msk [vmem:[#allocation2 + $0x28] sm:$0xff] %vm19_vm2, %v774_v7  ;;  %v546_v21 = vpop.f32.mrf.mxu0  ;;  %v1488_v51 = vsel %vm19_vm2, %v1422_v25, 0.0  ;;  %v805_v3 = vadd.f32 %v658_v61, %v120_v50  ;;  %v2317_v10 = vpop.f32.mrf.mxu1 }
  0xd9   :  { %1223 = vst.msk [vmem:[%s2990_s2 + $0x4] sm:$0xf] %vm1221_vm3, %v1760_v12  ;;  %v1484_v26 = vsel %vm19_vm2, %v1420_v14, 0.0  ;;  %v1765_v27 = vpack.c.bf16 %v2275_v19, %v2275_v19  ;;  %v777_v33 = vadd.f32 %v546_v21, %v92_v15  ;;  %v1425_v62 = vmul.f32 %v2275_v19, %v2275_v19  ;;  %v97_v21 = vld [vmem:[#allocation2 + $0x68] sm:$0xff] }
  0xda   :  { %v1290_v30 = vadd.f32 %v1289_v17, %v1288_v18  ;;  %v1485_v31 = vadd.f32 %v1484_v26, %v1483_v24  ;;  %844 = vst.msk [vmem:[#allocation2 + $0x50] sm:$0xff] %vm19_vm2, %v779_v20  ;;  %v1869_v34 = vpop.f32.mrf.mxu0  ;;  %v1793_v14 = vpack.c.bf16 %v2309_v2, %v2309_v2  ;;  %870 = vst.msk [vmem:[#allocation2 + $0x120] sm:$0xff] %vm19_vm2, %v805_v3  ;;  %v1297_v15 = vsel %vm19_vm2, %v2275_v19, 0.0  ;;  %v2330_v22 = vpop.f32.mrf.mxu1 }
  0xdb   :  { %v905_v32 = vld [vmem:[#allocation2 + $0x20] sm:$0xff]  ;;  %1228 = vst.msk [vmem:[%s2990_s2 + $0x18] sm:$0xf] %vm1221_vm3, %v1765_v27  ;;  %v780_v45 = vadd.f32 %v1869_v34, %v95_v28  ;;  %v1494_v19 = vsel %vm19_vm2, %v1425_v62, 0.0  ;;  %v1791_v3 = vpack.c.bf16 %v2356_v48, %v2356_v48 }
  0xdc   :  { %v1763_v41 = vpack.c.bf16 %v905_v32, %v905_v32  ;;  %v1423_v42 = vmul.f32 %v905_v32, %v905_v32  ;;  %v1487_v43 = vadd.f32 %v1486_v39, %v1485_v31  ;;  %v1292_v44 = vadd.f32 %v1291_v40, %v1290_v30  ;;  %842 = vst.msk [vmem:[#allocation2 + $0x40] sm:$0xff] %vm19_vm2, %v777_v33  ;;  %v549_v46 = vpop.f32.mrf.mxu0  ;;  %v2343_v31 = vpop.f32.mrf.mxu1 }
  0xdd   :  { %v1293_v52 = vsel %vm19_vm2, %v905_v32, 0.0  ;;  %v908_v53 = vld [vmem:[#allocation2 + $0x38] sm:$0xff]  ;;  %v778_v54 = vadd.f32 %v549_v46, %v93_v35  ;;  %845 = vst.msk [vmem:[#allocation2 + $0x58] sm:$0xff] %vm19_vm2, %v780_v45 }
  0xde   :  { %1226 = vst.msk [vmem:[%s2990_s2 + $0x10] sm:$0xf] %vm1221_vm3, %v1763_v41  ;;  %v1294_v56 = vadd.f32 %v1293_v52, %v1292_v44  ;;  %v1489_v57 = vadd.f32 %v1488_v51, %v1487_v43  ;;  %v1766_v58 = vpack.c.bf16 %v908_v53, %v908_v53  ;;  %v1872_v59 = vpop.f32.mrf.mxu0  ;;  %v1490_v63 = vsel %vm19_vm2, %v1423_v42, 0.0  ;;  %1256 = vst.msk [vmem:[%s2990_s2 + $0x88] sm:$0xf] %vm1221_vm3, %v1793_v14  ;;  %v2352_v42 = vpop.f32.mrf.mxu1 }
  0xdf   :  { %v906_v0 = vld [vmem:[#allocation2 + $0x28] sm:$0xff]  ;;  %843 = vst.msk [vmem:[#allocation2 + $0x48] sm:$0xff] %vm19_vm2, %v778_v54  ;;  %v783_v1 = vadd.f32 %v1872_v59, %v98_v47  ;;  %v1426_v16 = vmul.f32 %v908_v53, %v908_v53  ;;  %v1299_v27 = vsel %vm19_vm2, %v908_v53, 0.0  ;;  %v100_v47 = vld [vmem:[#allocation2 + $0x80] sm:$0xff] }
  0xe0   :  { %v1491_v4 = vadd.f32 %v1490_v63, %v1489_v57  ;;  %1229 = vst.msk [vmem:[%s2990_s2 + $0x1c] sm:$0xf] %vm1221_vm3, %v1766_v58  ;;  %v1764_v5 = vpack.c.bf16 %v906_v0, %v906_v0  ;;  %v1295_v6 = vsel %vm19_vm2, %v906_v0, 0.0  ;;  %v1424_v7 = vmul.f32 %v906_v0, %v906_v0  ;;  %v562_v8 = vpop.f32.mrf.mxu0  ;;  %v2365_v55 = vpop.f32.mrf.mxu1  ;;  %1254 = vst.msk [vmem:[%s2990_s2 + $0x80] sm:$0xf] %vm1221_vm3, %v1791_v3  ;;  %v110_v3 = vld [vmem:[#allocation2 + $0xd0] sm:$0xff] }
  0xe1   :  { %v1296_v11 = vadd.f32 %v1295_v6, %v1294_v56  ;;  %v911_v12 = vld [vmem:[#allocation2 + $0x50] sm:$0xff]  ;;  %848 = vst.msk [vmem:[#allocation2 + $0x70] sm:$0xff] %vm19_vm2, %v783_v1  ;;  %v781_v13 = vadd.f32 %v562_v8, %v96_v60  ;;  %v1496_v37 = vsel %vm19_vm2, %v1426_v16, 0.0  ;;  %v103_v60 = vld [vmem:[#allocation2 + $0x98] sm:$0xff]  ;;  %v101_v8 = vld [vmem:[#allocation2 + $0x88] sm:$0xff] }
  0xe2   :  { %1227 = vst.msk [vmem:[%s2990_s2 + $0x14] sm:$0xf] %vm1221_vm3, %v1764_v5  ;;  %v1492_v17 = vsel %vm19_vm2, %v1424_v7, 0.0  ;;  %v1769_v18 = vpack.c.bf16 %v911_v12, %v911_v12  ;;  %v1873_v20 = vpop.f32.mrf.mxu0  ;;  %v1429_v49 = vmul.f32 %v911_v12, %v911_v12  ;;  %v1305_v56 = vsel %vm19_vm2, %v911_v12, 0.0 }
  0xe3   :  { %v1298_v23 = vadd.f32 %v1297_v15, %v1296_v11  ;;  %v1493_v24 = vadd.f32 %v1492_v17, %v1491_v4  ;;  %v909_v25 = vld [vmem:[#allocation2 + $0x40] sm:$0xff]  ;;  %846 = vst.msk [vmem:[#allocation2 + $0x60] sm:$0xff] %vm19_vm2, %v781_v13  ;;  %v784_v26 = vadd.f32 %v1873_v20, %v99_v9  ;;  %v2378_v4 = vpop.f32.mrf.mxu1 }
  0xe4   :  { %1232 = vst.msk [vmem:[%s2990_s2 + $0x28] sm:$0xf] %vm1221_vm3, %v1769_v18  ;;  %v1767_v28 = vpack.c.bf16 %v909_v25, %v909_v25  ;;  %v1427_v29 = vmul.f32 %v909_v25, %v909_v25  ;;  %v565_v30 = vpop.f32.mrf.mxu0  ;;  %v912_v34 = vld [vmem:[#allocation2 + $0x58] sm:$0xff]  ;;  %v1301_v38 = vsel %vm19_vm2, %v909_v25, 0.0  ;;  %v1502_v9 = vsel %vm19_vm2, %v1429_v49, 0.0 }
  0xe5   :  { %v1495_v32 = vadd.f32 %v1494_v19, %v1493_v24  ;;  %v1300_v33 = vadd.f32 %v1299_v27, %v1298_v23  ;;  %849 = vst.msk [vmem:[#allocation2 + $0x78] sm:$0xff] %vm19_vm2, %v784_v26  ;;  %v782_v35 = vadd.f32 %v565_v30, %v97_v21  ;;  %v1770_v39 = vpack.c.bf16 %v912_v34, %v912_v34  ;;  %v2391_v16 = vpop.f32.mrf.mxu1  ;;  %v106_v21 = vld [vmem:[#allocation2 + $0xb0] sm:$0xff]  ;;  %v104_v27 = vld [vmem:[#allocation2 + $0xa0] sm:$0xff] }
  0xe6   :  { %1230 = vst.msk [vmem:[%s2990_s2 + $0x20] sm:$0xf] %vm1221_vm3, %v1767_v28  ;;  %v910_v40 = vld [vmem:[#allocation2 + $0x48] sm:$0xff]  ;;  %v1876_v41 = vpop.f32.mrf.mxu0  ;;  %v1498_v50 = vsel %vm19_vm2, %v1427_v29, 0.0  ;;  %v1430_v61 = vmul.f32 %v912_v34, %v912_v34  ;;  %v1307_v11 = vsel %vm19_vm2, %v912_v34, 0.0  ;;  %v2400_v28 = vld [vmem:[#allocation2 + $0x118] sm:$0xff] }
  0xe7   :  { %v1302_v43 = vadd.f32 %v1301_v38, %v1300_v33  ;;  %v1497_v44 = vadd.f32 %v1496_v37, %v1495_v32  ;;  %v1768_v45 = vpack.c.bf16 %v910_v40, %v910_v40  ;;  %v1303_v46 = vsel %vm19_vm2, %v910_v40, 0.0  ;;  %847 = vst.msk [vmem:[#allocation2 + $0x68] sm:$0xff] %vm19_vm2, %v782_v35  ;;  %v2402_v29 = vpop.f32.mrf.mxu1 }
  0xe8   :  { %1233 = vst.msk [vmem:[%s2990_s2 + $0x2c] sm:$0xf] %vm1221_vm3, %v1770_v39  ;;  %v1428_v51 = vmul.f32 %v910_v40, %v910_v40  ;;  %v2363_v52 = vld [vmem:[#allocation2 + $0x70] sm:$0xff]  ;;  %v787_v53 = vadd.f32 %v1876_v41, %v102_v36  ;;  %v578_v54 = vpop.f32.mrf.mxu0  ;;  %v1504_v23 = vsel %vm19_vm2, %v1430_v61, 0.0  ;;  %v107_v40 = vld [vmem:[#allocation2 + $0xb8] sm:$0xff] }
  0xe9   :  { %v1499_v57 = vadd.f32 %v1498_v50, %v1497_v44  ;;  %1231 = vst.msk [vmem:[%s2990_s2 + $0x24] sm:$0xf] %vm1221_vm3, %v1768_v45  ;;  %v1304_v58 = vadd.f32 %v1303_v46, %v1302_v43  ;;  %v1773_v59 = vpack.c.bf16 %v2363_v52, %v2363_v52  ;;  %v785_v0 = vadd.f32 %v578_v54, %v100_v47  ;;  %v2413_v41 = vpop.f32.mrf.mxu1 }
  0xea   :  { %v1500_v62 = vsel %vm19_vm2, %v1428_v51, 0.0  ;;  %v913_v63 = vld [vmem:[#allocation2 + $0x60] sm:$0xff]  ;;  %852 = vst.msk [vmem:[#allocation2 + $0x90] sm:$0xff] %vm19_vm2, %v787_v53  ;;  %v1877_v1 = vpop.f32.mrf.mxu0  ;;  %v1433_v35 = vmul.f32 %v2363_v52, %v2363_v52  ;;  %v1794_v47 = vpack.c.bf16 %v2400_v28, %v2400_v28  ;;  %v1313_v49 = vsel %vm19_vm2, %v2363_v52, 0.0 }
  0xeb   :  { %v1306_v5 = vadd.f32 %v1305_v56, %v1304_v58  ;;  %v1501_v6 = vadd.f32 %v1500_v62, %v1499_v57  ;;  %1236 = vst.msk [vmem:[%s2990_s2 + $0x38] sm:$0xf] %vm1221_vm3, %v1773_v59  ;;  %v1771_v7 = vpack.c.bf16 %v913_v63, %v913_v63  ;;  %v1431_v12 = vmul.f32 %v913_v63, %v913_v63  ;;  %v105_v56 = vld [vmem:[#allocation2 + $0xa8] sm:$0xff]  ;;  %v2425_v57 = vpop.f32.mrf.mxu1 }
  0xec   :  { %v916_v13 = vld [vmem:[#allocation2 + $0x78] sm:$0xff]  ;;  %850 = vst.msk [vmem:[#allocation2 + $0x80] sm:$0xff] %vm19_vm2, %v785_v0  ;;  %v788_v14 = vadd.f32 %v1877_v1, %v103_v60  ;;  %v581_v15 = vpop.f32.mrf.mxu0  ;;  %v1309_v24 = vsel %vm19_vm2, %v913_v63, 0.0  ;;  %v1510_v52 = vsel %vm19_vm2, %v1433_v35, 0.0 }
  0xed   :  { %v1503_v17 = vadd.f32 %v1502_v9, %v1501_v6  ;;  %1234 = vst.msk [vmem:[%s2990_s2 + $0x30] sm:$0xf] %vm1221_vm3, %v1771_v7  ;;  %v1308_v18 = vadd.f32 %v1307_v11, %v1306_v5  ;;  %v1774_v20 = vpack.c.bf16 %v916_v13, %v916_v13  ;;  %v786_v26 = vadd.f32 %v581_v15, %v101_v8  ;;  %v2438_v5 = vpop.f32.mrf.mxu1  ;;  %v108_v15 = vld [vmem:[#allocation2 + $0xc0] sm:$0xff] }
  0xee   :  { %v914_v25 = vld [vmem:[#allocation2 + $0x68] sm:$0xff]  ;;  %853 = vst.msk [vmem:[#allocation2 + $0x98] sm:$0xff] %vm19_vm2, %v788_v14  ;;  %v1880_v19 = vpop.f32.mrf.mxu0  ;;  %v1506_v36 = vsel %vm19_vm2, %v1431_v12, 0.0  ;;  %v1434_v50 = vmul.f32 %v916_v13, %v916_v13  ;;  %v1315_v62 = vsel %vm19_vm2, %v916_v13, 0.0 }
  0xef   :  { %v1310_v30 = vadd.f32 %v1309_v24, %v1308_v18  ;;  %v1505_v32 = vadd.f32 %v1504_v23, %v1503_v17  ;;  %1237 = vst.msk [vmem:[%s2990_s2 + $0x3c] sm:$0xf] %vm1221_vm3, %v1774_v20  ;;  %v1772_v33 = vpack.c.bf16 %v914_v25, %v914_v25  ;;  %v1311_v34 = vsel %vm19_vm2, %v914_v25, 0.0  ;;  %1257 = vst.msk [vmem:[%s2990_s2 + $0x8c] sm:$0xf] %vm1221_vm3, %v1794_v47  ;;  %v2447_v17 = vld [vmem:[#allocation2 + $0x108] sm:$0xff] }
  0xf0   :  { %v1432_v37 = vmul.f32 %v914_v25, %v914_v25  ;;  %851 = vst.msk [vmem:[#allocation2 + $0x88] sm:$0xff] %vm19_vm2, %v786_v26  ;;  %v791_v38 = vadd.f32 %v1880_v19, %v106_v21  ;;  %v594_v39 = vpop.f32.mrf.mxu0  ;;  %v1512_v11 = vsel %vm19_vm2, %v1434_v50, 0.0  ;;  %v2450_v25 = vpop.f32.mrf.mxu1 }
  0xf1   :  { %v1507_v43 = vadd.f32 %v1506_v36, %v1505_v32  ;;  %1235 = vst.msk [vmem:[%s2990_s2 + $0x34] sm:$0xf] %vm1221_vm3, %v1772_v33  ;;  %v1312_v44 = vadd.f32 %v1311_v34, %v1310_v30  ;;  %v919_v45 = vld [vmem:[#allocation2 + $0x90] sm:$0xff]  ;;  %v789_v46 = vadd.f32 %v594_v39, %v104_v27 }
  0xf2   :  { %v1508_v51 = vsel %vm19_vm2, %v1432_v37, 0.0  ;;  %v1777_v53 = vpack.c.bf16 %v919_v45, %v919_v45  ;;  %856 = vst.msk [vmem:[#allocation2 + $0xb0] sm:$0xff] %vm19_vm2, %v791_v38  ;;  %v1881_v54 = vpop.f32.mrf.mxu0  ;;  %v1437_v18 = vmul.f32 %v919_v45, %v919_v45  ;;  %v111_v37 = vld [vmem:[#allocation2 + $0xd8] sm:$0xff]  ;;  %v1792_v38 = vpack.c.bf16 %v2447_v17, %v2447_v17 }
  0xf3   :  { %v1314_v58 = vadd.f32 %v1313_v49, %v1312_v44  ;;  %v1509_v59 = vadd.f32 %v1508_v51, %v1507_v43  ;;  %v917_v60 = vld [vmem:[#allocation2 + $0x80] sm:$0xff]  ;;  %854 = vst.msk [vmem:[#allocation2 + $0xa0] sm:$0xff] %vm19_vm2, %v789_v46  ;;  %v792_v61 = vadd.f32 %v1881_v54, %v107_v40  ;;  %v1321_v39 = vsel %vm19_vm2, %v919_v45, 0.0  ;;  %v2472_v45 = vpop.f32.mrf.mxu1 }
  0xf4   :  { %1240 = vst.msk [vmem:[%s2990_s2 + $0x48] sm:$0xf] %vm1221_vm3, %v1777_v53  ;;  %v1775_v63 = vpack.c.bf16 %v917_v60, %v917_v60  ;;  %v1435_v0 = vmul.f32 %v917_v60, %v917_v60  ;;  %v597_v1 = vpop.f32.mrf.mxu0  ;;  %v1317_v12 = vsel %vm19_vm2, %v917_v60, 0.0  ;;  %v109_v53 = vld [vmem:[#allocation2 + $0xc8] sm:$0xff]  ;;  %1255 = vst.msk [vmem:[%s2990_s2 + $0x84] sm:$0xf] %vm1221_vm3, %v1792_v38 }
  0xf5   :  { %v1511_v6 = vadd.f32 %v1510_v52, %v1509_v59  ;;  %v1316_v7 = vadd.f32 %v1315_v62, %v1314_v58  ;;  %v920_v8 = vld [vmem:[#allocation2 + $0x98] sm:$0xff]  ;;  %857 = vst.msk [vmem:[#allocation2 + $0xb8] sm:$0xff] %vm19_vm2, %v792_v61  ;;  %v790_v9 = vadd.f32 %v597_v1, %v105_v56  ;;  %v1518_v54 = vsel %vm19_vm2, %v1437_v18, 0.0  ;;  %v2494_v18 = vpop.f32.mrf.mxu1 }
  0xf6   :  { %1238 = vst.msk [vmem:[%s2990_s2 + $0x40] sm:$0xf] %vm1221_vm3, %v1775_v63  ;;  %v1778_v13 = vpack.c.bf16 %v920_v8, %v920_v8  ;;  %v1884_v14 = vpop.f32.mrf.mxu0  ;;  %v1514_v26 = vsel %vm19_vm2, %v1435_v0, 0.0  ;;  %v1438_v40 = vmul.f32 %v920_v8, %v920_v8  ;;  %v1323_v56 = vsel %vm19_vm2, %v920_v8, 0.0  ;;  %v114_v0 = vld [vmem:[#allocation2 + $0xf0] sm:$0xff] }
  0xf7   :  { %v1318_v20 = vadd.f32 %v1317_v12, %v1316_v7  ;;  %v1513_v21 = vadd.f32 %v1512_v11, %v1511_v6  ;;  %v918_v23 = vld [vmem:[#allocation2 + $0x88] sm:$0xff]  ;;  %855 = vst.msk [vmem:[#allocation2 + $0xa8] sm:$0xff] %vm19_vm2, %v790_v9  ;;  %v795_v24 = vadd.f32 %v1884_v14, %v110_v3  ;;  %v112_v14 = vld [vmem:[#allocation2 + $0xe0] sm:$0xff] }
  0xf8   :  { %1241 = vst.msk [vmem:[%s2990_s2 + $0x4c] sm:$0xf] %vm1221_vm3, %v1778_v13  ;;  %v1776_v19 = vpack.c.bf16 %v918_v23, %v918_v23  ;;  %v1319_v27 = vsel %vm19_vm2, %v918_v23, 0.0  ;;  %v1436_v30 = vmul.f32 %v918_v23, %v918_v23  ;;  %v610_v32 = vpop.f32.mrf.mxu0  ;;  %v1520_v1 = vsel %vm19_vm2, %v1438_v40, 0.0 }
  0xf9   :  { %v1515_v33 = vadd.f32 %v1514_v26, %v1513_v21  ;;  %v1320_v34 = vadd.f32 %v1319_v27, %v1318_v20  ;;  %v923_v35 = vld [vmem:[#allocation2 + $0xb0] sm:$0xff]  ;;  %860 = vst.msk [vmem:[#allocation2 + $0xd0] sm:$0xff] %vm19_vm2, %v795_v24  ;;  %v793_v36 = vadd.f32 %v610_v32, %v108_v15 }
  0xfa   :  { %1239 = vst.msk [vmem:[%s2990_s2 + $0x44] sm:$0xf] %vm1221_vm3, %v1776_v19  ;;  %v1516_v43 = vsel %vm19_vm2, %v1436_v30, 0.0  ;;  %v1781_v44 = vpack.c.bf16 %v923_v35, %v923_v35  ;;  %v921_v46 = vld [vmem:[#allocation2 + $0xa0] sm:$0xff]  ;;  %v1885_v47 = vpop.f32.mrf.mxu0  ;;  %v2492_v15 = vld [vmem:[#allocation2 + $0x130] sm:$0xff]  ;;  %v1441_v20 = vmul.f32 %v923_v35, %v923_v35  ;;  %v1329_v27 = vsel %vm19_vm2, %v923_v35, 0.0 }
  0xfb   :  { %v1322_v49 = vadd.f32 %v1321_v39, %v1320_v34  ;;  %v1517_v50 = vadd.f32 %v1516_v43, %v1515_v33  ;;  %v1779_v51 = vpack.c.bf16 %v921_v46, %v921_v46  ;;  %858 = vst.msk [vmem:[#allocation2 + $0xc0] sm:$0xff] %vm19_vm2, %v793_v36  ;;  %v1439_v58 = vmul.f32 %v921_v46, %v921_v46  ;;  %v115_v34 = vld [vmem:[#allocation2 + $0xf8] sm:$0xff]  ;;  %v113_v43 = vld [vmem:[#allocation2 + $0xe8] sm:$0xff] }
  0xfc   :  { %1244 = vst.msk [vmem:[%s2990_s2 + $0x58] sm:$0xf] %vm1221_vm3, %v1781_v44  ;;  %v924_v59 = vld [vmem:[#allocation2 + $0xb8] sm:$0xff]  ;;  %v796_v60 = vadd.f32 %v1885_v47, %v111_v37  ;;  %v613_v61 = vpop.f32.mrf.mxu0  ;;  %v1325_v3 = vsel %vm19_vm2, %v921_v46, 0.0  ;;  %v1797_v35 = vpack.c.bf16 %v2492_v15, %v2492_v15 }
  0xfd   :  { %v1519_v52 = vadd.f32 %v1518_v54, %v1517_v50  ;;  %1242 = vst.msk [vmem:[%s2990_s2 + $0x50] sm:$0xf] %vm1221_vm3, %v1779_v51  ;;  %v1324_v62 = vadd.f32 %v1323_v56, %v1322_v49  ;;  %v1782_v63 = vpack.c.bf16 %v924_v59, %v924_v59  ;;  %v794_v7 = vadd.f32 %v613_v61, %v109_v53  ;;  %v2515_v50 = vpop.f32.mrf.mxu1 }
  0xfe   :  { %v922_v6 = vld [vmem:[#allocation2 + $0xa8] sm:$0xff]  ;;  %861 = vst.msk [vmem:[#allocation2 + $0xd8] sm:$0xff] %vm19_vm2, %v796_v60  ;;  %v1888_v8 = vpop.f32.mrf.mxu0  ;;  %v1522_v21 = vsel %vm19_vm2, %v1439_v58, 0.0  ;;  %v1442_v36 = vmul.f32 %v924_v59, %v924_v59  ;;  %v2513_v49 = vsel %vm19_vm2, %v2356_v48, 0.0  ;;  %v1526_v51 = vsel %vm19_vm2, %v1441_v20, 0.0  ;;  %v2524_v60 = vld [vmem:[#allocation2 + $0x120] sm:$0xff] }
  0xff   :  { %v1326_v9 = vadd.f32 %v1325_v3, %v1324_v62  ;;  %v1521_v11 = vadd.f32 %v1520_v1, %v1519_v52  ;;  %1245 = vst.msk [vmem:[%s2990_s2 + $0x5c] sm:$0xf] %vm1221_vm3, %v1782_v63  ;;  %v1780_v12 = vpack.c.bf16 %v922_v6, %v922_v6  ;;  %v1327_v13 = vsel %vm19_vm2, %v922_v6, 0.0  ;;  %1260 = vst.msk [vmem:[%s2990_s2 + $0x98] sm:$0xf] %vm1221_vm3, %v1797_v35 }
 0x100   :  { %v1440_v23 = vmul.f32 %v922_v6, %v922_v6  ;;  %v927_v24 = vld [vmem:[#allocation2 + $0xd0] sm:$0xff]  ;;  %859 = vst.msk [vmem:[#allocation2 + $0xc8] sm:$0xff] %vm19_vm2, %v794_v7  ;;  %v799_v26 = vadd.f32 %v1888_v8, %v114_v0  ;;  %v626_v19 = vpop.f32.mrf.mxu0  ;;  %v1331_v53 = vsel %vm19_vm2, %v924_v59, 0.0  ;;  %v1528_v0 = vsel %vm19_vm2, %v1442_v36, 0.0 }
 0x101   :  { %v1523_v30 = vadd.f32 %v1522_v21, %v1521_v11  ;;  %1243 = vst.msk [vmem:[%s2990_s2 + $0x54] sm:$0xf] %vm1221_vm3, %v1780_v12  ;;  %v1328_v32 = vadd.f32 %v1327_v13, %v1326_v9  ;;  %v1785_v33 = vpack.c.bf16 %v927_v24, %v927_v24  ;;  %v797_v39 = vadd.f32 %v626_v19, %v112_v14  ;;  %v2540_v13 = vpop.f32.mrf.mxu1 }
 0x102   :  { %v1524_v37 = vsel %vm19_vm2, %v1440_v23, 0.0  ;;  %v925_v38 = vld [vmem:[#allocation2 + $0xc0] sm:$0xff]  ;;  %864 = vst.msk [vmem:[#allocation2 + $0xf0] sm:$0xff] %vm19_vm2, %v799_v26  ;;  %v1889_v40 = vpop.f32.mrf.mxu0  ;;  %v1445_v52 = vmul.f32 %v927_v24, %v927_v24  ;;  %v2535_v6 = vmul.f32 %v2356_v48, %v2356_v48  ;;  %v1795_v12 = vpack.c.bf16 %v2524_v60, %v2524_v60  ;;  %v123_v23 = vld [vmem:[#allocation2 + $0x138] sm:$0xff] }
 0x103   :  { %v1330_v44 = vadd.f32 %v1329_v27, %v1328_v32  ;;  %v1525_v46 = vadd.f32 %v1524_v37, %v1523_v30  ;;  %1248 = vst.msk [vmem:[%s2990_s2 + $0x68] sm:$0xf] %vm1221_vm3, %v1785_v33  ;;  %v1783_v47 = vpack.c.bf16 %v925_v38, %v925_v38  ;;  %v1443_v54 = vmul.f32 %v925_v38, %v925_v38  ;;  %v121_v37 = vld [vmem:[#allocation2 + $0x128] sm:$0xff] }
 0x104   :  { %862 = vst.msk [vmem:[#allocation2 + $0xe0] sm:$0xff] %vm19_vm2, %v797_v39  ;;  %v800_v56 = vadd.f32 %v1889_v40, %v115_v34  ;;  %v629_v58 = vpop.f32.mrf.mxu0  ;;  %v1333_v1 = vsel %vm19_vm2, %v925_v38, 0.0  ;;  %v1337_v26 = vsel %vm19_vm2, %v927_v24, 0.0  ;;  %v1534_v19 = vsel %vm19_vm2, %v1445_v52, 0.0  ;;  %v126_v38 = vld [vmem:[#allocation2 + $0x150] sm:$0xff] }
 0x105   :  { %v1527_v61 = vadd.f32 %v1526_v51, %v1525_v46  ;;  %1246 = vst.msk [vmem:[%s2990_s2 + $0x60] sm:$0xf] %vm1221_vm3, %v1783_v47  ;;  %v1332_v59 = vadd.f32 %v1331_v53, %v1330_v44  ;;  %v928_v62 = vld [vmem:[#allocation2 + $0xd8] sm:$0xff]  ;;  %v798_v63 = vadd.f32 %v629_v58, %v113_v43  ;;  %v1530_v14 = vsel %vm19_vm2, %v1443_v54, 0.0  ;;  %1258 = vst.msk [vmem:[%s2990_s2 + $0x90] sm:$0xf] %vm1221_vm3, %v1795_v12  ;;  %v2562_v46 = vpop.f32.mrf.mxu1 }
 0x106   :  { %v1786_v3 = vpack.c.bf16 %v928_v62, %v928_v62  ;;  %865 = vst.msk [vmem:[#allocation2 + $0xf8] sm:$0xff] %vm19_vm2, %v800_v56  ;;  %v1446_v9 = vmul.f32 %v928_v62, %v928_v62  ;;  %v1339_v33 = vsel %vm19_vm2, %v928_v62, 0.0  ;;  %v808_v44 = vadd.f32 %v2317_v10, %v123_v23  ;;  %v127_v62 = vld [vmem:[#allocation2 + $0x158] sm:$0xff] }
 0x107   :  { %v1334_v7 = vadd.f32 %v1333_v1, %v1332_v59  ;;  %v1529_v8 = vadd.f32 %v1528_v0, %v1527_v61  ;;  %v926_v11 = vld [vmem:[#allocation2 + $0xc8] sm:$0xff]  ;;  %863 = vst.msk [vmem:[#allocation2 + $0xe8] sm:$0xff] %vm19_vm2, %v798_v63  ;;  %v806_v10 = vadd.f32 %v2330_v22, %v121_v37  ;;  %v811_v52 = vadd.f32 %v2343_v31, %v126_v38  ;;  %v124_v59 = vld [vmem:[#allocation2 + $0x140] sm:$0xff] }
 0x108   :  { %1249 = vst.msk [vmem:[%s2990_s2 + $0x6c] sm:$0xf] %vm1221_vm3, %v1786_v3  ;;  %v1784_v48 = vpack.c.bf16 %v926_v11, %v926_v11  ;;  %v1335_v20 = vsel %vm19_vm2, %v926_v11, 0.0  ;;  %v1444_v21 = vmul.f32 %v926_v11, %v926_v11  ;;  %v1536_v39 = vsel %vm19_vm2, %v1446_v9, 0.0  ;;  %v130_v9 = vld [vmem:[#allocation2 + $0x170] sm:$0xff]  ;;  %v133_v38 = vld [vmem:[#allocation2 + $0x188] sm:$0xff] }
 0x109   :  { %v1531_v27 = vadd.f32 %v1530_v14, %v1529_v8  ;;  %v1336_v30 = vadd.f32 %v1335_v20, %v1334_v7  ;;  %v931_v32 = vld [vmem:[#allocation2 + $0xf0] sm:$0xff]  ;;  %873 = vst.msk [vmem:[#allocation2 + $0x138] sm:$0xff] %vm19_vm2, %v808_v44  ;;  %v125_v8 = vld [vmem:[#allocation2 + $0x148] sm:$0xff]  ;;  %871 = vst.msk [vmem:[#allocation2 + $0x128] sm:$0xff] %vm19_vm2, %v806_v10  ;;  %v815_v37 = vadd.f32 %v2391_v16, %v130_v9  ;;  %v1546_v9 = vsel %vm19_vm2, %v2535_v6, 0.0 }
 0x10a   :  { %1247 = vst.msk [vmem:[%s2990_s2 + $0x64] sm:$0xf] %vm1221_vm3, %v1784_v48  ;;  %v1532_v34 = vsel %vm19_vm2, %v1444_v21, 0.0  ;;  %v1789_v24 = vpack.c.bf16 %v931_v32, %v931_v32  ;;  %v1449_v36 = vmul.f32 %v931_v32, %v931_v32  ;;  %v1345_v47 = vsel %vm19_vm2, %v931_v32, 0.0  ;;  %v128_v14 = vld [vmem:[#allocation2 + $0x160] sm:$0xff]  ;;  %v131_v48 = vld [vmem:[#allocation2 + $0x178] sm:$0xff]  ;;  %v725_v21 = vpop.f32.mrf.mxu1 }
 0x10b   :  { %v1338_v40 = vadd.f32 %v1337_v26, %v1336_v30  ;;  %v1533_v43 = vadd.f32 %v1532_v34, %v1531_v27  ;;  %v929_v35 = vld [vmem:[#allocation2 + $0xe0] sm:$0xff]  ;;  %876 = vst.msk [vmem:[#allocation2 + $0x150] sm:$0xff] %vm19_vm2, %v811_v52  ;;  %v129_v20 = vld [vmem:[#allocation2 + $0x168] sm:$0xff]  ;;  %v812_v27 = vadd.f32 %v2365_v55, %v127_v62  ;;  %v134_v30 = vld [vmem:[#allocation2 + $0x190] sm:$0xff]  ;;  %v813_v55 = vadd.f32 %v2402_v29, %v128_v14 }
 0x10c   :  { %1252 = vst.msk [vmem:[%s2990_s2 + $0x78] sm:$0xf] %vm1221_vm3, %v1789_v24  ;;  %v2570_v51 = vsel %vm19_vm2, %v1449_v36, 0.0  ;;  %v1787_v53 = vpack.c.bf16 %v929_v35, %v929_v35  ;;  %v1447_v54 = vmul.f32 %v929_v35, %v929_v35  ;;  %v1341_v63 = vsel %vm19_vm2, %v929_v35, 0.0  ;;  %v132_v32 = vld [vmem:[#allocation2 + $0x180] sm:$0xff] }
 0x10d   :  { %v1535_v56 = vadd.f32 %v1534_v19, %v1533_v43  ;;  %v1340_v58 = vadd.f32 %v1339_v33, %v1338_v40  ;;  %v932_v61 = vld [vmem:[#allocation2 + $0xf8] sm:$0xff]  ;;  %v809_v19 = vadd.f32 %v2352_v42, %v124_v59  ;;  %v810_v36 = vadd.f32 %v2378_v4, %v125_v8  ;;  %v136_v40 = vld [vmem:[#allocation2 + $0x1a0] sm:$0xff]  ;;  %877 = vst.msk [vmem:[#allocation2 + $0x158] sm:$0xff] %vm19_vm2, %v812_v27 }
 0x10e   :  { %1250 = vst.msk [vmem:[%s2990_s2 + $0x70] sm:$0xf] %vm1221_vm3, %v1787_v53  ;;  %v1538_v0 = vsel %vm19_vm2, %v1447_v54, 0.0  ;;  %v1790_v1 = vpack.c.bf16 %v932_v61, %v932_v61  ;;  %v1347_v3 = vsel %vm19_vm2, %v932_v61, 0.0  ;;  %v930_v7 = vld [vmem:[#allocation2 + $0xe8] sm:$0xff]  ;;  %v1450_v23 = vmul.f32 %v932_v61, %v932_v61  ;;  %v135_v33 = vld [vmem:[#allocation2 + $0x198] sm:$0xff]  ;;  %v1916_v61 = vpop.f32.mrf.mxu1 }
 0x10f   :  { %v1342_v22 = vadd.f32 %v1341_v63, %v1340_v58  ;;  %v1537_v11 = vadd.f32 %v1536_v39, %v1535_v56  ;;  %v1788_v31 = vpack.c.bf16 %v930_v7, %v930_v7  ;;  %v1343_v12 = vsel %vm19_vm2, %v930_v7, 0.0  ;;  %v138_v39 = vld [vmem:[#allocation2 + $0x1b0] sm:$0xff]  ;;  %874 = vst.msk [vmem:[#allocation2 + $0x140] sm:$0xff] %vm19_vm2, %v809_v19  ;;  %875 = vst.msk [vmem:[#allocation2 + $0x148] sm:$0xff] %vm19_vm2, %v810_v36  ;;  %v139_v54 = vld [vmem:[#allocation2 + $0x1b8] sm:$0xff] }
 0x110   :  { %1253 = vst.msk [vmem:[%s2990_s2 + $0x7c] sm:$0xf] %vm1221_vm3, %v1790_v1  ;;  %v1448_v26 = vmul.f32 %v930_v7, %v930_v7  ;;  %v816_v43 = vadd.f32 %v2413_v41, %v131_v48  ;;  %v814_v35 = vadd.f32 %v2425_v57, %v129_v20  ;;  %v819_v4 = vadd.f32 %v2438_v5, %v134_v30  ;;  %v137_v56 = vld [vmem:[#allocation2 + $0x1a8] sm:$0xff]  ;;  %v142_v58 = vld [vmem:[#allocation2 + $0x1d0] sm:$0xff]  ;;  %v2607_v10 = vld [vmem:[#allocation2 + $0x138] sm:$0xff]  ;;  %v738_v7 = vpop.f32.mrf.mxu1 }
 0x111   :  { %v1539_v34 = vadd.f32 %v1538_v0, %v1537_v11  ;;  %1251 = vst.msk [vmem:[%s2990_s2 + $0x74] sm:$0xf] %vm1221_vm3, %v1788_v31  ;;  %v1344_v24 = vadd.f32 %v1343_v12, %v1342_v22  ;;  %v817_v16 = vadd.f32 %v2450_v25, %v132_v32  ;;  %v820_v29 = vadd.f32 %v2472_v45, %v135_v33  ;;  %v140_v63 = vld [vmem:[#allocation2 + $0x1c0] sm:$0xff] }
 0x112   :  { %v1540_v42 = vsel %vm19_vm2, %v1448_v26, 0.0  ;;  %880 = vst.msk [vmem:[#allocation2 + $0x170] sm:$0xff] %vm19_vm2, %v815_v37  ;;  %878 = vst.msk [vmem:[#allocation2 + $0x160] sm:$0xff] %vm19_vm2, %v813_v55  ;;  %v818_v41 = vadd.f32 %v2494_v18, %v133_v38  ;;  %v823_v57 = vadd.f32 %v2515_v50, %v138_v39  ;;  %v821_v5 = vadd.f32 %v2540_v13, %v136_v40  ;;  %v938_v18 = vld [vmem:[#allocation2 + $0x128] sm:$0xff]  ;;  %v2624_v62 = vld [vmem:[#allocation2 + $0x150] sm:$0xff]  ;;  %v2673_v27 = vpop.f32.mrf.mxu1 }
 0x113   :  { %v1346_v44 = vadd.f32 %v1345_v47, %v1344_v24  ;;  %v1541_v53 = vadd.f32 %v1540_v42, %v1539_v34  ;;  %881 = vst.msk [vmem:[#allocation2 + $0x178] sm:$0xff] %vm19_vm2, %v816_v43  ;;  %879 = vst.msk [vmem:[#allocation2 + $0x168] sm:$0xff] %vm19_vm2, %v814_v35  ;;  %v1452_v52 = vmul.f32 %v2447_v17, %v2447_v17  ;;  %v1544_v45 = vsel %vm19_vm2, %v1450_v23, 0.0 }
 0x114   :  { %v1798_v59 = vpack.c.bf16 %v2607_v10, %v2607_v10  ;;  %884 = vst.msk [vmem:[#allocation2 + $0x190] sm:$0xff] %vm19_vm2, %v819_v4  ;;  %882 = vst.msk [vmem:[#allocation2 + $0x180] sm:$0xff] %vm19_vm2, %v817_v16  ;;  %v824_v50 = vadd.f32 %v2562_v46, %v139_v54  ;;  %v822_v13 = vadd.f32 %v725_v21, %v137_v56  ;;  %v1351_v46 = vsel %vm19_vm2, %v2447_v17, 0.0  ;;  %v2653_v31 = vld [vmem:[#allocation2 + $0x158] sm:$0xff] }
 0x115   :  { %v1543_v25 = vadd.f32 %v2570_v51, %v1541_v53  ;;  %v1348_v47 = vadd.f32 %v1347_v3, %v1346_v44  ;;  %885 = vst.msk [vmem:[#allocation2 + $0x198] sm:$0xff] %vm19_vm2, %v820_v29  ;;  %883 = vst.msk [vmem:[#allocation2 + $0x188] sm:$0xff] %vm19_vm2, %v818_v41  ;;  %v827_v51 = vadd.f32 %v1916_v61, %v142_v58  ;;  %v1353_v12 = vsel %vm19_vm2, %v2309_v2, 0.0  ;;  %v2707_v53 = vpop.f32.mrf.mxu1 }
 0x116   :  { %888 = vst.msk [vmem:[#allocation2 + $0x1b0] sm:$0xff] %vm19_vm2, %v823_v57  ;;  %886 = vst.msk [vmem:[#allocation2 + $0x1a0] sm:$0xff] %vm19_vm2, %v821_v5  ;;  %v1796_v3 = vpack.c.bf16 %v938_v18, %v938_v18  ;;  %v1453_v8 = vmul.f32 %v2309_v2, %v2309_v2  ;;  %v2651_v6 = vld [vmem:[#allocation2 + $0x140] sm:$0xff]  ;;  %v825_v17 = vadd.f32 %v738_v7, %v140_v63  ;;  %v1548_v48 = vsel %vm19_vm2, %v1452_v52, 0.0  ;;  %v2666_v21 = vld [vmem:[#allocation2 + $0x148] sm:$0xff] }
 0x117   :  { %v1350_v0 = vadd.f32 %v2513_v49, %v1348_v47  ;;  %v1545_v1 = vadd.f32 %v1544_v45, %v1543_v25  ;;  %1261 = vst.msk [vmem:[%s2990_s2 + $0x9c] sm:$0xf] %vm1221_vm3, %v1798_v59  ;;  %v1801_v49 = vpack.c.bf16 %v2624_v62, %v2624_v62  ;;  %v1454_v14 = vmul.f32 %v2400_v28, %v2400_v28 }
 0x118   :  { %889 = vst.msk [vmem:[#allocation2 + $0x1b8] sm:$0xff] %vm19_vm2, %v824_v50  ;;  %887 = vst.msk [vmem:[#allocation2 + $0x1a8] sm:$0xff] %vm19_vm2, %v822_v13  ;;  %v1799_v20 = vpack.c.bf16 %v2651_v6, %v2651_v6  ;;  %v1802_v2 = vpack.c.bf16 %v2653_v31, %v2653_v31  ;;  %v1550_v30 = vsel %vm19_vm2, %v1453_v8, 0.0  ;;  %v1355_v32 = vsel %vm19_vm2, %v2400_v28, 0.0 }
 0x119   :  { %892 = vst.msk [vmem:[#allocation2 + $0x1d0] sm:$0xff] %vm19_vm2, %v827_v51  ;;  %v1352_v22 = vadd.f32 %v1351_v46, %v1350_v0  ;;  %v1547_v11 = vadd.f32 %v1546_v9, %v1545_v1  ;;  %v2670_v19 = vld [vmem:[#allocation2 + $0x170] sm:$0xff]  ;;  %890 = vst.msk [vmem:[#allocation2 + $0x1c0] sm:$0xff] %vm19_vm2, %v825_v17  ;;  %v1455_v33 = vmul.f32 %v2524_v60, %v2524_v60  ;;  %v2686_v24 = vld [vmem:[#allocation2 + $0x160] sm:$0xff]  ;;  %v1552_v38 = vsel %vm19_vm2, %v1454_v14, 0.0 }
 0x11a   :  { %1259 = vst.msk [vmem:[%s2990_s2 + $0x94] sm:$0xf] %vm1221_vm3, %v1796_v3  ;;  %1264 = vst.msk [vmem:[%s2990_s2 + $0xa8] sm:$0xf] %vm1221_vm3, %v1801_v49  ;;  %v1800_v34 = vpack.c.bf16 %v2666_v21, %v2666_v21  ;;  %v2692_v28 = vld [vmem:[#allocation2 + $0x178] sm:$0xff]  ;;  %v1357_v39 = vsel %vm19_vm2, %v2524_v60, 0.0  ;;  %v1456_v40 = vmul.f32 %v938_v18, %v938_v18  ;;  %v1805_v42 = vpack.c.bf16 %v2670_v19, %v2670_v19 }
 0x11b   :  { %v1354_v23 = vadd.f32 %v1353_v12, %v1352_v22  ;;  %v1549_v26 = vadd.f32 %v1548_v48, %v1547_v11  ;;  %1262 = vst.msk [vmem:[%s2990_s2 + $0xa0] sm:$0xf] %vm1221_vm3, %v1799_v20  ;;  %1265 = vst.msk [vmem:[%s2990_s2 + $0xac] sm:$0xf] %vm1221_vm3, %v1802_v2  ;;  %v1803_v35 = vpack.c.bf16 %v2686_v24, %v2686_v24  ;;  %v2705_v44 = vld [vmem:[#allocation2 + $0x168] sm:$0xff]  ;;  %v1554_v4 = vsel %vm19_vm2, %v1455_v33, 0.0 }
 0x11c   :  { %1263 = vst.msk [vmem:[%s2990_s2 + $0xa4] sm:$0xf] %vm1221_vm3, %v1800_v34  ;;  %v1457_v60 = vmul.f32 %v2492_v15, %v2492_v15  ;;  %v1359_v16 = vsel %vm19_vm2, %v938_v18, 0.0  ;;  %1268 = vst.msk [vmem:[%s2990_s2 + $0xb8] sm:$0xf] %vm1221_vm3, %v1805_v42  ;;  %v1806_v54 = vpack.c.bf16 %v2692_v28, %v2692_v28  ;;  %v2719_v56 = vld [vmem:[#allocation2 + $0x190] sm:$0xff]  ;;  %v1458_v57 = vmul.f32 %v2607_v10, %v2607_v10 }
 0x11d   :  { %v1551_v36 = vadd.f32 %v1550_v30, %v1549_v26  ;;  %v1356_v37 = vadd.f32 %v1355_v32, %v1354_v23  ;;  %1266 = vst.msk [vmem:[%s2990_s2 + $0xb0] sm:$0xf] %vm1221_vm3, %v1803_v35  ;;  %v2725_v29 = vld [vmem:[#allocation2 + $0x180] sm:$0xff]  ;;  %v1361_v41 = vsel %vm19_vm2, %v2492_v15, 0.0  ;;  %v1556_v5 = vsel %vm19_vm2, %v1456_v40, 0.0  ;;  %v2740_v45 = vld [vmem:[#allocation2 + $0x198] sm:$0xff]  ;;  %v2742_v15 = vpop.f32.mrf.mxu1 }
 0x11e   :  { %1269 = vst.msk [vmem:[%s2990_s2 + $0xbc] sm:$0xf] %vm1221_vm3, %v1806_v54  ;;  %v1804_v25 = vpack.c.bf16 %v2705_v44, %v2705_v44  ;;  %v1809_v59 = vpack.c.bf16 %v2719_v56, %v2719_v56  ;;  %v1558_v18 = vsel %vm19_vm2, %v1457_v60, 0.0  ;;  %v1363_v50 = vsel %vm19_vm2, %v2607_v10, 0.0  ;;  %v2755_v63 = vld [vmem:[#allocation2 + $0x188] sm:$0xff]  ;;  %v2761_v10 = vld [vmem:[#allocation2 + $0x1b0] sm:$0xff] }
 0x11f   :  { %v1358_v55 = vadd.f32 %v1357_v39, %v1356_v37  ;;  %v1553_v43 = vadd.f32 %v1552_v38, %v1551_v36  ;;  %v1459_v13 = vmul.f32 %v2651_v6, %v2651_v6  ;;  %v1807_v51 = vpack.c.bf16 %v2725_v29, %v2725_v29  ;;  %v2776_v11 = vld [vmem:[#allocation2 + $0x1a0] sm:$0xff]  ;;  %v754_v17 = vpop.f32.mrf.mxu1  ;;  %v2789_v20 = vld [vmem:[#allocation2 + $0x1b8] sm:$0xff] }
 0x120   :  { %1267 = vst.msk [vmem:[%s2990_s2 + $0xb4] sm:$0xf] %vm1221_vm3, %v1804_v25  ;;  %1272 = vst.msk [vmem:[%s2990_s2 + $0xc8] sm:$0xf] %vm1221_vm3, %v1809_v59  ;;  %v1560_v3 = vsel %vm19_vm2, %v1458_v57, 0.0  ;;  %v1365_v7 = vsel %vm19_vm2, %v2651_v6, 0.0  ;;  %v1460_v8 = vmul.f32 %v2666_v21, %v2666_v21  ;;  %v1810_v9 = vpack.c.bf16 %v2740_v45, %v2740_v45 }
 0x121   :  { %v1555_v58 = vadd.f32 %v1554_v4, %v1553_v43  ;;  %v1360_v61 = vadd.f32 %v1359_v16, %v1358_v55  ;;  %1270 = vst.msk [vmem:[%s2990_s2 + $0xc0] sm:$0xf] %vm1221_vm3, %v1807_v51  ;;  %v1808_v22 = vpack.c.bf16 %v2755_v63, %v2755_v63  ;;  %v1461_v6 = vmul.f32 %v2624_v62, %v2624_v62  ;;  %v2810_v38 = vld [vmem:[#allocation2 + $0x1d0] sm:$0xff]  ;;  %v1921_v39 = vpop.f32.mrf.mxu1  ;;  %v2823_v43 = vld [vmem:[#allocation2 + $0x1c0] sm:$0xff]  ;;  %v147_v59 = vld [vmem:[#allocation2 + $0x1f8] sm:$0xff] }
 0x122   :  { %v1562_v12 = vsel %vm19_vm2, %v1459_v13, 0.0  ;;  %v1367_v14 = vsel %vm19_vm2, %v2666_v21, 0.0  ;;  %1273 = vst.msk [vmem:[%s2990_s2 + $0xcc] sm:$0xf] %vm1221_vm3, %v1810_v9  ;;  %v1813_v48 = vpack.c.bf16 %v2761_v10, %v2761_v10  ;;  %v1462_v26 = vmul.f32 %v2653_v31, %v2653_v31  ;;  %v2797_v21 = vld [vmem:[#allocation2 + $0x1a8] sm:$0xff]  ;;  %v146_v57 = vld [vmem:[#allocation2 + $0x1f0] sm:$0xff] }
 0x123   :  { %v1362_v47 = vadd.f32 %v1361_v41, %v1360_v61  ;;  %v1557_v52 = vadd.f32 %v1556_v5, %v1555_v58  ;;  %1271 = vst.msk [vmem:[%s2990_s2 + $0xc4] sm:$0xf] %vm1221_vm3, %v1808_v22  ;;  %v1369_v30 = vsel %vm19_vm2, %v2624_v62, 0.0  ;;  %v1564_v32 = vsel %vm19_vm2, %v1460_v8, 0.0  ;;  %v141_v41 = vld [vmem:[#allocation2 + $0x1c8] sm:$0xff] }
 0x124   :  { %1276 = vst.msk [vmem:[%s2990_s2 + $0xd8] sm:$0xf] %vm1221_vm3, %v1813_v48  ;;  %v1811_v33 = vpack.c.bf16 %v2776_v11, %v2776_v11  ;;  %v1814_v37 = vpack.c.bf16 %v2789_v20, %v2789_v20  ;;  %v1566_v62 = vsel %vm19_vm2, %v1461_v6, 0.0  ;;  %v1371_v40 = vsel %vm19_vm2, %v2653_v31, 0.0  ;;  %v143_v31 = vld [vmem:[#allocation2 + $0x1d8] sm:$0xff] }
 0x125   :  { %v1559_v0 = vadd.f32 %v1558_v18, %v1557_v52  ;;  %v1364_v1 = vadd.f32 %v1363_v50, %v1362_v47  ;;  %v1463_v42 = vmul.f32 %v2686_v24, %v2686_v24  ;;  %v1812_v55 = vpack.c.bf16 %v2797_v21, %v2797_v21  ;;  %v144_v52 = vld [vmem:[#allocation2 + $0x1e0] sm:$0xff]  ;;  %v145_v18 = vld [vmem:[#allocation2 + $0x1e8] sm:$0xff]  ;;  %v757_v50 = vpop.f32.mrf.mxu1 }
 0x126   :  { %1274 = vst.msk [vmem:[%s2990_s2 + $0xd0] sm:$0xf] %vm1221_vm3, %v1811_v33  ;;  %v1568_v35 = vsel %vm19_vm2, %v1462_v26, 0.0  ;;  %1277 = vst.msk [vmem:[%s2990_s2 + $0xdc] sm:$0xf] %vm1221_vm3, %v1814_v37  ;;  %v1377_v16 = vsel %vm19_vm2, %v2670_v19, 0.0  ;;  %v1464_v58 = vmul.f32 %v2705_v44, %v2705_v44  ;;  %v1817_v61 = vpack.c.bf16 %v2810_v38, %v2810_v38 }
 0x127   :  { %v1366_v46 = vadd.f32 %v1365_v7, %v1364_v1  ;;  %v1561_v49 = vadd.f32 %v1560_v3, %v1559_v0  ;;  %v1373_v54 = vsel %vm19_vm2, %v2686_v24, 0.0  ;;  %1275 = vst.msk [vmem:[%s2990_s2 + $0xd4] sm:$0xf] %vm1221_vm3, %v1812_v55  ;;  %v1465_v5 = vmul.f32 %v2670_v19, %v2670_v19 }
 0x128   :  { %v1815_v24 = vpack.c.bf16 %v2823_v43, %v2823_v43  ;;  %v1570_v13 = vsel %vm19_vm2, %v1463_v42, 0.0  ;;  %v1466_v51 = vmul.f32 %v2692_v28, %v2692_v28  ;;  %v1375_v0 = vsel %vm19_vm2, %v2705_v44, 0.0  ;;  %1280 = vst.msk [vmem:[%s2990_s2 + $0xe8] sm:$0xf] %vm1221_vm3, %v1817_v61 }
 0x129   :  { %v1563_v23 = vadd.f32 %v1562_v12, %v1561_v49  ;;  %v1368_v2 = vadd.f32 %v1367_v14, %v1366_v46  ;;  %v828_v19 = vadd.f32 %v2673_v27, %v143_v31  ;;  %v826_v7 = vadd.f32 %v2707_v53, %v141_v41 }
 0x12a   :  { %1278 = vst.msk [vmem:[%s2990_s2 + $0xe0] sm:$0xf] %vm1221_vm3, %v1815_v24  ;;  %v831_v8 = vadd.f32 %v2742_v15, %v146_v57  ;;  %v1572_v44 = vsel %vm19_vm2, %v1464_v58, 0.0  ;;  %v829_v9 = vadd.f32 %v754_v17, %v144_v52  ;;  %v832_v46 = vadd.f32 %v1921_v39, %v147_v59 }
 0x12b   :  { %v1370_v34 = vadd.f32 %v1369_v30, %v1368_v2  ;;  %v1565_v36 = vadd.f32 %v1564_v32, %v1563_v23  ;;  %893 = vst.msk [vmem:[#allocation2 + $0x1d8] sm:$0xff] %vm19_vm2, %v828_v19  ;;  %v830_v49 = vadd.f32 %v757_v50, %v145_v18  ;;  %891 = vst.msk [vmem:[#allocation2 + $0x1c8] sm:$0xff] %vm19_vm2, %v826_v7  ;;  %v1574_v6 = vsel %vm19_vm2, %v1465_v5, 0.0 }
 0x12c   :  { %896 = vst.msk [vmem:[#allocation2 + $0x1f0] sm:$0xff] %vm19_vm2, %v831_v8  ;;  %v1379_v53 = vsel %vm19_vm2, %v2692_v28, 0.0  ;;  %v1467_v15 = vmul.f32 %v2725_v29, %v2725_v29  ;;  %894 = vst.msk [vmem:[#allocation2 + $0x1e0] sm:$0xff] %vm19_vm2, %v829_v9  ;;  %v1576_v14 = vsel %vm19_vm2, %v1466_v51, 0.0  ;;  %v1381_v48 = vsel %vm19_vm2, %v2725_v29, 0.0 }
 0x12d   :  { %v1567_v60 = vadd.f32 %v1566_v62, %v1565_v36  ;;  %v1372_v4 = vadd.f32 %v1371_v40, %v1370_v34  ;;  %897 = vst.msk [vmem:[#allocation2 + $0x1f8] sm:$0xff] %vm19_vm2, %v832_v46  ;;  %895 = vst.msk [vmem:[#allocation2 + $0x1e8] sm:$0xff] %vm19_vm2, %v830_v49  ;;  %v1468_v23 = vmul.f32 %v2755_v63, %v2755_v63  ;;  %v1383_v32 = vsel %vm19_vm2, %v2755_v63, 0.0 }
 0x12e   :  { %v1469_v2 = vmul.f32 %v2719_v56, %v2719_v56  ;;  %v1578_v30 = vsel %vm19_vm2, %v1467_v15, 0.0  ;;  %v1385_v29 = vsel %vm19_vm2, %v2719_v56, 0.0  ;;  %v1470_v37 = vmul.f32 %v2740_v45, %v2740_v45 }
 0x12f   :  { %v1374_v25 = vadd.f32 %v1373_v54, %v1372_v4  ;;  %v1569_v47 = vadd.f32 %v1568_v35, %v1567_v60  ;;  %v1580_v39 = vsel %vm19_vm2, %v1468_v23, 0.0  ;;  %v1387_v56 = vsel %vm19_vm2, %v2740_v45, 0.0 }
 0x130   :  { %v1582_v31 = vsel %vm19_vm2, %v1469_v2, 0.0  ;;  %v1584_v57 = vsel %vm19_vm2, %v1470_v37, 0.0  ;;  %v1389_v5 = vsel %vm19_vm2, %v2776_v11, 0.0  ;;  %v1391_v18 = vsel %vm19_vm2, %v2797_v21, 0.0 }
 0x131   :  { %v1571_v1 = vadd.f32 %v1570_v13, %v1569_v47  ;;  %v1376_v3 = vadd.f32 %v1375_v0, %v1374_v25  ;;  %v1472_v25 = vmul.f32 %v2797_v21, %v2797_v21  ;;  %v1393_v0 = vsel %vm19_vm2, %v2761_v10, 0.0 }
 0x132   :  { %v2884_v36 = vld [vmem:[#allocation2 + $0x1d8] sm:$0xff]  ;;  %v958_v40 = vld [vmem:[#allocation2 + $0x1c8] sm:$0xff]  ;;  %v1474_v19 = vmul.f32 %v2789_v20, %v2789_v20  ;;  %v1395_v8 = vsel %vm19_vm2, %v2789_v20, 0.0  ;;  %v1397_v49 = vsel %vm19_vm2, %v2823_v43, 0.0 }
 0x133   :  { %v1378_v22 = vadd.f32 %v1377_v16, %v1376_v3  ;;  %v1573_v27 = vadd.f32 %v1572_v44, %v1571_v1  ;;  %v1818_v62 = vpack.c.bf16 %v2884_v36, %v2884_v36  ;;  %v2893_v42 = vld [vmem:[#allocation2 + $0x1f0] sm:$0xff]  ;;  %v1816_v35 = vpack.c.bf16 %v958_v40, %v958_v40  ;;  %v961_v60 = vld [vmem:[#allocation2 + $0x1e0] sm:$0xff] }
 0x134   :  { %v2895_v4 = vld [vmem:[#allocation2 + $0x1f8] sm:$0xff]  ;;  %v1471_v16 = vmul.f32 %v2776_v11, %v2776_v11  ;;  %v1821_v54 = vpack.c.bf16 %v2893_v42, %v2893_v42  ;;  %v1819_v41 = vpack.c.bf16 %v961_v60, %v961_v60  ;;  %v962_v45 = vld [vmem:[#allocation2 + $0x1e8] sm:$0xff]  ;;  %v1473_v11 = vmul.f32 %v2761_v10, %v2761_v10 }
 0x135   :  { %v1575_v17 = vadd.f32 %v1574_v6, %v1573_v27  ;;  %v1380_v12 = vadd.f32 %v1379_v53, %v1378_v22  ;;  %1281 = vst.msk [vmem:[%s2990_s2 + $0xec] sm:$0xf] %vm1221_vm3, %v1818_v62  ;;  %1279 = vst.msk [vmem:[%s2990_s2 + $0xe4] sm:$0xf] %vm1221_vm3, %v1816_v35  ;;  %v1822_v47 = vpack.c.bf16 %v2895_v4, %v2895_v4  ;;  %v1588_v1 = vsel %vm19_vm2, %v1472_v25, 0.0 }
 0x136   :  { %1284 = vst.msk [vmem:[%s2990_s2 + $0xf8] sm:$0xf] %vm1221_vm3, %v1821_v54  ;;  %1282 = vst.msk [vmem:[%s2990_s2 + $0xf0] sm:$0xf] %vm1221_vm3, %v1819_v41  ;;  %v1586_v59 = vsel %vm19_vm2, %v1471_v16, 0.0  ;;  %v1820_v50 = vpack.c.bf16 %v962_v45, %v962_v45  ;;  %v1590_v7 = vsel %vm19_vm2, %v1473_v11, 0.0  ;;  %v1475_v10 = vmul.f32 %v2823_v43, %v2823_v43 }
 0x137   :  { %v1382_v28 = vadd.f32 %v1381_v48, %v1380_v12  ;;  %v1577_v26 = vadd.f32 %v1576_v14, %v1575_v17  ;;  %1285 = vst.msk [vmem:[%s2990_s2 + $0xfc] sm:$0xf] %vm1221_vm3, %v1822_v47  ;;  %v1592_v46 = vsel %vm19_vm2, %v1474_v19, 0.0  ;;  %v1476_v22 = vmul.f32 %v958_v40, %v958_v40 }
 0x138   :  { %1283 = vst.msk [vmem:[%s2990_s2 + $0xf4] sm:$0xf] %vm1221_vm3, %v1820_v50  ;;  %v1477_v53 = vmul.f32 %v2810_v38, %v2810_v38  ;;  %v1594_v15 = vsel %vm19_vm2, %v1475_v10, 0.0  ;;  %v1399_v20 = vsel %vm19_vm2, %v958_v40, 0.0  ;;  %v1401_v14 = vsel %vm19_vm2, %v2810_v38, 0.0 }
 0x139   :  { %v1579_v33 = vadd.f32 %v1578_v30, %v1577_v26  ;;  %v1384_v34 = vadd.f32 %v1383_v32, %v1382_v28  ;;  %v1478_v48 = vmul.f32 %v2884_v36, %v2884_v36  ;;  %v1596_v43 = vsel %vm19_vm2, %v1476_v22, 0.0 }
 0x13a   :  { %v1598_v26 = vsel %vm19_vm2, %v1477_v53, 0.0  ;;  %v1403_v2 = vsel %vm19_vm2, %v2884_v36, 0.0  ;;  %v1479_v30 = vmul.f32 %v961_v60, %v961_v60  ;;  %v1480_v38 = vmul.f32 %v962_v45, %v962_v45 }
 0x13b   :  { %v1386_v55 = vadd.f32 %v1385_v29, %v1384_v34  ;;  %v1581_v63 = vadd.f32 %v1580_v39, %v1579_v33  ;;  %v1600_v34 = vsel %vm19_vm2, %v1478_v48, 0.0  ;;  %v1405_v29 = vsel %vm19_vm2, %v961_v60, 0.0 }
 0x13c   :  { %v1481_v62 = vmul.f32 %v2893_v42, %v2893_v42  ;;  %v1602_v40 = vsel %vm19_vm2, %v1479_v30, 0.0  ;;  %v1409_v36 = vsel %vm19_vm2, %v2893_v42, 0.0  ;;  %v1604_v60 = vsel %vm19_vm2, %v1480_v38, 0.0 }
 0x13d   :  { %v1583_v58 = vadd.f32 %v1582_v31, %v1581_v63  ;;  %v1388_v61 = vadd.f32 %v1387_v56, %v1386_v55  ;;  %v1407_v55 = vsel %vm19_vm2, %v962_v45, 0.0  ;;  %v1482_v31 = vmul.f32 %v2895_v4, %v2895_v4 }
 0x13e   :  { %v1606_v54 = vsel %vm19_vm2, %v1481_v62, 0.0 }
 0x13f   :  { %v1390_v24 = vadd.f32 %v1389_v5, %v1388_v61  ;;  %v1585_v52 = vadd.f32 %v1584_v57, %v1583_v58  ;;  %v1411_v58 = vsel %vm19_vm2, %v2895_v4, 0.0  ;;  %v1608_v45 = vsel %vm19_vm2, %v1482_v31, 0.0 }
 0x141   :  { %v1587_v13 = vadd.f32 %v1586_v59, %v1585_v52  ;;  %v1392_v51 = vadd.f32 %v1391_v18, %v1390_v24 }
 0x143   :  { %v1394_v21 = vadd.f32 %v1393_v0, %v1392_v51  ;;  %v1589_v3 = vadd.f32 %v1588_v1, %v1587_v13 }
 0x145   :  { %v1591_v44 = vadd.f32 %v1590_v7, %v1589_v3  ;;  %v1396_v9 = vadd.f32 %v1395_v8, %v1394_v21 }
 0x147   :  { %v1398_v27 = vadd.f32 %v1397_v49, %v1396_v9  ;;  %v1593_v6 = vadd.f32 %v1592_v46, %v1591_v44 }
 0x149   :  { %v1595_v17 = vadd.f32 %v1594_v15, %v1593_v6  ;;  %v1400_v12 = vadd.f32 %v1399_v20, %v1398_v27 }
 0x14b   :  { %v1402_v23 = vadd.f32 %v1401_v14, %v1400_v12  ;;  %v1597_v28 = vadd.f32 %v1596_v43, %v1595_v17 }
 0x14d   :  { %v1599_v32 = vadd.f32 %v1598_v26, %v1597_v28  ;;  %v1404_v33 = vadd.f32 %v1403_v2, %v1402_v23 }
 0x14f   :  { %v1406_v37 = vadd.f32 %v1405_v29, %v1404_v33  ;;  %v1601_v39 = vadd.f32 %v1600_v34, %v1599_v32 }
 0x151   :  { %v1603_v63 = vadd.f32 %v1602_v40, %v1601_v39  ;;  %v1408_v35 = vadd.f32 %v1407_v55, %v1406_v37 }
 0x153   :  { %v1410_v56 = vadd.f32 %v1409_v36, %v1408_v35  ;;  %v1605_v16 = vadd.f32 %v1604_v60, %v1603_v63 }
 0x155   :  { %v1412_v61 = vadd.f32 %v1411_v58, %v1410_v56  ;;  %v1607_v41 = vadd.f32 %v1606_v54, %v1605_v16 }
 0x157   :  { %v1413_v57 = vrot.slane %v1412_v61, 4  ;;  %v1609_v5 = vadd.f32 %v1608_v45, %v1607_v41 }
 0x159   :  { %v1414_v25 = vadd.f32 %v1413_v57, %v1412_v61  ;;  %v1610_v42 = vrot.slane %v1609_v5, 4 }
 0x15b   :  { %v1415_v47 = vrot.slane %v1414_v25, 2  ;;  %v1611_v24 = vadd.f32 %v1610_v42, %v1609_v5 }
 0x15d   :  { %v1416_v52 = vadd.f32 %v1415_v47, %v1414_v25  ;;  %v1612_v11 = vrot.slane %v1611_v24, 2 }
 0x15f   :  { %v1417_v59 = vrot.slane %v1416_v52, 1  ;;  %v1613_v18 = vadd.f32 %v1612_v11, %v1611_v24 }
 0x161   :  { %v1418_v50 = vadd.f32 %v1417_v59, %v1416_v52  ;;  %v1614_v13 = vrot.slane %v1613_v18, 1 }
 0x163   :  { %v1615_v51 = vadd.f32 %v1614_v13, %v1613_v18  ;;  %1616 = vst.msk [vmem:[%s2991_s3] sm:$0xff] %vm19_vm2, %v1418_v50 }
 0x165   :  { %1617 = vst.msk [vmem:[%s2992_s4] sm:$0xff] %vm19_vm2, %v1615_v51 }

// kernel: resnet_block_forward.8
= control target key start
LH: loop header
LB: loop body
LE: loop exit
PB: predicated region body
PF: predicated region fallthrough
CT: control target
= control target key end

     0   :  { %s99_s0 = inlined_call_operand.vmem [shape: bf16[16,128], index: 0, kind: input, shape index: {}]   ;;  %s100_s1 = inlined_call_operand.vmem [shape: f32[1,128], index: 1, kind: input, shape index: {}]   ;;  %s101_s2 = inlined_call_operand.vmem [shape: f32[1,128], index: 2, kind: input, shape index: {}]   ;;  %s102_s3 = inlined_call_operand.vmem [shape: bf16[16,128], index: 3, kind: output, shape index: {}]  }
   0x1   :  { %v59_v0 = vld [vmem:[%s99_s0] sm:$0xff]  }
   0x2   :  { %v52_v1 = vld [vmem:[%s100_s1] ss:$0 sm:$0xff]  ;;  %v60_v2 = vunpack.c.l.bf16 %v59_v0  ;;  %v61_v3 = vunpack.c.h.bf16 %v59_v0 }
   0x3   :  { %v53_v4 = vld [vmem:[%s101_s2] ss:$0 sm:$0xff] }
   0x4   :  { %v25_v5 = vmul.f32 %v60_v2, %v52_v1  ;;  %v26_v6 = vmul.f32 %v61_v3, %v52_v1 }
   0x6   :  { %v34_v7 = vadd.f32 %v53_v4, %v25_v5  ;;  %v35_v8 = vadd.f32 %v53_v4, %v26_v6 }
   0x8   :  { %v36_v9 = vmax.f32 %v34_v7, 0.0  ;;  %v37_v10 = vmax.f32 %v35_v8, 0.0 }
   0xa   :  { %v65_v11 = vpack.c.bf16 %v37_v10, %v36_v9 }
   0xc   :  { %66 = vst [vmem:[%s102_s3] sm:$0xff] %v65_v11  }

// kernel: resnet_block_forward.9
= control target key start
LH: loop header
LB: loop body
LE: loop exit
PB: predicated region body
PF: predicated region fallthrough
CT: control target
= control target key end

     0   :  { %vm153_vm0 = vcmask 1041408   ;;  %vm19_vm1 = vcmask 31744   ;;  %v595_v2 = vmov 0.0   ;;  %vm128_vm2 = vcmask 293888   ;;  %s843_s1 = inlined_call_operand.vmem [shape: bf16[36,4], index: 1, kind: input, shape index: {}]   ;;  %s844_s0 = inlined_call_operand.vmem [shape: bf16[128,36], index: 0, kind: input, shape index: {}]   ;;  %s845_s2 = inlined_call_operand.vmem [shape: bf16[128,4], index: 2, kind: output, shape index: {0}]   ;;  %s846_s3 = inlined_call_operand.vmem [shape: f32[1,8,4], index: 3, kind: output, shape index: {1}]   ;;  %s847_s4 = inlined_call_operand.vmem [shape: f32[1,8,4], index: 4, kind: output, shape index: {2}]  }
   0x1   :  { %v584_v0 = vld [vmem:[%s843_s1 + $0x10] ss:$0 sps:$4 sm:$0x33]   ;;  %v585_v1 = vld [vmem:[%s843_s1 + $0x8] sm:$0xff]   ;;  %22 = vst.msk [vmem:[#allocation2 + $0x10] sm:$0xff] %vm19_vm1, %v595_v2  ;;  %20 = vst.msk [vmem:[#allocation2] sm:$0xff] %vm19_vm1, %v595_v2 }
   0x2   :  { %21 = vst.msk [vmem:[#allocation2 + $0x8] sm:$0xff] %vm19_vm1, %v595_v2  ;;  %23 = vst.msk [vmem:[#allocation2 + $0x18] sm:$0xff] %vm19_vm1, %v595_v2  ;;  %581 = vmatprep.subr.msk.bf16.mxu0 %vm153_vm0, %v584_v0  ;;  %v155_v3 = vsel %vm153_vm0, %v584_v0, 0  ;;  %582 = vmatprep.subr.msk.bf16.mxu1 %vm153_vm0, %v584_v0  ;;  %v587_v4 = vld [vmem:[%s844_s0] sm:$0xff]   ;;  %v588_v7 = vld [vmem:[%s844_s0 + $0x8] sm:$0xff]   ;;  %vm370_vm3 = vcmask 27648  }
   0x3   :  { %24 = vst.msk [vmem:[#allocation2 + $0x20] sm:$0xff] %vm19_vm1, %v595_v2  ;;  %25 = vst.msk [vmem:[#allocation2 + $0x28] sm:$0xff] %vm19_vm1, %v595_v2  ;;  %554 = vmatpush3.bf16.msra.mxu0 %v155_v3  ;;  %578 = vmatpush3.bf16.msra.mxu1 %v155_v3  ;;  %v586_v5 = vld [vmem:[%s843_s1] sm:$0xff]   ;;  %v592_v8 = vld [vmem:[%s844_s0 + $0x28] sm:$0xff]  }
   0x4   :  { %26 = vst.msk [vmem:[#allocation2 + $0x30] sm:$0xff] %vm19_vm1, %v595_v2  ;;  %27 = vst.msk [vmem:[#allocation2 + $0x38] sm:$0xff] %vm19_vm1, %v595_v2  ;;  %555 = vmatprep.subr.bf16.mxu0 %v585_v1  ;;  %576 = vmatprep.subr.bf16.mxu1 %v585_v1  ;;  %v591_v6 = vld [vmem:[%s844_s0 + $0x20] sm:$0xff]   ;;  %v589_v9 = vld [vmem:[%s844_s0 + $0x10] sm:$0xff]  }
   0x5   :  { %28 = vst.msk [vmem:[#allocation2 + $0x40] sm:$0xff] %vm19_vm1, %v595_v2  ;;  %29 = vst.msk [vmem:[#allocation2 + $0x48] sm:$0xff] %vm19_vm1, %v595_v2  ;;  %559 = vmatprep.mubr.msk.bf16.mxu0 %vm128_vm2, %v587_v4  ;;  %567 = vmatprep.mubr.msk.bf16.mxu1 %vm128_vm2, %v591_v6  ;;  %v593_v10 = vld [vmem:[%s844_s0 + $0x30] sm:$0xff]   ;;  %v590_v11 = vld [vmem:[%s844_s0 + $0x18] sm:$0xff]  }
   0x6   :  { %30 = vst.msk [vmem:[#allocation2 + $0x50] sm:$0xff] %vm19_vm1, %v595_v2  ;;  %31 = vst.msk [vmem:[#allocation2 + $0x58] sm:$0xff] %vm19_vm1, %v595_v2  ;;  %v594_v12 = vld [vmem:[%s844_s0 + $0x38] sm:$0xff]  }
   0x7   :  { %32 = vst.msk [vmem:[#allocation2 + $0x60] sm:$0xff] %vm19_vm1, %v595_v2  ;;  %33 = vst.msk [vmem:[#allocation2 + $0x68] sm:$0xff] %vm19_vm1, %v595_v2  ;;  %556 = vmatpush3.bf16.msra.mxu0 %v585_v1  ;;  %579 = vmatpush3.bf16.msra.mxu1 %v585_v1 }
   0x8   :  { %34 = vst.msk [vmem:[#allocation2 + $0x70] sm:$0xff] %vm19_vm1, %v595_v2  ;;  %35 = vst.msk [vmem:[#allocation2 + $0x78] sm:$0xff] %vm19_vm1, %v595_v2  ;;  %557 = vmatprep.subr.bf16.mxu0 %v586_v5  ;;  %577 = vmatprep.subr.bf16.mxu1 %v586_v5  ;;  %v38_v13 = vld [vmem:[#allocation2 + $0x10] sm:$0xff]  ;;  %v36_v16 = vld [vmem:[#allocation2] sm:$0xff] }
   0x9   :  { %v39_v22 = vld [vmem:[#allocation2 + $0x18] sm:$0xff]  ;;  %v37_v28 = vld [vmem:[#allocation2 + $0x8] sm:$0xff] }
   0xa   :  { %v40_v40 = vld [vmem:[#allocation2 + $0x20] sm:$0xff]  ;;  %v41_v58 = vld [vmem:[#allocation2 + $0x28] sm:$0xff] }
   0xb   :  { %558 = vmatpush3.bf16.msra.mxu0 %v586_v5  ;;  %580 = vmatpush3.bf16.msra.mxu1 %v586_v5  ;;  %v42_v34 = vld [vmem:[#allocation2 + $0x30] sm:$0xff]  ;;  %v43_v50 = vld [vmem:[#allocation2 + $0x38] sm:$0xff] }
   0xc   :  { %v44_v18 = vld [vmem:[#allocation2 + $0x40] sm:$0xff]  ;;  %v45_v30 = vld [vmem:[#allocation2 + $0x48] sm:$0xff] }
   0xd   :  { %v46_v14 = vld [vmem:[#allocation2 + $0x50] sm:$0xff]  ;;  %v47_v24 = vld [vmem:[#allocation2 + $0x58] sm:$0xff] }
   0xe   :  { %560 = vmatmul.mubr.msk.bf16.vlgmr.msra.gmra.mxu0 %vm128_vm2, %v588_v7  ;;  %568 = vmatmul.mubr.msk.bf16.vlgmr.msra.gmra.mxu1 %vm128_vm2, %v592_v8  ;;  %v48_v44 = vld [vmem:[#allocation2 + $0x60] sm:$0xff] }
   0xf   :  { %563 = vmatprep.mubr.msk.bf16.mxu0 %vm128_vm2, %v589_v9  ;;  %571 = vmatprep.mubr.msk.bf16.mxu1 %vm128_vm2, %v593_v10  ;;  %v50_v36 = vld [vmem:[#allocation2 + $0x70] sm:$0xff] }
  0x16   :  { %564 = vmatmul.mubr.msk.bf16.gmra.mxu0 %vm128_vm2, %v590_v11  ;;  %572 = vmatmul.mubr.msk.bf16.gmra.mxu1 %vm128_vm2, %v594_v12 }
  0xce   :  { %v561_v15 = vpop.f32.mrf.mxu0  ;;  %v569_v17 = vpop.f32.mrf.mxu1 }
  0xcf   :  { %v256_v19 = vadd.f32 %v561_v15, %v38_v13  ;;  %v264_v20 = vadd.f32 %v569_v17, %v46_v14 }
  0xd0   :  { %v191_v21 = vpop.f32.mrf.mxu0  ;;  %v223_v23 = vpop.f32.mrf.mxu1 }
  0xd1   :  { %273 = vst.msk [vmem:[#allocation2 + $0x10] sm:$0xff] %vm19_vm1, %v256_v19  ;;  %v254_v25 = vadd.f32 %v191_v21, %v36_v16  ;;  %281 = vst.msk [vmem:[#allocation2 + $0x50] sm:$0xff] %vm19_vm1, %v264_v20  ;;  %v262_v26 = vadd.f32 %v223_v23, %v44_v18 }
  0xd2   :  { %v562_v27 = vpop.f32.mrf.mxu0  ;;  %v570_v29 = vpop.f32.mrf.mxu1 }
  0xd3   :  { %271 = vst.msk [vmem:[#allocation2] sm:$0xff] %vm19_vm1, %v254_v25  ;;  %v257_v31 = vadd.f32 %v562_v27, %v39_v22  ;;  %279 = vst.msk [vmem:[#allocation2 + $0x40] sm:$0xff] %vm19_vm1, %v262_v26  ;;  %v265_v32 = vadd.f32 %v570_v29, %v47_v24 }
  0xd4   :  { %v194_v33 = vpop.f32.mrf.mxu0  ;;  %v226_v35 = vpop.f32.mrf.mxu1 }
  0xd5   :  { %274 = vst.msk [vmem:[#allocation2 + $0x18] sm:$0xff] %vm19_vm1, %v257_v31  ;;  %v255_v37 = vadd.f32 %v194_v33, %v37_v28  ;;  %282 = vst.msk [vmem:[#allocation2 + $0x58] sm:$0xff] %vm19_vm1, %v265_v32  ;;  %v263_v38 = vadd.f32 %v226_v35, %v45_v30 }
  0xd6   :  { %v565_v39 = vpop.f32.mrf.mxu0  ;;  %v573_v41 = vpop.f32.mrf.mxu1 }
  0xd7   :  { %272 = vst.msk [vmem:[#allocation2 + $0x8] sm:$0xff] %vm19_vm1, %v255_v37  ;;  %v260_v42 = vadd.f32 %v565_v39, %v42_v34  ;;  %280 = vst.msk [vmem:[#allocation2 + $0x48] sm:$0xff] %vm19_vm1, %v263_v38  ;;  %v268_v43 = vadd.f32 %v573_v41, %v50_v36  ;;  %v51_v39 = vld [vmem:[#allocation2 + $0x78] sm:$0xff] }
  0xd8   :  { %v292_v45 = vld [vmem:[#allocation2 + $0x10] sm:$0xff]  ;;  %v207_v46 = vpop.f32.mrf.mxu0  ;;  %v239_v51 = vpop.f32.mrf.mxu1 }
  0xd9   :  { %v689_v47 = vld [vmem:[#allocation2 + $0x50] sm:$0xff]  ;;  %v528_v48 = vpack.c.bf16 %v292_v45, %v292_v45  ;;  %277 = vst.msk [vmem:[#allocation2 + $0x30] sm:$0xff] %vm19_vm1, %v260_v42  ;;  %v258_v49 = vadd.f32 %v207_v46, %v40_v40  ;;  %285 = vst.msk [vmem:[#allocation2 + $0x70] sm:$0xff] %vm19_vm1, %v268_v43  ;;  %v266_v56 = vadd.f32 %v239_v51, %v48_v44  ;;  %v390_v11 = vsel %vm19_vm1, %v292_v45, 0.0  ;;  %v49_v43 = vld [vmem:[#allocation2 + $0x68] sm:$0xff] }
  0xda   :  { %v290_v52 = vld [vmem:[#allocation2] sm:$0xff]  ;;  %v536_v53 = vpack.c.bf16 %v689_v47, %v689_v47  ;;  %v566_v54 = vpop.f32.mrf.mxu0  ;;  %v426_v2 = vmul.f32 %v292_v45, %v292_v45  ;;  %v574_v28 = vpop.f32.mrf.mxu1 }
  0xdb   :  { %v695_v55 = vld [vmem:[#allocation2 + $0x40] sm:$0xff]  ;;  %373 = vst.msk [vmem:[%s845_s2 + $0x8] sm:$0xf] %vm370_vm3, %v528_v48  ;;  %v526_v57 = vpack.c.bf16 %v290_v52, %v290_v52  ;;  %v261_v60 = vadd.f32 %v566_v54, %v43_v50  ;;  %v424_v0 = vmul.f32 %v290_v52, %v290_v52  ;;  %v387_v7 = vsel %vm19_vm1, %v290_v52, 0.0 }
  0xdc   :  { %275 = vst.msk [vmem:[#allocation2 + $0x20] sm:$0xff] %vm19_vm1, %v258_v49  ;;  %v293_v59 = vld [vmem:[#allocation2 + $0x18] sm:$0xff]  ;;  %v534_v61 = vpack.c.bf16 %v695_v55, %v695_v55  ;;  %v210_v62 = vpop.f32.mrf.mxu0  ;;  %283 = vst.msk [vmem:[#allocation2 + $0x60] sm:$0xff] %vm19_vm1, %v266_v56  ;;  %v443_v23 = vsel %vm19_vm1, %v426_v2, 0.0  ;;  %v242_v44 = vpop.f32.mrf.mxu1  ;;  %v269_v51 = vadd.f32 %v574_v28, %v51_v39  ;;  %v402_v2 = vsel %vm19_vm1, %v695_v55, 0.0 }
  0xdd   :  { %381 = vst.msk [vmem:[%s845_s2 + $0x28] sm:$0xf] %vm370_vm3, %v536_v53  ;;  %v708_v63 = vld [vmem:[#allocation2 + $0x58] sm:$0xff]  ;;  %371 = vst.msk [vmem:[%s845_s2] sm:$0xf] %vm370_vm3, %v526_v57  ;;  %v529_v1 = vpack.c.bf16 %v293_v59, %v293_v59  ;;  %v259_v4 = vadd.f32 %v210_v62, %v41_v58  ;;  %v440_v15 = vsel %vm19_vm1, %v424_v0, 0.0  ;;  %v427_v16 = vmul.f32 %v293_v59, %v293_v59 }
  0xde   :  { %v291_v3 = vld [vmem:[#allocation2 + $0x8] sm:$0xff]  ;;  %278 = vst.msk [vmem:[#allocation2 + $0x38] sm:$0xff] %vm19_vm1, %v261_v60  ;;  %v537_v5 = vpack.c.bf16 %v708_v63, %v708_v63  ;;  %v392_v24 = vsel %vm19_vm1, %v293_v59, 0.0  ;;  %v267_v56 = vadd.f32 %v242_v44, %v49_v43  ;;  %286 = vst.msk [vmem:[#allocation2 + $0x78] sm:$0xff] %vm19_vm1, %v269_v51 }
  0xdf   :  { %379 = vst.msk [vmem:[%s845_s2 + $0x20] sm:$0xf] %vm370_vm3, %v534_v61  ;;  %v722_v6 = vld [vmem:[#allocation2 + $0x48] sm:$0xff]  ;;  %374 = vst.msk [vmem:[%s845_s2 + $0xc] sm:$0xf] %vm370_vm3, %v529_v1  ;;  %v527_v8 = vpack.c.bf16 %v291_v3, %v291_v3  ;;  %v388_v9 = vsel %vm19_vm1, %v291_v3, 0.0  ;;  %v425_v10 = vmul.f32 %v291_v3, %v291_v3  ;;  %v432_v61 = vmul.f32 %v695_v55, %v695_v55 }
  0xe0   :  { %v389_v12 = vadd.f32 %v388_v9, %v387_v7  ;;  %v296_v13 = vld [vmem:[#allocation2 + $0x30] sm:$0xff]  ;;  %276 = vst.msk [vmem:[#allocation2 + $0x28] sm:$0xff] %vm19_vm1, %v259_v4  ;;  %v535_v14 = vpack.c.bf16 %v722_v6, %v722_v6  ;;  %v445_v32 = vsel %vm19_vm1, %v427_v16, 0.0  ;;  %284 = vst.msk [vmem:[#allocation2 + $0x68] sm:$0xff] %vm19_vm1, %v267_v56  ;;  %v433_v3 = vmul.f32 %v722_v6, %v722_v6 }
  0xe1   :  { %382 = vst.msk [vmem:[%s845_s2 + $0x2c] sm:$0xf] %vm370_vm3, %v537_v5  ;;  %372 = vst.msk [vmem:[%s845_s2 + $0x4] sm:$0xf] %vm370_vm3, %v527_v8  ;;  %v441_v17 = vsel %vm19_vm1, %v425_v10, 0.0  ;;  %v532_v18 = vpack.c.bf16 %v296_v13, %v296_v13  ;;  %v744_v19 = vld [vmem:[#allocation2 + $0x70] sm:$0xff]  ;;  %v430_v40 = vmul.f32 %v296_v13, %v296_v13  ;;  %v434_v7 = vmul.f32 %v689_v47, %v689_v47 }
  0xe2   :  { %v391_v20 = vadd.f32 %v390_v11, %v389_v12  ;;  %v442_v21 = vadd.f32 %v441_v17, %v440_v15  ;;  %380 = vst.msk [vmem:[%s845_s2 + $0x24] sm:$0xf] %vm370_vm3, %v535_v14  ;;  %v540_v31 = vpack.c.bf16 %v744_v19, %v744_v19  ;;  %v398_v52 = vsel %vm19_vm1, %v296_v13, 0.0 }
  0xe3   :  { %v294_v22 = vld [vmem:[#allocation2 + $0x20] sm:$0xff]  ;;  %377 = vst.msk [vmem:[%s845_s2 + $0x18] sm:$0xf] %vm370_vm3, %v532_v18  ;;  %v451_v59 = vsel %vm19_vm1, %v430_v40, 0.0  ;;  %v455_v8 = vsel %vm19_vm1, %v432_v61, 0.0  ;;  %v404_v9 = vsel %vm19_vm1, %v722_v6, 0.0  ;;  %v435_v55 = vmul.f32 %v708_v63, %v708_v63 }
  0xe4   :  { %v530_v25 = vpack.c.bf16 %v294_v22, %v294_v22  ;;  %v428_v26 = vmul.f32 %v294_v22, %v294_v22  ;;  %v756_v27 = vld [vmem:[#allocation2 + $0x60] sm:$0xff]  ;;  %v444_v29 = vadd.f32 %v443_v23, %v442_v21  ;;  %v393_v30 = vadd.f32 %v392_v24, %v391_v20  ;;  %385 = vst.msk [vmem:[%s845_s2 + $0x38] sm:$0xf] %vm370_vm3, %v540_v31 }
  0xe5   :  { %v394_v33 = vsel %vm19_vm1, %v294_v22, 0.0  ;;  %v297_v34 = vld [vmem:[#allocation2 + $0x38] sm:$0xff]  ;;  %v538_v35 = vpack.c.bf16 %v756_v27, %v756_v27  ;;  %v406_v12 = vsel %vm19_vm1, %v689_v47, 0.0  ;;  %v457_v13 = vsel %vm19_vm1, %v433_v3, 0.0 }
  0xe6   :  { %375 = vst.msk [vmem:[%s845_s2 + $0x10] sm:$0xf] %vm370_vm3, %v530_v25  ;;  %v395_v36 = vadd.f32 %v394_v33, %v393_v30  ;;  %v446_v37 = vadd.f32 %v445_v32, %v444_v29  ;;  %v533_v38 = vpack.c.bf16 %v297_v34, %v297_v34  ;;  %v447_v41 = vsel %vm19_vm1, %v428_v26, 0.0  ;;  %v305_v14 = vld [vmem:[#allocation2 + $0x78] sm:$0xff] }
  0xe7   :  { %v295_v42 = vld [vmem:[#allocation2 + $0x28] sm:$0xff]  ;;  %383 = vst.msk [vmem:[%s845_s2 + $0x30] sm:$0xf] %vm370_vm3, %v538_v35  ;;  %v431_v53 = vmul.f32 %v297_v34, %v297_v34  ;;  %v400_v60 = vsel %vm19_vm1, %v297_v34, 0.0  ;;  %v541_v17 = vpack.c.bf16 %v305_v14, %v305_v14  ;;  %v459_v20 = vsel %vm19_vm1, %v434_v7, 0.0 }
  0xe8   :  { %v448_v45 = vadd.f32 %v447_v41, %v446_v37  ;;  %378 = vst.msk [vmem:[%s845_s2 + $0x1c] sm:$0xf] %vm370_vm3, %v533_v38  ;;  %v531_v46 = vpack.c.bf16 %v295_v42, %v295_v42  ;;  %v396_v48 = vsel %vm19_vm1, %v295_v42, 0.0  ;;  %v429_v49 = vmul.f32 %v295_v42, %v295_v42  ;;  %v303_v18 = vld [vmem:[#allocation2 + $0x68] sm:$0xff] }
  0xe9   :  { %v397_v50 = vadd.f32 %v396_v48, %v395_v36  ;;  %v453_v1 = vsel %vm19_vm1, %v431_v53, 0.0  ;;  %v408_v6 = vsel %vm19_vm1, %v708_v63, 0.0  ;;  %v436_v21 = vmul.f32 %v756_v27, %v756_v27  ;;  %386 = vst.msk [vmem:[%s845_s2 + $0x3c] sm:$0xf] %vm370_vm3, %v541_v17 }
  0xea   :  { %376 = vst.msk [vmem:[%s845_s2 + $0x14] sm:$0xf] %vm370_vm3, %v531_v46  ;;  %v449_v54 = vsel %vm19_vm1, %v429_v49, 0.0  ;;  %v539_v22 = vpack.c.bf16 %v303_v18, %v303_v18  ;;  %v461_v24 = vsel %vm19_vm1, %v435_v55, 0.0  ;;  %v410_v25 = vsel %vm19_vm1, %v756_v27, 0.0 }
  0xeb   :  { %v399_v57 = vadd.f32 %v398_v52, %v397_v50  ;;  %v450_v58 = vadd.f32 %v449_v54, %v448_v45  ;;  %v437_v63 = vmul.f32 %v303_v18, %v303_v18  ;;  %v438_v29 = vmul.f32 %v744_v19, %v744_v19 }
  0xec   :  { %384 = vst.msk [vmem:[%s845_s2 + $0x34] sm:$0xf] %vm370_vm3, %v539_v22  ;;  %v463_v30 = vsel %vm19_vm1, %v436_v21, 0.0  ;;  %v412_v31 = vsel %vm19_vm1, %v303_v18, 0.0  ;;  %v414_v27 = vsel %vm19_vm1, %v744_v19, 0.0  ;;  %v439_v34 = vmul.f32 %v305_v14, %v305_v14 }
  0xed   :  { %v452_v62 = vadd.f32 %v451_v59, %v450_v58  ;;  %v401_v0 = vadd.f32 %v400_v60, %v399_v57  ;;  %v465_v35 = vsel %vm19_vm1, %v437_v63, 0.0  ;;  %v467_v38 = vsel %vm19_vm1, %v438_v29, 0.0 }
  0xee   :  { %v416_v39 = vsel %vm19_vm1, %v305_v14, 0.0  ;;  %v469_v42 = vsel %vm19_vm1, %v439_v34, 0.0 }
  0xef   :  { %v403_v4 = vadd.f32 %v402_v2, %v401_v0  ;;  %v454_v5 = vadd.f32 %v453_v1, %v452_v62 }
  0xf1   :  { %v405_v10 = vadd.f32 %v404_v9, %v403_v4  ;;  %v456_v11 = vadd.f32 %v455_v8, %v454_v5 }
  0xf3   :  { %v407_v15 = vadd.f32 %v406_v12, %v405_v10  ;;  %v458_v16 = vadd.f32 %v457_v13, %v456_v11 }
  0xf5   :  { %v460_v47 = vadd.f32 %v459_v20, %v458_v16  ;;  %v409_v23 = vadd.f32 %v408_v6, %v407_v15 }
  0xf7   :  { %v411_v26 = vadd.f32 %v410_v25, %v409_v23  ;;  %v462_v28 = vadd.f32 %v461_v24, %v460_v47 }
  0xf9   :  { %v464_v32 = vadd.f32 %v463_v30, %v462_v28  ;;  %v413_v33 = vadd.f32 %v412_v31, %v411_v26 }
  0xfb   :  { %v415_v36 = vadd.f32 %v414_v27, %v413_v33  ;;  %v466_v37 = vadd.f32 %v465_v35, %v464_v32 }
  0xfd   :  { %v417_v40 = vadd.f32 %v416_v39, %v415_v36  ;;  %v468_v41 = vadd.f32 %v467_v38, %v466_v37 }
  0xff   :  { %v418_v43 = vrot.slane %v417_v40, 4  ;;  %v470_v44 = vadd.f32 %v469_v42, %v468_v41 }
 0x101   :  { %v419_v45 = vadd.f32 %v418_v43, %v417_v40  ;;  %v471_v46 = vrot.slane %v470_v44, 4 }
 0x103   :  { %v420_v48 = vrot.slane %v419_v45, 2  ;;  %v472_v49 = vadd.f32 %v471_v46, %v470_v44 }
 0x105   :  { %v421_v19 = vadd.f32 %v420_v48, %v419_v45  ;;  %v473_v50 = vrot.slane %v472_v49, 2 }
 0x107   :  { %v422_v51 = vrot.slane %v421_v19, 1  ;;  %v474_v52 = vadd.f32 %v473_v50, %v472_v49 }
 0x109   :  { %v423_v53 = vadd.f32 %v422_v51, %v421_v19  ;;  %v475_v54 = vrot.slane %v474_v52, 1 }
 0x10b   :  { %v476_v56 = vadd.f32 %v475_v54, %v474_v52  ;;  %477 = vst.msk [vmem:[%s846_s3] sm:$0xff] %vm19_vm1, %v423_v53 }
 0x10d   :  { %478 = vst.msk [vmem:[%s847_s4] sm:$0xff] %vm19_vm1, %v476_v56 }

// kernel: resnet_block_forward.10
= control target key start
LH: loop header
LB: loop body
LE: loop exit
PB: predicated region body
PF: predicated region fallthrough
CT: control target
= control target key end

     0   :  { %s73_s0 = inlined_call_operand.vmem [shape: bf16[4,128], index: 0, kind: input, shape index: {}]   ;;  %s74_s1 = inlined_call_operand.vmem [shape: f32[1,128], index: 1, kind: input, shape index: {}]   ;;  %s75_s2 = inlined_call_operand.vmem [shape: f32[1,128], index: 2, kind: input, shape index: {}]   ;;  %s76_s3 = inlined_call_operand.vmem [shape: bf16[4,128], index: 3, kind: output, shape index: {}]  }
   0x1   :  { %v14_v0 = vld [vmem:[%s73_s0] sm:$0x3] }
   0x2   :  { %v39_v1 = vld [vmem:[%s74_s1] ss:$0 sm:$0xff]  ;;  %v15_v2 = vunpack.c.l.bf16 %v14_v0 }
   0x3   :  { %v40_v3 = vld [vmem:[%s75_s2] ss:$0 sm:$0xff] }
   0x4   :  { %v23_v4 = vmul.f32 %v39_v1, %v15_v2 }
   0x6   :  { %v31_v5 = vadd.f32 %v40_v3, %v23_v4 }
   0x8   :  { %v32_v6 = vmax.f32 %v31_v5, 0.0 }
   0xa   :  { %v33_v7 = vpack.c.bf16 %v32_v6, %v32_v6 }
   0xc   :  { %34 = vst [vmem:[%s76_s3] sm:$0x3] %v33_v7 }

// kernel: resnet_block_forward.13
= control target key start
LH: loop header
LB: loop body
LE: loop exit
PB: predicated region body
PF: predicated region fallthrough
CT: control target
= control target key end

     0   :  { %s125_s0 = inlined_call_operand.vmem [shape: f32[8,128], index: 0, kind: input, shape index: {}]   ;;  %s126_s1 = inlined_call_operand.vmem [shape: f32[1,128], index: 1, kind: input, shape index: {}]   ;;  %s127_s2 = inlined_call_operand.vmem [shape: f32[1,128], index: 2, kind: input, shape index: {}]   ;;  %s128_s3 = inlined_call_operand.vmem [shape: f32[8,128], index: 3, kind: input, shape index: {}]   ;;  %s129_s4 = inlined_call_operand.vmem [shape: f32[1,128], index: 4, kind: input, shape index: {}]   ;;  %s130_s5 = inlined_call_operand.vmem [shape: f32[1,128], index: 5, kind: input, shape index: {}]   ;;  %s131_s6 = inlined_call_operand.vmem [shape: f32[8,128], index: 6, kind: output, shape index: {}]  }
   0x1   :  { %v23_v0 = vld [vmem:[%s125_s0] sm:$0xff] }
   0x2   :  { %v65_v1 = vld [vmem:[%s126_s1] ss:$0 sm:$0xff] }
   0x3   :  { %v66_v2 = vld [vmem:[%s127_s2] ss:$0 sm:$0xff]  ;;  %v31_v3 = vmul.f32 %v65_v1, %v23_v0 }
   0x4   :  { %v41_v4 = vld [vmem:[%s128_s3] sm:$0xff] }
   0x5   :  { %v67_v5 = vld [vmem:[%s129_s4] ss:$0 sm:$0xff]  ;;  %v39_v8 = vadd.f32 %v66_v2, %v31_v3 }
   0x6   :  { %v68_v6 = vld [vmem:[%s130_s5] ss:$0 sm:$0xff]  ;;  %v49_v7 = vmul.f32 %v67_v5, %v41_v4 }
   0x7   :  { %v40_v10 = vmax.f32 %v39_v8, 0.0 }
   0x8   :  { %v57_v9 = vadd.f32 %v68_v6, %v49_v7 }
   0xa   :  { %v58_v11 = vadd.f32 %v57_v9, %v40_v10 }
   0xc   :  { %v59_v12 = vmax.f32 %v58_v11, 0.0 }
   0xe   :  { %60 = vst [vmem:[%s131_s6] sm:$0xff] %v59_v12 }

</bundles_post_ra>
